<compile_context>
chip_gen: v5e
topology: v5e:2x2
jax: 0.10.0
libtpu: 0.0.40
codegen_flags: <defaults>
</compile_context>

<pallas_src>
import functools

import jax
import jax.numpy as jnp
from jax.experimental import pallas as pl
from jax.experimental.pallas import tpu as pltpu


_MXU_DTYPE = jnp.bfloat16           # matmul operand dtype (accumulation stays f32)
_VMEM_LIMIT = 32 * 1024 * 1024      # conservative scoped-VMEM budget (v7x-safe)
_ROW_TILE = 512                     # row tile for the tiled linears
_LN_EPS = 1e-6                      # Cait uses LayerNorm(eps=1e-6)


def _cparams(n_parallel_axes):
    return pltpu.CompilerParams(
        dimension_semantics=("parallel",) * n_parallel_axes,
        vmem_limit_bytes=_VMEM_LIMIT)


def _row_tile(m):
    # biggest row tile that keeps VMEM modest; must be a multiple of 8 or the full M
    return m if m <= _ROW_TILE else _ROW_TILE


def _layernorm_rows(x, g, b):
    # biased variance + eps=1e-6, matching torch.nn.LayerNorm; statistics in f32
    mu = jnp.mean(x, axis=-1, keepdims=True)
    var = jnp.mean(jnp.square(x - mu), axis=-1, keepdims=True)
    return (x - mu) * jax.lax.rsqrt(var + _LN_EPS) * g + b


# ----------------------------------------------------------------------------- kernels

def _linear_kernel(x_ref, w_ref, b_ref, o_ref):
    # y = x @ w + b, bf16 operands, f32 accumulation
    o_ref[...] = jnp.dot(x_ref[...].astype(_MXU_DTYPE), w_ref[...].astype(_MXU_DTYPE),
                         preferred_element_type=jnp.float32) + b_ref[...]


def _ln_linear_kernel(x_ref, g_ref, b_ref, w_ref, wb_ref, o_ref):
    # y = LayerNorm(x) @ w + wb   (LN fused into the matmul prologue)
    xn = _layernorm_rows(x_ref[...], g_ref[...], b_ref[...])
    o_ref[...] = jnp.dot(xn.astype(_MXU_DTYPE), w_ref[...].astype(_MXU_DTYPE),
                         preferred_element_type=jnp.float32) + wb_ref[...]


def _linear_scale_res_kernel(x_ref, w_ref, b_ref, gamma_ref, res_ref, o_ref):
    # y = res + gamma * (x @ w + b)   (layer-scale + residual fused into the epilogue)
    y = jnp.dot(x_ref[...].astype(_MXU_DTYPE), w_ref[...].astype(_MXU_DTYPE),
                preferred_element_type=jnp.float32) + b_ref[...]
    o_ref[...] = res_ref[...] + gamma_ref[...] * y


def _th_attn_kernel(qkv_ref, wl_ref, bl_ref, ww_ref, bw_ref, o_ref,
                    *, num_heads, head_dim, scale):
    # Fused talking-heads attention for one batch element.
    #   qkv_ref: (1, N, 3C) f32   wl/ww: (H, H) f32 in SMEM   bl/bw: (H,) f32 in SMEM
    #   o_ref:   (1, N, C)  f32   (per-head outputs concatenated -> lane-dense C)
    H, d = num_heads, head_dim
    C = H * d
    qkv = qkv_ref[0].astype(_MXU_DTYPE)                       # (N, 3C)
    q = jnp.stack([qkv[:, h * d:(h + 1) * d] for h in range(H)], axis=0)          # (H,N,d)
    k = jnp.stack([qkv[:, C + h * d:C + (h + 1) * d] for h in range(H)], axis=0)
    v = jnp.stack([qkv[:, 2 * C + h * d:2 * C + (h + 1) * d] for h in range(H)], axis=0)

    # q k^T for all heads; accumulate in f32, apply the head-dim scale in f32
    attn = jnp.einsum('hqd,hkd->hqk', q, k,
                      preferred_element_type=jnp.float32) * scale                 # (H,N,N)

    def head_mix(a, w_ref, b_ref):
        # torch nn.Linear over the head axis: out[g] = sum_h w[g,h] * a[h] + b[g]
        # lane axis stays = N (key dim); H*H scalar*slab multiply-adds on the VPU.
        mixed = []
        for g in range(H):
            s = a[0] * w_ref[g, 0]
            for h in range(1, H):
                s = s + a[h] * w_ref[g, h]
            mixed.append(s + b_ref[g])
        return jnp.stack(mixed, axis=0)

    attn = head_mix(attn, wl_ref, bl_ref)                     # proj_l (pre-softmax)
    attn = attn - jnp.max(attn, axis=-1, keepdims=True)       # f32 softmax
    attn = jnp.exp(attn)
    attn = attn / jnp.sum(attn, axis=-1, keepdims=True)
    attn = head_mix(attn, ww_ref, bw_ref)                     # proj_w (post-softmax)

    out = jnp.einsum('hqk,hkd->hqd', attn.astype(_MXU_DTYPE), v,
                     preferred_element_type=jnp.float32)      # (H, N, d)
    o_ref[0] = jnp.concatenate([out[h] for h in range(H)], axis=-1)  # (N, C)


def _class_attn_kernel(x_ref, cls_ref, g_ref, b_ref, qw_ref, qb_ref, kw_ref, kb_ref,
                       vw_ref, vb_ref, pw_ref, pb_ref, gamma_ref, o_ref,
                       *, num_heads, head_dim, scale):
    # Fused ClassAttn for one batch element:
    #   LN1(concat(cls, x)) -> q/k/v projections -> per-head softmax attention over
    #   all tokens -> output proj -> cls + gamma_1 * (...)
    H, d = num_heads, head_dim
    cls = cls_ref[0]                                          # (1, C) f32
    u = jnp.concatenate([cls, x_ref[0]], axis=0)              # (N+1, C)
    un = _layernorm_rows(u, g_ref[...], b_ref[...])
    un_c = un.astype(_MXU_DTYPE)

    q = (jnp.dot(un_c[0:1], qw_ref[...].astype(_MXU_DTYPE),
                 preferred_element_type=jnp.float32) + qb_ref[...]) * scale        # (1, C)
    k = jnp.dot(un_c, kw_ref[...].astype(_MXU_DTYPE),
                preferred_element_type=jnp.float32) + kb_ref[...]                  # (Nu, C)
    v = jnp.dot(un_c, vw_ref[...].astype(_MXU_DTYPE),
                preferred_element_type=jnp.float32) + vb_ref[...]                  # (Nu, C)

    q_c = q.astype(_MXU_DTYPE)
    k_c = k.astype(_MXU_DTYPE)
    v_c = v.astype(_MXU_DTYPE)

    outs = []
    for h in range(H):
        a = jnp.einsum('qd,kd->qk', q_c[:, h * d:(h + 1) * d], k_c[:, h * d:(h + 1) * d],
                       preferred_element_type=jnp.float32)    # (1, Nu)
        a = a - jnp.max(a, axis=-1, keepdims=True)            # f32 softmax
        a = jnp.exp(a)
        a = a / jnp.sum(a, axis=-1, keepdims=True)
        outs.append(jnp.dot(a.astype(_MXU_DTYPE), v_c[:, h * d:(h + 1) * d],
                            preferred_element_type=jnp.float32))                  # (1, d)
    attn_out = jnp.concatenate(outs, axis=-1)                 # (1, C)

    y = jnp.dot(attn_out.astype(_MXU_DTYPE), pw_ref[...].astype(_MXU_DTYPE),
                preferred_element_type=jnp.float32) + pb_ref[...]
    o_ref[0] = cls + gamma_ref[...] * y                       # residual + layer-scale


# ---------------------------------------------------------------------------- wrappers

def linear(x2d, w, b):
    M, K = x2d.shape
    N = w.shape[1]
    tm = _row_tile(M)
    return pl.pallas_call(
        _linear_kernel,
        grid=(pl.cdiv(M, tm),),
        in_specs=[pl.BlockSpec((tm, K), lambda i: (i, 0)),
                  pl.BlockSpec((K, N), lambda i: (0, 0)),       # resident weight
                  pl.BlockSpec((1, N), lambda i: (0, 0))],
        out_specs=pl.BlockSpec((tm, N), lambda i: (i, 0)),
        out_shape=jax.ShapeDtypeStruct((M, N), jnp.float32),
        compiler_params=_cparams(1),
    )(x2d, w, b.reshape(1, N))


def ln_linear(x2d, g, b, w, wb):
    M, K = x2d.shape
    N = w.shape[1]
    tm = _row_tile(M)
    return pl.pallas_call(
        _ln_linear_kernel,
        grid=(pl.cdiv(M, tm),),
        in_specs=[pl.BlockSpec((tm, K), lambda i: (i, 0)),
                  pl.BlockSpec((1, K), lambda i: (0, 0)),
                  pl.BlockSpec((1, K), lambda i: (0, 0)),
                  pl.BlockSpec((K, N), lambda i: (0, 0)),       # resident weight
                  pl.BlockSpec((1, N), lambda i: (0, 0))],
        out_specs=pl.BlockSpec((tm, N), lambda i: (i, 0)),
        out_shape=jax.ShapeDtypeStruct((M, N), jnp.float32),
        compiler_params=_cparams(1),
    )(x2d, g.reshape(1, K), b.reshape(1, K), w, wb.reshape(1, N))


def linear_scale_res(x2d, w, b, gamma, res2d):
    M, K = x2d.shape
    N = w.shape[1]
    tm = _row_tile(M)
    return pl.pallas_call(
        _linear_scale_res_kernel,
        grid=(pl.cdiv(M, tm),),
        in_specs=[pl.BlockSpec((tm, K), lambda i: (i, 0)),
                  pl.BlockSpec((K, N), lambda i: (0, 0)),       # resident weight
                  pl.BlockSpec((1, N), lambda i: (0, 0)),
                  pl.BlockSpec((1, N), lambda i: (0, 0)),
                  pl.BlockSpec((tm, N), lambda i: (i, 0))],     # residual tile
        out_specs=pl.BlockSpec((tm, N), lambda i: (i, 0)),
        out_shape=jax.ShapeDtypeStruct((M, N), jnp.float32),
        compiler_params=_cparams(1),
    )(x2d, w, b.reshape(1, N), gamma.reshape(1, N), res2d)


def talking_head_attention(qkv_bnc, p, num_heads):
    B, N, C3 = qkv_bnc.shape
    C = C3 // 3
    d = C // num_heads
    kernel = functools.partial(_th_attn_kernel, num_heads=num_heads, head_dim=d,
                               scale=d ** (-0.5))
    smem = pl.BlockSpec(memory_space=pltpu.MemorySpace.SMEM)
    return pl.pallas_call(
        kernel,
        grid=(B,),
        in_specs=[pl.BlockSpec((1, N, C3), lambda b: (b, 0, 0)),
                  smem, smem, smem, smem],                      # proj_l / proj_w params
        out_specs=pl.BlockSpec((1, N, C), lambda b: (b, 0, 0)),
        out_shape=jax.ShapeDtypeStruct((B, N, C), jnp.float32),
        compiler_params=_cparams(1),
    )(qkv_bnc, p['proj_l_w'], p['proj_l_b'], p['proj_w_w'], p['proj_w_b'])


def class_attention(x, x_cls, p, num_heads):
    B, N, C = x.shape
    d = C // num_heads
    kernel = functools.partial(_class_attn_kernel, num_heads=num_heads, head_dim=d,
                               scale=d ** (-0.5))
    wfull = lambda shape: pl.BlockSpec(shape, lambda b: (0, 0))
    return pl.pallas_call(
        kernel,
        grid=(B,),
        in_specs=[pl.BlockSpec((1, N, C), lambda b: (b, 0, 0)),
                  pl.BlockSpec((1, 1, C), lambda b: (b, 0, 0)),
                  wfull((1, C)), wfull((1, C)),                 # norm1 gamma / beta
                  wfull((C, C)), wfull((1, C)),                 # q
                  wfull((C, C)), wfull((1, C)),                 # k
                  wfull((C, C)), wfull((1, C)),                 # v
                  wfull((C, C)), wfull((1, C)),                 # proj
                  wfull((1, C))],                               # gamma_1
        out_specs=pl.BlockSpec((1, 1, C), lambda b: (b, 0, 0)),
        out_shape=jax.ShapeDtypeStruct((B, 1, C), jnp.float32),
        compiler_params=_cparams(1),
    )(x, x_cls,
      p['norm1_g'].reshape(1, C), p['norm1_b'].reshape(1, C),
      p['q_w'], p['q_b'].reshape(1, C),
      p['k_w'], p['k_b'].reshape(1, C),
      p['v_w'], p['v_b'].reshape(1, C),
      p['proj_w'], p['proj_b'].reshape(1, C),
      p['gamma_1'].reshape(1, C))


# --------------------------------------------------------------------------- sub-modules

def _mlp_residual(x2d, p):
    # x + gamma_2 * fc2(GELU(fc1(LN2(x)))) ; LN fused into fc1, gamma+residual into fc2
    h = ln_linear(x2d, p['norm2_g'], p['norm2_b'], p['fc1_w'], p['fc1_b'])
    # TODO(synk): exact-erf GELU kept as XLA elementwise glue (not fused into the kernels).
    h = jax.nn.gelu(h, approximate=False)
    return linear_scale_res(h, p['fc2_w'], p['fc2_b'], p['gamma_2'], x2d)


def layer_scale_block(x, p, num_heads):
    B, N, C = x.shape
    x2d = x.reshape(B * N, C)
    # LN1 fused into the qkv projection
    qkv = ln_linear(x2d, p['norm1_g'], p['norm1_b'], p['qkv_w'], p['qkv_b'])
    # fused talking-heads attention (per-batch grid, attention slab stays in VMEM)
    attn = talking_head_attention(qkv.reshape(B, N, 3 * C), p, num_heads)
    # output projection with fused layer-scale + residual
    x2d = linear_scale_res(attn.reshape(B * N, C), p['proj_w'], p['proj_b'],
                           p['gamma_1'], x2d)
    x2d = _mlp_residual(x2d, p)
    return x2d.reshape(B, N, C)


def layer_scale_block_class_attn(x, x_cls, p, num_heads):
    B, _, C = x.shape
    # fused: LN1(cat(cls,x)) + class-attention + proj + gamma_1 + residual
    x_cls = class_attention(x, x_cls, p, num_heads)
    cls2d = _mlp_residual(x_cls.reshape(B, C), p)
    return cls2d.reshape(B, 1, C)


# ----------------------------------------------------------------------------- model

def cait_forward(x_nchw, params, cfg):
    B, Cin, Himg, Wimg = x_nchw.shape
    ps = cfg['patch_size']
    E = cfg['embed_dim']
    gh, gw = Himg // ps, Wimg // ps

    # patch embed: Conv2d(k=ps, stride=ps) == non-overlapping-patch extract + matmul
    # TODO(synk): patch extraction transpose kept in XLA (one-time layout cost); could be
    #             folded into the linear's BlockSpec index_map for large images.
    patches = x_nchw.reshape(B, Cin, gh, ps, gw, ps)
    patches = patches.transpose(0, 2, 4, 1, 3, 5).reshape(B * gh * gw, Cin * ps * ps)
    x = linear(patches, params['patch_w'], params['patch_b']).reshape(B, gh * gw, E)

    x = x + params['pos_embed']                              # pos_drop is identity (p=0)

    for p in params['blocks']:
        x = layer_scale_block(x, p, cfg['num_heads'])

    cls = jnp.broadcast_to(params['cls_token'], (B, 1, E))
    for p in params['blocks_token_only']:
        cls = layer_scale_block_class_attn(x, cls, p, cfg['num_heads'])

    # global_pool == 'token': the final LayerNorm is row-wise, so norm(cat(cls, x))[:, 0]
    # == norm(cls); fuse that norm directly into the classifier head matmul.
    return ln_linear(cls.reshape(B, E), params['norm_g'], params['norm_b'],
                     params['head_w'], params['head_b'])


# -------------------------------------------------------------------------- param init

def init_params(key, cfg):
    ks = iter(jax.random.split(key, 256))
    E = cfg['embed_dim']
    H = cfg['num_heads']
    ps = cfg['patch_size']
    Cin = cfg['in_chans']
    hid = int(E * cfg['mlp_ratio'])
    hid_tok = int(E * cfg['mlp_ratio_token_only'])
    N = (cfg['img_size'] // ps) ** 2
    iv = cfg['init_values']

    def tn(shape, std=0.02):
        return std * jax.random.truncated_normal(next(ks), -2.0, 2.0, shape, jnp.float32)

    def tnw(shape, std=0.02):
        # large matmul weights stored in bf16 (MXU operand dtype); biases/LN/gamma stay f32
        return tn(shape, std).astype(_MXU_DTYPE)

    zeros = lambda s: jnp.zeros(s, jnp.float32)
    ones = lambda s: jnp.ones(s, jnp.float32)

    params = {
        'patch_w': tnw((Cin * ps * ps, E)),   # flattened Conv2d weight (E,Cin,ps,ps).T
        'patch_b': zeros((E,)),
        'cls_token': tn((1, 1, E)),
        'pos_embed': tn((1, N, E)),
        'norm_g': ones((E,)), 'norm_b': zeros((E,)),
        'head_w': tnw((E, cfg['num_classes'])), 'head_b': zeros((cfg['num_classes'],)),
    }

    blocks = []
    for _ in range(cfg['depth']):
        blocks.append({
            'norm1_g': ones((E,)), 'norm1_b': zeros((E,)),
            'norm2_g': ones((E,)), 'norm2_b': zeros((E,)),
            'qkv_w': tnw((E, 3 * E)), 'qkv_b': zeros((3 * E,)),
            'proj_w': tnw((E, E)), 'proj_b': zeros((E,)),
            'proj_l_w': tn((H, H)), 'proj_l_b': zeros((H,)),    # (out, in) layout, f32/SMEM
            'proj_w_w': tn((H, H)), 'proj_w_b': zeros((H,)),
            'fc1_w': tnw((E, hid)), 'fc1_b': zeros((hid,)),
            'fc2_w': tnw((hid, E)), 'fc2_b': zeros((E,)),
            'gamma_1': iv * ones((E,)), 'gamma_2': iv * ones((E,)),
        })
    params['blocks'] = blocks

    blocks_tok = []
    for _ in range(cfg['depth_token_only']):
        blocks_tok.append({
            'norm1_g': ones((E,)), 'norm1_b': zeros((E,)),
            'norm2_g': ones((E,)), 'norm2_b': zeros((E,)),
            'q_w': tnw((E, E)), 'q_b': zeros((E,)),
            'k_w': tnw((E, E)), 'k_b': zeros((E,)),
            'v_w': tnw((E, E)), 'v_b': zeros((E,)),
            'proj_w': tnw((E, E)), 'proj_b': zeros((E,)),
            'fc1_w': tnw((E, hid_tok)), 'fc1_b': zeros((hid_tok,)),
            'fc2_w': tnw((hid_tok, E)), 'fc2_b': zeros((E,)),
            'gamma_1': iv * ones((E,)), 'gamma_2': iv * ones((E,)),
        })
    params['blocks_token_only'] = blocks_tok
    return params


# ------------------------------------------------------------------------------- main

if __name__ == "__main__":
    cfg = dict(
        img_size=16, patch_size=4, in_chans=3, num_classes=10,
        embed_dim=32, depth=2, num_heads=4, mlp_ratio=4.0,
        depth_token_only=2, mlp_ratio_token_only=4.0, init_values=1e-4,
    )

    key = jax.random.PRNGKey(0)
    k_params, k_x = jax.random.split(key)
    params = init_params(k_params, cfg)

    x = jax.random.normal(k_x, (2, cfg['in_chans'], cfg['img_size'], cfg['img_size']),
                          dtype=jnp.float32)  # NCHW, like the PyTorch module

    fwd = jax.jit(functools.partial(cait_forward, cfg=cfg))
    logits = fwd(x, params)
    jax.block_until_ready(logits)

    assert logits.shape == (2, cfg['num_classes'])
    assert bool(jnp.all(jnp.isfinite(logits)))
    print("KERNEL_OK")
</pallas_src>

<mosaic_0001>
module attributes {stable_mosaic.version = 11 : i64} {
  func.func @_linear_kernel(%arg0: i32, %arg1: memref<32x48xf32, #tpu.memory_space<vmem>>, %arg2: memref<48x32xbf16, #tpu.memory_space<vmem>>, %arg3: memref<1x32xf32, #tpu.memory_space<vmem>>, %arg4: memref<32x32xf32, #tpu.memory_space<vmem>>) attributes {dimension_semantics = [#tpu.dimension_semantics<parallel>], iteration_bounds = array<i64: 1>, scalar_prefetch = 0 : i64, scratch_operands = 0 : i64, tpu.core_type = #tpu.core_type<tc>, window_params = [{transform_indices = @transform_0, window_bounds = array<i64: 32, 48>}, {pipeline_mode = #tpu.pipeline_mode<synchronous>, transform_indices = @transform_1, window_bounds = array<i64: 48, 32>}, {pipeline_mode = #tpu.pipeline_mode<synchronous>, transform_indices = @transform_2, window_bounds = array<i64: 1, 32>}, {transform_indices = @transform_3, window_bounds = array<i64: 32, 32>}]} {
    %c0 = arith.constant 0 : index
    %c0_0 = arith.constant 0 : index
    %0 = vector.load %arg1[%c0, %c0_0] : memref<32x48xf32, #tpu.memory_space<vmem>>, vector<32x48xf32>
    %1 = arith.truncf %0 : vector<32x48xf32> to vector<32x48xbf16>
    %c0_1 = arith.constant 0 : index
    %c0_2 = arith.constant 0 : index
    %2 = vector.load %arg2[%c0_1, %c0_2] : memref<48x32xbf16, #tpu.memory_space<vmem>>, vector<48x32xbf16>
    %cst = arith.constant dense<0.000000e+00> : vector<32x32xf32>
    %3 = tpu.matmul %1, %2, %cst {dimension_numbers = #tpu.dot_dimension_numbers<[1], [0], [0], [1], [0, 0, 1, 1], [], []>} : vector<32x48xbf16>, vector<48x32xbf16>, vector<32x32xf32> -> vector<32x32xf32>
    %c0_3 = arith.constant 0 : index
    %c0_4 = arith.constant 0 : index
    %4 = vector.load %arg3[%c0_3, %c0_4] : memref<1x32xf32, #tpu.memory_space<vmem>>, vector<1x32xf32>
    %5 = vector.broadcast %4 : vector<1x32xf32> to vector<32x32xf32>
    %6 = arith.addf %3, %5 : vector<32x32xf32>
    %c0_5 = arith.constant 0 : index
    %c0_6 = arith.constant 0 : index
    %7 = vector.load %arg4[%c0_5, %c0_6] : memref<32x32xf32, #tpu.memory_space<vmem>>, vector<32x32xf32>
    tpu.vector_store %arg4[%c0_5, %c0_6], %6 {strides = array<i32>} : memref<32x32xf32, #tpu.memory_space<vmem>>, vector<32x32xf32>,
    return
  }
  func.func @transform_0(%arg0: i32) -> (i32, i32) {
    %c0_i32 = arith.constant 0 : i32
    %c0_i32_0 = arith.constant 0 : i32
    return %arg0, %c0_i32 : i32, i32
  }
  func.func @transform_1(%arg0: i32) -> (i32, i32) {
    %c0_i32 = arith.constant 0 : i32
    %c0_i32_0 = arith.constant 0 : i32
    %c0_i32_1 = arith.constant 0 : i32
    return %c0_i32, %c0_i32_0 : i32, i32
  }
  func.func @transform_2(%arg0: i32) -> (i32, i32) {
    %c0_i32 = arith.constant 0 : i32
    %c0_i32_0 = arith.constant 0 : i32
    %c0_i32_1 = arith.constant 0 : i32
    return %c0_i32, %c0_i32_0 : i32, i32
  }
  func.func @transform_3(%arg0: i32) -> (i32, i32) {
    %c0_i32 = arith.constant 0 : i32
    %c0_i32_0 = arith.constant 0 : i32
    return %arg0, %c0_i32 : i32, i32
  }
}

module attributes {stable_mosaic.version = 11 : i64} {
  func.func @_linear_scale_res_kernel(%arg0: i32, %arg1: memref<32x32xf32, #tpu.memory_space<vmem>>, %arg2: memref<32x32xbf16, #tpu.memory_space<vmem>>, %arg3: memref<1x32xf32, #tpu.memory_space<vmem>>, %arg4: memref<1x32xf32, #tpu.memory_space<vmem>>, %arg5: memref<32x32xf32, #tpu.memory_space<vmem>>, %arg6: memref<32x32xf32, #tpu.memory_space<vmem>>) attributes {dimension_semantics = [#tpu.dimension_semantics<parallel>], iteration_bounds = array<i64: 1>, scalar_prefetch = 0 : i64, scratch_operands = 0 : i64, tpu.core_type = #tpu.core_type<tc>, window_params = [{transform_indices = @transform_0, window_bounds = array<i64: 32, 32>}, {pipeline_mode = #tpu.pipeline_mode<synchronous>, transform_indices = @transform_1, window_bounds = array<i64: 32, 32>}, {pipeline_mode = #tpu.pipeline_mode<synchronous>, transform_indices = @transform_2, window_bounds = array<i64: 1, 32>}, {pipeline_mode = #tpu.pipeline_mode<synchronous>, transform_indices = @transform_3, window_bounds = array<i64: 1, 32>}, {transform_indices = @transform_4, window_bounds = array<i64: 32, 32>}, {transform_indices = @transform_5, window_bounds = array<i64: 32, 32>}]} {
    %c0 = arith.constant 0 : index
    %c0_0 = arith.constant 0 : index
    %0 = vector.load %arg1[%c0, %c0_0] : memref<32x32xf32, #tpu.memory_space<vmem>>, vector<32x32xf32>
    %1 = arith.truncf %0 : vector<32x32xf32> to vector<32x32xbf16>
    %c0_1 = arith.constant 0 : index
    %c0_2 = arith.constant 0 : index
    %2 = vector.load %arg2[%c0_1, %c0_2] : memref<32x32xbf16, #tpu.memory_space<vmem>>, vector<32x32xbf16>
    %cst = arith.constant dense<0.000000e+00> : vector<32x32xf32>
    %3 = tpu.matmul %1, %2, %cst {dimension_numbers = #tpu.dot_dimension_numbers<[1], [0], [0], [1], [0, 0, 1, 1], [], []>} : vector<32x32xbf16>, vector<32x32xbf16>, vector<32x32xf32> -> vector<32x32xf32>
    %c0_3 = arith.constant 0 : index
    %c0_4 = arith.constant 0 : index
    %4 = vector.load %arg3[%c0_3, %c0_4] : memref<1x32xf32, #tpu.memory_space<vmem>>, vector<1x32xf32>
    %5 = vector.broadcast %4 : vector<1x32xf32> to vector<32x32xf32>
    %6 = arith.addf %3, %5 : vector<32x32xf32>
    %c0_5 = arith.constant 0 : index
    %c0_6 = arith.constant 0 : index
    %7 = vector.load %arg5[%c0_5, %c0_6] : memref<32x32xf32, #tpu.memory_space<vmem>>, vector<32x32xf32>
    %c0_7 = arith.constant 0 : index
    %c0_8 = arith.constant 0 : index
    %8 = vector.load %arg4[%c0_7, %c0_8] : memref<1x32xf32, #tpu.memory_space<vmem>>, vector<1x32xf32>
    %9 = vector.broadcast %8 : vector<1x32xf32> to vector<32x32xf32>
    %10 = arith.mulf %9, %6 : vector<32x32xf32>
    %11 = arith.addf %7, %10 : vector<32x32xf32>
    %c0_9 = arith.constant 0 : index
    %c0_10 = arith.constant 0 : index
    %12 = vector.load %arg6[%c0_9, %c0_10] : memref<32x32xf32, #tpu.memory_space<vmem>>, vector<32x32xf32>
    tpu.vector_store %arg6[%c0_9, %c0_10], %11 {strides = array<i32>} : memref<32x32xf32, #tpu.memory_space<vmem>>, vector<32x32xf32>,
    return
  }
  func.func @transform_0(%arg0: i32) -> (i32, i32) {
    %c0_i32 = arith.constant 0 : i32
    %c0_i32_0 = arith.constant 0 : i32
    return %arg0, %c0_i32 : i32, i32
  }
  func.func @transform_1(%arg0: i32) -> (i32, i32) {
    %c0_i32 = arith.constant 0 : i32
    %c0_i32_0 = arith.constant 0 : i32
    %c0_i32_1 = arith.constant 0 : i32
    return %c0_i32, %c0_i32_0 : i32, i32
  }
  func.func @transform_2(%arg0: i32) -> (i32, i32) {
    %c0_i32 = arith.constant 0 : i32
    %c0_i32_0 = arith.constant 0 : i32
    %c0_i32_1 = arith.constant 0 : i32
    return %c0_i32, %c0_i32_0 : i32, i32
  }
  func.func @transform_3(%arg0: i32) -> (i32, i32) {
    %c0_i32 = arith.constant 0 : i32
    %c0_i32_0 = arith.constant 0 : i32
    %c0_i32_1 = arith.constant 0 : i32
    return %c0_i32, %c0_i32_0 : i32, i32
  }
  func.func @transform_4(%arg0: i32) -> (i32, i32) {
    %c0_i32 = arith.constant 0 : i32
    %c0_i32_0 = arith.constant 0 : i32
    return %arg0, %c0_i32 : i32, i32
  }
  func.func @transform_5(%arg0: i32) -> (i32, i32) {
    %c0_i32 = arith.constant 0 : i32
    %c0_i32_0 = arith.constant 0 : i32
    return %arg0, %c0_i32 : i32, i32
  }
}

module attributes {stable_mosaic.version = 11 : i64} {
  func.func @_ln_linear_kernel(%arg0: i32, %arg1: memref<32x32xf32, #tpu.memory_space<vmem>>, %arg2: memref<1x32xf32, #tpu.memory_space<vmem>>, %arg3: memref<1x32xf32, #tpu.memory_space<vmem>>, %arg4: memref<32x96xbf16, #tpu.memory_space<vmem>>, %arg5: memref<1x96xf32, #tpu.memory_space<vmem>>, %arg6: memref<32x96xf32, #tpu.memory_space<vmem>>) attributes {dimension_semantics = [#tpu.dimension_semantics<parallel>], iteration_bounds = array<i64: 1>, scalar_prefetch = 0 : i64, scratch_operands = 0 : i64, tpu.core_type = #tpu.core_type<tc>, window_params = [{transform_indices = @transform_0, window_bounds = array<i64: 32, 32>}, {pipeline_mode = #tpu.pipeline_mode<synchronous>, transform_indices = @transform_1, window_bounds = array<i64: 1, 32>}, {pipeline_mode = #tpu.pipeline_mode<synchronous>, transform_indices = @transform_2, window_bounds = array<i64: 1, 32>}, {pipeline_mode = #tpu.pipeline_mode<synchronous>, transform_indices = @transform_3, window_bounds = array<i64: 32, 96>}, {pipeline_mode = #tpu.pipeline_mode<synchronous>, transform_indices = @transform_4, window_bounds = array<i64: 1, 96>}, {transform_indices = @transform_5, window_bounds = array<i64: 32, 96>}]} {
    %c0 = arith.constant 0 : index
    %c0_0 = arith.constant 0 : index
    %0 = vector.load %arg1[%c0, %c0_0] : memref<32x32xf32, #tpu.memory_space<vmem>>, vector<32x32xf32>
    %c0_1 = arith.constant 0 : index
    %c0_2 = arith.constant 0 : index
    %1 = vector.load %arg2[%c0_1, %c0_2] : memref<1x32xf32, #tpu.memory_space<vmem>>, vector<1x32xf32>
    %c0_3 = arith.constant 0 : index
    %c0_4 = arith.constant 0 : index
    %2 = vector.load %arg3[%c0_3, %c0_4] : memref<1x32xf32, #tpu.memory_space<vmem>>, vector<1x32xf32>
    %cst = arith.constant dense<0.000000e+00> : vector<32xf32>
    %3 = vector.multi_reduction <add>, %0, %cst [1] : vector<32x32xf32> to vector<32xf32>
    %4 = vector.shape_cast %3 : vector<32xf32> to vector<32x1xf32>
    %cst_5 = arith.constant 3.200000e+01 : f32
    %5 = vector.broadcast %cst_5 : f32 to vector<32x1xf32>
    %6 = arith.divf %4, %5 : vector<32x1xf32>
    %7 = vector.broadcast %6 : vector<32x1xf32> to vector<32x32xf32>
    %8 = arith.subf %0, %7 : vector<32x32xf32>
    %9 = arith.mulf %8, %8 : vector<32x32xf32>
    %cst_6 = arith.constant dense<0.000000e+00> : vector<32xf32>
    %10 = vector.multi_reduction <add>, %9, %cst_6 [1] : vector<32x32xf32> to vector<32xf32>
    %11 = vector.shape_cast %10 : vector<32xf32> to vector<32x1xf32>
    %cst_7 = arith.constant 3.200000e+01 : f32
    %12 = vector.broadcast %cst_7 : f32 to vector<32x1xf32>
    %13 = arith.divf %11, %12 : vector<32x1xf32>
    %14 = vector.broadcast %6 : vector<32x1xf32> to vector<32x32xf32>
    %15 = arith.subf %0, %14 : vector<32x32xf32>
    %cst_8 = arith.constant 9.99999997E-7 : f32
    %16 = vector.broadcast %cst_8 : f32 to vector<32x1xf32>
    %17 = arith.addf %13, %16 : vector<32x1xf32>
    %18 = math.rsqrt %17 : vector<32x1xf32>
    %19 = vector.broadcast %18 : vector<32x1xf32> to vector<32x32xf32>
    %20 = arith.mulf %15, %19 : vector<32x32xf32>
    %21 = vector.broadcast %1 : vector<1x32xf32> to vector<32x32xf32>
    %22 = arith.mulf %20, %21 : vector<32x32xf32>
    %23 = vector.broadcast %2 : vector<1x32xf32> to vector<32x32xf32>
    %24 = arith.addf %22, %23 : vector<32x32xf32>
    %25 = arith.truncf %24 : vector<32x32xf32> to vector<32x32xbf16>
    %c0_9 = arith.constant 0 : index
    %c0_10 = arith.constant 0 : index
    %26 = vector.load %arg4[%c0_9, %c0_10] : memref<32x96xbf16, #tpu.memory_space<vmem>>, vector<32x96xbf16>
    %cst_11 = arith.constant dense<0.000000e+00> : vector<32x96xf32>
    %27 = tpu.matmul %25, %26, %cst_11 {dimension_numbers = #tpu.dot_dimension_numbers<[1], [0], [0], [1], [0, 0, 1, 1], [], []>} : vector<32x32xbf16>, vector<32x96xbf16>, vector<32x96xf32> -> vector<32x96xf32>
    %c0_12 = arith.constant 0 : index
    %c0_13 = arith.constant 0 : index
    %28 = vector.load %arg5[%c0_12, %c0_13] : memref<1x96xf32, #tpu.memory_space<vmem>>, vector<1x96xf32>
    %29 = vector.broadcast %28 : vector<1x96xf32> to vector<32x96xf32>
    %30 = arith.addf %27, %29 : vector<32x96xf32>
    %c0_14 = arith.constant 0 : index
    %c0_15 = arith.constant 0 : index
    %31 = vector.load %arg6[%c0_14, %c0_15] : memref<32x96xf32, #tpu.memory_space<vmem>>, vector<32x96xf32>
    tpu.vector_store %arg6[%c0_14, %c0_15], %30 {strides = array<i32>} : memref<32x96xf32, #tpu.memory_space<vmem>>, vector<32x96xf32>,
    return
  }
  func.func @transform_0(%arg0: i32) -> (i32, i32) {
    %c0_i32 = arith.constant 0 : i32
    %c0_i32_0 = arith.constant 0 : i32
    return %arg0, %c0_i32 : i32, i32
  }
  func.func @transform_1(%arg0: i32) -> (i32, i32) {
    %c0_i32 = arith.constant 0 : i32
    %c0_i32_0 = arith.constant 0 : i32
    %c0_i32_1 = arith.constant 0 : i32
    return %c0_i32, %c0_i32_0 : i32, i32
  }
  func.func @transform_2(%arg0: i32) -> (i32, i32) {
    %c0_i32 = arith.constant 0 : i32
    %c0_i32_0 = arith.constant 0 : i32
    %c0_i32_1 = arith.constant 0 : i32
    return %c0_i32, %c0_i32_0 : i32, i32
  }
  func.func @transform_3(%arg0: i32) -> (i32, i32) {
    %c0_i32 = arith.constant 0 : i32
    %c0_i32_0 = arith.constant 0 : i32
    %c0_i32_1 = arith.constant 0 : i32
    return %c0_i32, %c0_i32_0 : i32, i32
  }
  func.func @transform_4(%arg0: i32) -> (i32, i32) {
    %c0_i32 = arith.constant 0 : i32
    %c0_i32_0 = arith.constant 0 : i32
    %c0_i32_1 = arith.constant 0 : i32
    return %c0_i32, %c0_i32_0 : i32, i32
  }
  func.func @transform_5(%arg0: i32) -> (i32, i32) {
    %c0_i32 = arith.constant 0 : i32
    %c0_i32_0 = arith.constant 0 : i32
    return %arg0, %c0_i32 : i32, i32
  }
}

module attributes {stable_mosaic.version = 11 : i64} {
  func.func @_th_attn_kernel(%arg0: i32, %arg1: memref<1x16x96xf32, #tpu.memory_space<vmem>>, %arg2: memref<4x4xf32, #tpu.memory_space<smem>>, %arg3: memref<4xf32, #tpu.memory_space<smem>>, %arg4: memref<4x4xf32, #tpu.memory_space<smem>>, %arg5: memref<4xf32, #tpu.memory_space<smem>>, %arg6: memref<1x16x32xf32, #tpu.memory_space<vmem>>) attributes {dimension_semantics = [#tpu.dimension_semantics<parallel>], iteration_bounds = array<i64: 2>, scalar_prefetch = 0 : i64, scratch_operands = 0 : i64, tpu.core_type = #tpu.core_type<tc>, window_params = [{transform_indices = @transform_0, window_bounds = array<i64: 1, 16, 96>}, {transform_indices = @transform_1, window_bounds = array<i64: 4, 4>}, {transform_indices = @transform_2, window_bounds = array<i64: 4>}, {transform_indices = @transform_3, window_bounds = array<i64: 4, 4>}, {transform_indices = @transform_4, window_bounds = array<i64: 4>}, {transform_indices = @transform_5, window_bounds = array<i64: 1, 16, 32>}]} {
    %c0 = arith.constant 0 : index
    %c0_0 = arith.constant 0 : index
    %c0_1 = arith.constant 0 : index
    %0 = vector.load %arg1[%c0, %c0_0, %c0_1] : memref<1x16x96xf32, #tpu.memory_space<vmem>>, vector<1x16x96xf32>
    %1 = vector.shape_cast %0 : vector<1x16x96xf32> to vector<16x96xf32>
    %2 = arith.truncf %1 : vector<16x96xf32> to vector<16x96xbf16>
    %3 = vector.extract_strided_slice %2 {offsets = [0, 0], sizes = [16, 8], strides = [1, 1]} : vector<16x96xbf16> to vector<16x8xbf16>
    %4 = vector.extract_strided_slice %2 {offsets = [0, 8], sizes = [16, 8], strides = [1, 1]} : vector<16x96xbf16> to vector<16x8xbf16>
    %5 = vector.extract_strided_slice %2 {offsets = [0, 16], sizes = [16, 8], strides = [1, 1]} : vector<16x96xbf16> to vector<16x8xbf16>
    %6 = vector.extract_strided_slice %2 {offsets = [0, 24], sizes = [16, 8], strides = [1, 1]} : vector<16x96xbf16> to vector<16x8xbf16>
    %7 = vector.shape_cast %3 : vector<16x8xbf16> to vector<1x16x8xbf16>
    %8 = vector.shape_cast %4 : vector<16x8xbf16> to vector<1x16x8xbf16>
    %9 = vector.shape_cast %5 : vector<16x8xbf16> to vector<1x16x8xbf16>
    %10 = vector.shape_cast %6 : vector<16x8xbf16> to vector<1x16x8xbf16>
    %11 = tpu.concatenate %7, %8, %9, %10 in 0 : vector<1x16x8xbf16>, vector<1x16x8xbf16>, vector<1x16x8xbf16>, vector<1x16x8xbf16> -> vector<4x16x8xbf16>
    %12 = vector.extract_strided_slice %2 {offsets = [0, 32], sizes = [16, 8], strides = [1, 1]} : vector<16x96xbf16> to vector<16x8xbf16>
    %13 = vector.extract_strided_slice %2 {offsets = [0, 40], sizes = [16, 8], strides = [1, 1]} : vector<16x96xbf16> to vector<16x8xbf16>
    %14 = vector.extract_strided_slice %2 {offsets = [0, 48], sizes = [16, 8], strides = [1, 1]} : vector<16x96xbf16> to vector<16x8xbf16>
    %15 = vector.extract_strided_slice %2 {offsets = [0, 56], sizes = [16, 8], strides = [1, 1]} : vector<16x96xbf16> to vector<16x8xbf16>
    %16 = vector.shape_cast %12 : vector<16x8xbf16> to vector<1x16x8xbf16>
    %17 = vector.shape_cast %13 : vector<16x8xbf16> to vector<1x16x8xbf16>
    %18 = vector.shape_cast %14 : vector<16x8xbf16> to vector<1x16x8xbf16>
    %19 = vector.shape_cast %15 : vector<16x8xbf16> to vector<1x16x8xbf16>
    %20 = tpu.concatenate %16, %17, %18, %19 in 0 : vector<1x16x8xbf16>, vector<1x16x8xbf16>, vector<1x16x8xbf16>, vector<1x16x8xbf16> -> vector<4x16x8xbf16>
    %21 = vector.extract_strided_slice %2 {offsets = [0, 64], sizes = [16, 8], strides = [1, 1]} : vector<16x96xbf16> to vector<16x8xbf16>
    %22 = vector.extract_strided_slice %2 {offsets = [0, 72], sizes = [16, 8], strides = [1, 1]} : vector<16x96xbf16> to vector<16x8xbf16>
    %23 = vector.extract_strided_slice %2 {offsets = [0, 80], sizes = [16, 8], strides = [1, 1]} : vector<16x96xbf16> to vector<16x8xbf16>
    %24 = vector.extract_strided_slice %2 {offsets = [0, 88], sizes = [16, 8], strides = [1, 1]} : vector<16x96xbf16> to vector<16x8xbf16>
    %25 = vector.shape_cast %21 : vector<16x8xbf16> to vector<1x16x8xbf16>
    %26 = vector.shape_cast %22 : vector<16x8xbf16> to vector<1x16x8xbf16>
    %27 = vector.shape_cast %23 : vector<16x8xbf16> to vector<1x16x8xbf16>
    %28 = vector.shape_cast %24 : vector<16x8xbf16> to vector<1x16x8xbf16>
    %29 = tpu.concatenate %25, %26, %27, %28 in 0 : vector<1x16x8xbf16>, vector<1x16x8xbf16>, vector<1x16x8xbf16>, vector<1x16x8xbf16> -> vector<4x16x8xbf16>
    "tpu.trace_start"() <{level = 10 : i32, message = "hqd,hkd->hqk"}> : () -> ()
    %cst = arith.constant dense<0.000000e+00> : vector<4x16x16xf32>
    %30 = tpu.matmul %11, %20, %cst {dimension_numbers = #tpu.dot_dimension_numbers<[2], [2], [1], [1], [0, 0, 0, 1, 1, 1], [0], [0]>} : vector<4x16x8xbf16>, vector<4x16x8xbf16>, vector<4x16x16xf32> -> vector<4x16x16xf32>
    "tpu.trace_stop"() : () -> ()
    %cst_2 = arith.constant 0.353553385 : f32
    %31 = vector.broadcast %cst_2 : f32 to vector<4x16x16xf32>
    %32 = arith.mulf %30, %31 : vector<4x16x16xf32>
    %33 = vector.extract_strided_slice %32 {offsets = [0, 0, 0], sizes = [1, 16, 16], strides = [1, 1, 1]} : vector<4x16x16xf32> to vector<1x16x16xf32>
    %34 = vector.shape_cast %33 : vector<1x16x16xf32> to vector<16x16xf32>
    %c0_3 = arith.constant 0 : index
    %c0_4 = arith.constant 0 : index
    %35 = memref.load %arg2[%c0_3, %c0_4] : memref<4x4xf32, #tpu.memory_space<smem>>
    %36 = vector.broadcast %35 : f32 to vector<16x16xf32>
    %37 = arith.mulf %34, %36 : vector<16x16xf32>
    %38 = vector.extract_strided_slice %32 {offsets = [1, 0, 0], sizes = [1, 16, 16], strides = [1, 1, 1]} : vector<4x16x16xf32> to vector<1x16x16xf32>
    %39 = vector.shape_cast %38 : vector<1x16x16xf32> to vector<16x16xf32>
    %c0_5 = arith.constant 0 : index
    %c1 = arith.constant 1 : index
    %40 = memref.load %arg2[%c0_5, %c1] : memref<4x4xf32, #tpu.memory_space<smem>>
    %41 = vector.broadcast %40 : f32 to vector<16x16xf32>
    %42 = arith.mulf %39, %41 : vector<16x16xf32>
    %43 = arith.addf %37, %42 : vector<16x16xf32>
    %44 = vector.extract_strided_slice %32 {offsets = [2, 0, 0], sizes = [1, 16, 16], strides = [1, 1, 1]} : vector<4x16x16xf32> to vector<1x16x16xf32>
    %45 = vector.shape_cast %44 : vector<1x16x16xf32> to vector<16x16xf32>
    %c0_6 = arith.constant 0 : index
    %c2 = arith.constant 2 : index
    %46 = memref.load %arg2[%c0_6, %c2] : memref<4x4xf32, #tpu.memory_space<smem>>
    %47 = vector.broadcast %46 : f32 to vector<16x16xf32>
    %48 = arith.mulf %45, %47 : vector<16x16xf32>
    %49 = arith.addf %43, %48 : vector<16x16xf32>
    %50 = vector.extract_strided_slice %32 {offsets = [3, 0, 0], sizes = [1, 16, 16], strides = [1, 1, 1]} : vector<4x16x16xf32> to vector<1x16x16xf32>
    %51 = vector.shape_cast %50 : vector<1x16x16xf32> to vector<16x16xf32>
    %c0_7 = arith.constant 0 : index
    %c3 = arith.constant 3 : index
    %52 = memref.load %arg2[%c0_7, %c3] : memref<4x4xf32, #tpu.memory_space<smem>>
    %53 = vector.broadcast %52 : f32 to vector<16x16xf32>
    %54 = arith.mulf %51, %53 : vector<16x16xf32>
    %55 = arith.addf %49, %54 : vector<16x16xf32>
    %c0_8 = arith.constant 0 : index
    %56 = memref.load %arg3[%c0_8] : memref<4xf32, #tpu.memory_space<smem>>
    %57 = vector.broadcast %56 : f32 to vector<16x16xf32>
    %58 = arith.addf %55, %57 : vector<16x16xf32>
    %59 = vector.extract_strided_slice %32 {offsets = [0, 0, 0], sizes = [1, 16, 16], strides = [1, 1, 1]} : vector<4x16x16xf32> to vector<1x16x16xf32>
    %60 = vector.shape_cast %59 : vector<1x16x16xf32> to vector<16x16xf32>
    %c1_9 = arith.constant 1 : index
    %c0_10 = arith.constant 0 : index
    %61 = memref.load %arg2[%c1_9, %c0_10] : memref<4x4xf32, #tpu.memory_space<smem>>
    %62 = vector.broadcast %61 : f32 to vector<16x16xf32>
    %63 = arith.mulf %60, %62 : vector<16x16xf32>
    %64 = vector.extract_strided_slice %32 {offsets = [1, 0, 0], sizes = [1, 16, 16], strides = [1, 1, 1]} : vector<4x16x16xf32> to vector<1x16x16xf32>
    %65 = vector.shape_cast %64 : vector<1x16x16xf32> to vector<16x16xf32>
    %c1_11 = arith.constant 1 : index
    %c1_12 = arith.constant 1 : index
    %66 = memref.load %arg2[%c1_11, %c1_12] : memref<4x4xf32, #tpu.memory_space<smem>>
    %67 = vector.broadcast %66 : f32 to vector<16x16xf32>
    %68 = arith.mulf %65, %67 : vector<16x16xf32>
    %69 = arith.addf %63, %68 : vector<16x16xf32>
    %70 = vector.extract_strided_slice %32 {offsets = [2, 0, 0], sizes = [1, 16, 16], strides = [1, 1, 1]} : vector<4x16x16xf32> to vector<1x16x16xf32>
    %71 = vector.shape_cast %70 : vector<1x16x16xf32> to vector<16x16xf32>
    %c1_13 = arith.constant 1 : index
    %c2_14 = arith.constant 2 : index
    %72 = memref.load %arg2[%c1_13, %c2_14] : memref<4x4xf32, #tpu.memory_space<smem>>
    %73 = vector.broadcast %72 : f32 to vector<16x16xf32>
    %74 = arith.mulf %71, %73 : vector<16x16xf32>
    %75 = arith.addf %69, %74 : vector<16x16xf32>
    %76 = vector.extract_strided_slice %32 {offsets = [3, 0, 0], sizes = [1, 16, 16], strides = [1, 1, 1]} : vector<4x16x16xf32> to vector<1x16x16xf32>
    %77 = vector.shape_cast %76 : vector<1x16x16xf32> to vector<16x16xf32>
    %c1_15 = arith.constant 1 : index
    %c3_16 = arith.constant 3 : index
    %78 = memref.load %arg2[%c1_15, %c3_16] : memref<4x4xf32, #tpu.memory_space<smem>>
    %79 = vector.broadcast %78 : f32 to vector<16x16xf32>
    %80 = arith.mulf %77, %79 : vector<16x16xf32>
    %81 = arith.addf %75, %80 : vector<16x16xf32>
    %c1_17 = arith.constant 1 : index
    %82 = memref.load %arg3[%c1_17] : memref<4xf32, #tpu.memory_space<smem>>
    %83 = vector.broadcast %82 : f32 to vector<16x16xf32>
    %84 = arith.addf %81, %83 : vector<16x16xf32>
    %85 = vector.extract_strided_slice %32 {offsets = [0, 0, 0], sizes = [1, 16, 16], strides = [1, 1, 1]} : vector<4x16x16xf32> to vector<1x16x16xf32>
    %86 = vector.shape_cast %85 : vector<1x16x16xf32> to vector<16x16xf32>
    %c2_18 = arith.constant 2 : index
    %c0_19 = arith.constant 0 : index
    %87 = memref.load %arg2[%c2_18, %c0_19] : memref<4x4xf32, #tpu.memory_space<smem>>
    %88 = vector.broadcast %87 : f32 to vector<16x16xf32>
    %89 = arith.mulf %86, %88 : vector<16x16xf32>
    %90 = vector.extract_strided_slice %32 {offsets = [1, 0, 0], sizes = [1, 16, 16], strides = [1, 1, 1]} : vector<4x16x16xf32> to vector<1x16x16xf32>
    %91 = vector.shape_cast %90 : vector<1x16x16xf32> to vector<16x16xf32>
    %c2_20 = arith.constant 2 : index
    %c1_21 = arith.constant 1 : index
    %92 = memref.load %arg2[%c2_20, %c1_21] : memref<4x4xf32, #tpu.memory_space<smem>>
    %93 = vector.broadcast %92 : f32 to vector<16x16xf32>
    %94 = arith.mulf %91, %93 : vector<16x16xf32>
    %95 = arith.addf %89, %94 : vector<16x16xf32>
    %96 = vector.extract_strided_slice %32 {offsets = [2, 0, 0], sizes = [1, 16, 16], strides = [1, 1, 1]} : vector<4x16x16xf32> to vector<1x16x16xf32>
    %97 = vector.shape_cast %96 : vector<1x16x16xf32> to vector<16x16xf32>
    %c2_22 = arith.constant 2 : index
    %c2_23 = arith.constant 2 : index
    %98 = memref.load %arg2[%c2_22, %c2_23] : memref<4x4xf32, #tpu.memory_space<smem>>
    %99 = vector.broadcast %98 : f32 to vector<16x16xf32>
    %100 = arith.mulf %97, %99 : vector<16x16xf32>
    %101 = arith.addf %95, %100 : vector<16x16xf32>
    %102 = vector.extract_strided_slice %32 {offsets = [3, 0, 0], sizes = [1, 16, 16], strides = [1, 1, 1]} : vector<4x16x16xf32> to vector<1x16x16xf32>
    %103 = vector.shape_cast %102 : vector<1x16x16xf32> to vector<16x16xf32>
    %c2_24 = arith.constant 2 : index
    %c3_25 = arith.constant 3 : index
    %104 = memref.load %arg2[%c2_24, %c3_25] : memref<4x4xf32, #tpu.memory_space<smem>>
    %105 = vector.broadcast %104 : f32 to vector<16x16xf32>
    %106 = arith.mulf %103, %105 : vector<16x16xf32>
    %107 = arith.addf %101, %106 : vector<16x16xf32>
    %c2_26 = arith.constant 2 : index
    %108 = memref.load %arg3[%c2_26] : memref<4xf32, #tpu.memory_space<smem>>
    %109 = vector.broadcast %108 : f32 to vector<16x16xf32>
    %110 = arith.addf %107, %109 : vector<16x16xf32>
    %111 = vector.extract_strided_slice %32 {offsets = [0, 0, 0], sizes = [1, 16, 16], strides = [1, 1, 1]} : vector<4x16x16xf32> to vector<1x16x16xf32>
    %112 = vector.shape_cast %111 : vector<1x16x16xf32> to vector<16x16xf32>
    %c3_27 = arith.constant 3 : index
    %c0_28 = arith.constant 0 : index
    %113 = memref.load %arg2[%c3_27, %c0_28] : memref<4x4xf32, #tpu.memory_space<smem>>
    %114 = vector.broadcast %113 : f32 to vector<16x16xf32>
    %115 = arith.mulf %112, %114 : vector<16x16xf32>
    %116 = vector.extract_strided_slice %32 {offsets = [1, 0, 0], sizes = [1, 16, 16], strides = [1, 1, 1]} : vector<4x16x16xf32> to vector<1x16x16xf32>
    %117 = vector.shape_cast %116 : vector<1x16x16xf32> to vector<16x16xf32>
    %c3_29 = arith.constant 3 : index
    %c1_30 = arith.constant 1 : index
    %118 = memref.load %arg2[%c3_29, %c1_30] : memref<4x4xf32, #tpu.memory_space<smem>>
    %119 = vector.broadcast %118 : f32 to vector<16x16xf32>
    %120 = arith.mulf %117, %119 : vector<16x16xf32>
    %121 = arith.addf %115, %120 : vector<16x16xf32>
    %122 = vector.extract_strided_slice %32 {offsets = [2, 0, 0], sizes = [1, 16, 16], strides = [1, 1, 1]} : vector<4x16x16xf32> to vector<1x16x16xf32>
    %123 = vector.shape_cast %122 : vector<1x16x16xf32> to vector<16x16xf32>
    %c3_31 = arith.constant 3 : index
    %c2_32 = arith.constant 2 : index
    %124 = memref.load %arg2[%c3_31, %c2_32] : memref<4x4xf32, #tpu.memory_space<smem>>
    %125 = vector.broadcast %124 : f32 to vector<16x16xf32>
    %126 = arith.mulf %123, %125 : vector<16x16xf32>
    %127 = arith.addf %121, %126 : vector<16x16xf32>
    %128 = vector.extract_strided_slice %32 {offsets = [3, 0, 0], sizes = [1, 16, 16], strides = [1, 1, 1]} : vector<4x16x16xf32> to vector<1x16x16xf32>
    %129 = vector.shape_cast %128 : vector<1x16x16xf32> to vector<16x16xf32>
    %c3_33 = arith.constant 3 : index
    %c3_34 = arith.constant 3 : index
    %130 = memref.load %arg2[%c3_33, %c3_34] : memref<4x4xf32, #tpu.memory_space<smem>>
    %131 = vector.broadcast %130 : f32 to vector<16x16xf32>
    %132 = arith.mulf %129, %131 : vector<16x16xf32>
    %133 = arith.addf %127, %132 : vector<16x16xf32>
    %c3_35 = arith.constant 3 : index
    %134 = memref.load %arg3[%c3_35] : memref<4xf32, #tpu.memory_space<smem>>
    %135 = vector.broadcast %134 : f32 to vector<16x16xf32>
    %136 = arith.addf %133, %135 : vector<16x16xf32>
    %137 = vector.shape_cast %58 : vector<16x16xf32> to vector<1x16x16xf32>
    %138 = vector.shape_cast %84 : vector<16x16xf32> to vector<1x16x16xf32>
    %139 = vector.shape_cast %110 : vector<16x16xf32> to vector<1x16x16xf32>
    %140 = vector.shape_cast %136 : vector<16x16xf32> to vector<1x16x16xf32>
    %141 = tpu.concatenate %137, %138, %139, %140 in 0 : vector<1x16x16xf32>, vector<1x16x16xf32>, vector<1x16x16xf32>, vector<1x16x16xf32> -> vector<4x16x16xf32>
    %cst_36 = arith.constant dense<0xFF800000> : vector<4x16xf32>
    %142 = vector.multi_reduction <maximumf>, %141, %cst_36 [2] : vector<4x16x16xf32> to vector<4x16xf32>
    %143 = vector.shape_cast %142 : vector<4x16xf32> to vector<4x16x1xf32>
    %144 = vector.broadcast %143 : vector<4x16x1xf32> to vector<4x16x16xf32>
    %145 = arith.subf %141, %144 : vector<4x16x16xf32>
    %146 = math.exp %145 : vector<4x16x16xf32>
    %cst_37 = arith.constant dense<0.000000e+00> : vector<4x16xf32>
    %147 = vector.multi_reduction <add>, %146, %cst_37 [2] : vector<4x16x16xf32> to vector<4x16xf32>
    %148 = vector.shape_cast %147 : vector<4x16xf32> to vector<4x16x1xf32>
    %149 = vector.broadcast %148 : vector<4x16x1xf32> to vector<4x16x16xf32>
    %150 = arith.divf %146, %149 : vector<4x16x16xf32>
    %151 = vector.extract_strided_slice %150 {offsets = [0, 0, 0], sizes = [1, 16, 16], strides = [1, 1, 1]} : vector<4x16x16xf32> to vector<1x16x16xf32>
    %152 = vector.shape_cast %151 : vector<1x16x16xf32> to vector<16x16xf32>
    %c0_38 = arith.constant 0 : index
    %c0_39 = arith.constant 0 : index
    %153 = memref.load %arg4[%c0_38, %c0_39] : memref<4x4xf32, #tpu.memory_space<smem>>
    %154 = vector.broadcast %153 : f32 to vector<16x16xf32>
    %155 = arith.mulf %152, %154 : vector<16x16xf32>
    %156 = vector.extract_strided_slice %150 {offsets = [1, 0, 0], sizes = [1, 16, 16], strides = [1, 1, 1]} : vector<4x16x16xf32> to vector<1x16x16xf32>
    %157 = vector.shape_cast %156 : vector<1x16x16xf32> to vector<16x16xf32>
    %c0_40 = arith.constant 0 : index
    %c1_41 = arith.constant 1 : index
    %158 = memref.load %arg4[%c0_40, %c1_41] : memref<4x4xf32, #tpu.memory_space<smem>>
    %159 = vector.broadcast %158 : f32 to vector<16x16xf32>
    %160 = arith.mulf %157, %159 : vector<16x16xf32>
    %161 = arith.addf %155, %160 : vector<16x16xf32>
    %162 = vector.extract_strided_slice %150 {offsets = [2, 0, 0], sizes = [1, 16, 16], strides = [1, 1, 1]} : vector<4x16x16xf32> to vector<1x16x16xf32>
    %163 = vector.shape_cast %162 : vector<1x16x16xf32> to vector<16x16xf32>
    %c0_42 = arith.constant 0 : index
    %c2_43 = arith.constant 2 : index
    %164 = memref.load %arg4[%c0_42, %c2_43] : memref<4x4xf32, #tpu.memory_space<smem>>
    %165 = vector.broadcast %164 : f32 to vector<16x16xf32>
    %166 = arith.mulf %163, %165 : vector<16x16xf32>
    %167 = arith.addf %161, %166 : vector<16x16xf32>
    %168 = vector.extract_strided_slice %150 {offsets = [3, 0, 0], sizes = [1, 16, 16], strides = [1, 1, 1]} : vector<4x16x16xf32> to vector<1x16x16xf32>
    %169 = vector.shape_cast %168 : vector<1x16x16xf32> to vector<16x16xf32>
    %c0_44 = arith.constant 0 : index
    %c3_45 = arith.constant 3 : index
    %170 = memref.load %arg4[%c0_44, %c3_45] : memref<4x4xf32, #tpu.memory_space<smem>>
    %171 = vector.broadcast %170 : f32 to vector<16x16xf32>
    %172 = arith.mulf %169, %171 : vector<16x16xf32>
    %173 = arith.addf %167, %172 : vector<16x16xf32>
    %c0_46 = arith.constant 0 : index
    %174 = memref.load %arg5[%c0_46] : memref<4xf32, #tpu.memory_space<smem>>
    %175 = vector.broadcast %174 : f32 to vector<16x16xf32>
    %176 = arith.addf %173, %175 : vector<16x16xf32>
    %177 = vector.extract_strided_slice %150 {offsets = [0, 0, 0], sizes = [1, 16, 16], strides = [1, 1, 1]} : vector<4x16x16xf32> to vector<1x16x16xf32>
    %178 = vector.shape_cast %177 : vector<1x16x16xf32> to vector<16x16xf32>
    %c1_47 = arith.constant 1 : index
    %c0_48 = arith.constant 0 : index
    %179 = memref.load %arg4[%c1_47, %c0_48] : memref<4x4xf32, #tpu.memory_space<smem>>
    %180 = vector.broadcast %179 : f32 to vector<16x16xf32>
    %181 = arith.mulf %178, %180 : vector<16x16xf32>
    %182 = vector.extract_strided_slice %150 {offsets = [1, 0, 0], sizes = [1, 16, 16], strides = [1, 1, 1]} : vector<4x16x16xf32> to vector<1x16x16xf32>
    %183 = vector.shape_cast %182 : vector<1x16x16xf32> to vector<16x16xf32>
    %c1_49 = arith.constant 1 : index
    %c1_50 = arith.constant 1 : index
    %184 = memref.load %arg4[%c1_49, %c1_50] : memref<4x4xf32, #tpu.memory_space<smem>>
    %185 = vector.broadcast %184 : f32 to vector<16x16xf32>
    %186 = arith.mulf %183, %185 : vector<16x16xf32>
    %187 = arith.addf %181, %186 : vector<16x16xf32>
    %188 = vector.extract_strided_slice %150 {offsets = [2, 0, 0], sizes = [1, 16, 16], strides = [1, 1, 1]} : vector<4x16x16xf32> to vector<1x16x16xf32>
    %189 = vector.shape_cast %188 : vector<1x16x16xf32> to vector<16x16xf32>
    %c1_51 = arith.constant 1 : index
    %c2_52 = arith.constant 2 : index
    %190 = memref.load %arg4[%c1_51, %c2_52] : memref<4x4xf32, #tpu.memory_space<smem>>
    %191 = vector.broadcast %190 : f32 to vector<16x16xf32>
    %192 = arith.mulf %189, %191 : vector<16x16xf32>
    %193 = arith.addf %187, %192 : vector<16x16xf32>
    %194 = vector.extract_strided_slice %150 {offsets = [3, 0, 0], sizes = [1, 16, 16], strides = [1, 1, 1]} : vector<4x16x16xf32> to vector<1x16x16xf32>
    %195 = vector.shape_cast %194 : vector<1x16x16xf32> to vector<16x16xf32>
    %c1_53 = arith.constant 1 : index
    %c3_54 = arith.constant 3 : index
    %196 = memref.load %arg4[%c1_53, %c3_54] : memref<4x4xf32, #tpu.memory_space<smem>>
    %197 = vector.broadcast %196 : f32 to vector<16x16xf32>
    %198 = arith.mulf %195, %197 : vector<16x16xf32>
    %199 = arith.addf %193, %198 : vector<16x16xf32>
    %c1_55 = arith.constant 1 : index
    %200 = memref.load %arg5[%c1_55] : memref<4xf32, #tpu.memory_space<smem>>
    %201 = vector.broadcast %200 : f32 to vector<16x16xf32>
    %202 = arith.addf %199, %201 : vector<16x16xf32>
    %203 = vector.extract_strided_slice %150 {offsets = [0, 0, 0], sizes = [1, 16, 16], strides = [1, 1, 1]} : vector<4x16x16xf32> to vector<1x16x16xf32>
    %204 = vector.shape_cast %203 : vector<1x16x16xf32> to vector<16x16xf32>
    %c2_56 = arith.constant 2 : index
    %c0_57 = arith.constant 0 : index
    %205 = memref.load %arg4[%c2_56, %c0_57] : memref<4x4xf32, #tpu.memory_space<smem>>
    %206 = vector.broadcast %205 : f32 to vector<16x16xf32>
    %207 = arith.mulf %204, %206 : vector<16x16xf32>
    %208 = vector.extract_strided_slice %150 {offsets = [1, 0, 0], sizes = [1, 16, 16], strides = [1, 1, 1]} : vector<4x16x16xf32> to vector<1x16x16xf32>
    %209 = vector.shape_cast %208 : vector<1x16x16xf32> to vector<16x16xf32>
    %c2_58 = arith.constant 2 : index
    %c1_59 = arith.constant 1 : index
    %210 = memref.load %arg4[%c2_58, %c1_59] : memref<4x4xf32, #tpu.memory_space<smem>>
    %211 = vector.broadcast %210 : f32 to vector<16x16xf32>
    %212 = arith.mulf %209, %211 : vector<16x16xf32>
    %213 = arith.addf %207, %212 : vector<16x16xf32>
    %214 = vector.extract_strided_slice %150 {offsets = [2, 0, 0], sizes = [1, 16, 16], strides = [1, 1, 1]} : vector<4x16x16xf32> to vector<1x16x16xf32>
    %215 = vector.shape_cast %214 : vector<1x16x16xf32> to vector<16x16xf32>
    %c2_60 = arith.constant 2 : index
    %c2_61 = arith.constant 2 : index
    %216 = memref.load %arg4[%c2_60, %c2_61] : memref<4x4xf32, #tpu.memory_space<smem>>
    %217 = vector.broadcast %216 : f32 to vector<16x16xf32>
    %218 = arith.mulf %215, %217 : vector<16x16xf32>
    %219 = arith.addf %213, %218 : vector<16x16xf32>
    %220 = vector.extract_strided_slice %150 {offsets = [3, 0, 0], sizes = [1, 16, 16], strides = [1, 1, 1]} : vector<4x16x16xf32> to vector<1x16x16xf32>
    %221 = vector.shape_cast %220 : vector<1x16x16xf32> to vector<16x16xf32>
    %c2_62 = arith.constant 2 : index
    %c3_63 = arith.constant 3 : index
    %222 = memref.load %arg4[%c2_62, %c3_63] : memref<4x4xf32, #tpu.memory_space<smem>>
    %223 = vector.broadcast %222 : f32 to vector<16x16xf32>
    %224 = arith.mulf %221, %223 : vector<16x16xf32>
    %225 = arith.addf %219, %224 : vector<16x16xf32>
    %c2_64 = arith.constant 2 : index
    %226 = memref.load %arg5[%c2_64] : memref<4xf32, #tpu.memory_space<smem>>
    %227 = vector.broadcast %226 : f32 to vector<16x16xf32>
    %228 = arith.addf %225, %227 : vector<16x16xf32>
    %229 = vector.extract_strided_slice %150 {offsets = [0, 0, 0], sizes = [1, 16, 16], strides = [1, 1, 1]} : vector<4x16x16xf32> to vector<1x16x16xf32>
    %230 = vector.shape_cast %229 : vector<1x16x16xf32> to vector<16x16xf32>
    %c3_65 = arith.constant 3 : index
    %c0_66 = arith.constant 0 : index
    %231 = memref.load %arg4[%c3_65, %c0_66] : memref<4x4xf32, #tpu.memory_space<smem>>
    %232 = vector.broadcast %231 : f32 to vector<16x16xf32>
    %233 = arith.mulf %230, %232 : vector<16x16xf32>
    %234 = vector.extract_strided_slice %150 {offsets = [1, 0, 0], sizes = [1, 16, 16], strides = [1, 1, 1]} : vector<4x16x16xf32> to vector<1x16x16xf32>
    %235 = vector.shape_cast %234 : vector<1x16x16xf32> to vector<16x16xf32>
    %c3_67 = arith.constant 3 : index
    %c1_68 = arith.constant 1 : index
    %236 = memref.load %arg4[%c3_67, %c1_68] : memref<4x4xf32, #tpu.memory_space<smem>>
    %237 = vector.broadcast %236 : f32 to vector<16x16xf32>
    %238 = arith.mulf %235, %237 : vector<16x16xf32>
    %239 = arith.addf %233, %238 : vector<16x16xf32>
    %240 = vector.extract_strided_slice %150 {offsets = [2, 0, 0], sizes = [1, 16, 16], strides = [1, 1, 1]} : vector<4x16x16xf32> to vector<1x16x16xf32>
    %241 = vector.shape_cast %240 : vector<1x16x16xf32> to vector<16x16xf32>
    %c3_69 = arith.constant 3 : index
    %c2_70 = arith.constant 2 : index
    %242 = memref.load %arg4[%c3_69, %c2_70] : memref<4x4xf32, #tpu.memory_space<smem>>
    %243 = vector.broadcast %242 : f32 to vector<16x16xf32>
    %244 = arith.mulf %241, %243 : vector<16x16xf32>
    %245 = arith.addf %239, %244 : vector<16x16xf32>
    %246 = vector.extract_strided_slice %150 {offsets = [3, 0, 0], sizes = [1, 16, 16], strides = [1, 1, 1]} : vector<4x16x16xf32> to vector<1x16x16xf32>
    %247 = vector.shape_cast %246 : vector<1x16x16xf32> to vector<16x16xf32>
    %c3_71 = arith.constant 3 : index
    %c3_72 = arith.constant 3 : index
    %248 = memref.load %arg4[%c3_71, %c3_72] : memref<4x4xf32, #tpu.memory_space<smem>>
    %249 = vector.broadcast %248 : f32 to vector<16x16xf32>
    %250 = arith.mulf %247, %249 : vector<16x16xf32>
    %251 = arith.addf %245, %250 : vector<16x16xf32>
    %c3_73 = arith.constant 3 : index
    %252 = memref.load %arg5[%c3_73] : memref<4xf32, #tpu.memory_space<smem>>
    %253 = vector.broadcast %252 : f32 to vector<16x16xf32>
    %254 = arith.addf %251, %253 : vector<16x16xf32>
    %255 = vector.shape_cast %176 : vector<16x16xf32> to vector<1x16x16xf32>
    %256 = vector.shape_cast %202 : vector<16x16xf32> to vector<1x16x16xf32>
    %257 = vector.shape_cast %228 : vector<16x16xf32> to vector<1x16x16xf32>
    %258 = vector.shape_cast %254 : vector<16x16xf32> to vector<1x16x16xf32>
    %259 = tpu.concatenate %255, %256, %257, %258 in 0 : vector<1x16x16xf32>, vector<1x16x16xf32>, vector<1x16x16xf32>, vector<1x16x16xf32> -> vector<4x16x16xf32>
    %260 = arith.truncf %259 : vector<4x16x16xf32> to vector<4x16x16xbf16>
    "tpu.trace_start"() <{level = 10 : i32, message = "hqk,hkd->hqd"}> : () -> ()
    %cst_74 = arith.constant dense<0.000000e+00> : vector<4x16x8xf32>
    %261 = tpu.matmul %260, %29, %cst_74 {dimension_numbers = #tpu.dot_dimension_numbers<[2], [1], [1], [2], [0, 0, 0, 1, 1, 2], [0], [0]>} : vector<4x16x16xbf16>, vector<4x16x8xbf16>, vector<4x16x8xf32> -> vector<4x16x8xf32>
    "tpu.trace_stop"() : () -> ()
    %262 = vector.extract_strided_slice %261 {offsets = [0, 0, 0], sizes = [1, 16, 8], strides = [1, 1, 1]} : vector<4x16x8xf32> to vector<1x16x8xf32>
    %263 = vector.shape_cast %262 : vector<1x16x8xf32> to vector<16x8xf32>
    %264 = vector.extract_strided_slice %261 {offsets = [1, 0, 0], sizes = [1, 16, 8], strides = [1, 1, 1]} : vector<4x16x8xf32> to vector<1x16x8xf32>
    %265 = vector.shape_cast %264 : vector<1x16x8xf32> to vector<16x8xf32>
    %266 = vector.extract_strided_slice %261 {offsets = [2, 0, 0], sizes = [1, 16, 8], strides = [1, 1, 1]} : vector<4x16x8xf32> to vector<1x16x8xf32>
    %267 = vector.shape_cast %266 : vector<1x16x8xf32> to vector<16x8xf32>
    %268 = vector.extract_strided_slice %261 {offsets = [3, 0, 0], sizes = [1, 16, 8], strides = [1, 1, 1]} : vector<4x16x8xf32> to vector<1x16x8xf32>
    %269 = vector.shape_cast %268 : vector<1x16x8xf32> to vector<16x8xf32>
    %270 = tpu.concatenate %263, %265, %267, %269 in 1 : vector<16x8xf32>, vector<16x8xf32>, vector<16x8xf32>, vector<16x8xf32> -> vector<16x32xf32>
    %c0_75 = arith.constant 0 : index
    %c0_76 = arith.constant 0 : index
    %c0_77 = arith.constant 0 : index
    %271 = vector.load %arg6[%c0_75, %c0_76, %c0_77] : memref<1x16x32xf32, #tpu.memory_space<vmem>>, vector<1x16x32xf32>
    %272 = vector.shape_cast %271 : vector<1x16x32xf32> to vector<16x32xf32>
    %273 = vector.shape_cast %270 : vector<16x32xf32> to vector<1x16x32xf32>
    tpu.vector_store %arg6[%c0_75, %c0_76, %c0_77], %273 {strides = array<i32>} : memref<1x16x32xf32, #tpu.memory_space<vmem>>, vector<1x16x32xf32>,
    return
  }
  func.func @transform_0(%arg0: i32) -> (i32, i32, i32) {
    %c0_i32 = arith.constant 0 : i32
    %c0_i32_0 = arith.constant 0 : i32
    %c0_i32_1 = arith.constant 0 : i32
    return %arg0, %c0_i32, %c0_i32_0 : i32, i32, i32
  }
  func.func @transform_1(%arg0: i32) -> (i32, i32) {
    %c0_i32 = arith.constant 0 : i32
    %c0_i32_0 = arith.constant 0 : i32
    %c0_i32_1 = arith.constant 0 : i32
    return %c0_i32, %c0_i32_0 : i32, i32
  }
  func.func @transform_2(%arg0: i32) -> i32 {
    %c0_i32 = arith.constant 0 : i32
    %c0_i32_0 = arith.constant 0 : i32
    return %c0_i32 : i32
  }
  func.func @transform_3(%arg0: i32) -> (i32, i32) {
    %c0_i32 = arith.constant 0 : i32
    %c0_i32_0 = arith.constant 0 : i32
    %c0_i32_1 = arith.constant 0 : i32
    return %c0_i32, %c0_i32_0 : i32, i32
  }
  func.func @transform_4(%arg0: i32) -> i32 {
    %c0_i32 = arith.constant 0 : i32
    %c0_i32_0 = arith.constant 0 : i32
    return %c0_i32 : i32
  }
  func.func @transform_5(%arg0: i32) -> (i32, i32, i32) {
    %c0_i32 = arith.constant 0 : i32
    %c0_i32_0 = arith.constant 0 : i32
    %c0_i32_1 = arith.constant 0 : i32
    return %arg0, %c0_i32, %c0_i32_0 : i32, i32, i32
  }
}

module attributes {stable_mosaic.version = 11 : i64} {
  func.func @_ln_linear_kernel(%arg0: i32, %arg1: memref<32x32xf32, #tpu.memory_space<vmem>>, %arg2: memref<1x32xf32, #tpu.memory_space<vmem>>, %arg3: memref<1x32xf32, #tpu.memory_space<vmem>>, %arg4: memref<32x128xbf16, #tpu.memory_space<vmem>>, %arg5: memref<1x128xf32, #tpu.memory_space<vmem>>, %arg6: memref<32x128xf32, #tpu.memory_space<vmem>>) attributes {dimension_semantics = [#tpu.dimension_semantics<parallel>], iteration_bounds = array<i64: 1>, scalar_prefetch = 0 : i64, scratch_operands = 0 : i64, tpu.core_type = #tpu.core_type<tc>, window_params = [{transform_indices = @transform_0, window_bounds = array<i64: 32, 32>}, {pipeline_mode = #tpu.pipeline_mode<synchronous>, transform_indices = @transform_1, window_bounds = array<i64: 1, 32>}, {pipeline_mode = #tpu.pipeline_mode<synchronous>, transform_indices = @transform_2, window_bounds = array<i64: 1, 32>}, {pipeline_mode = #tpu.pipeline_mode<synchronous>, transform_indices = @transform_3, window_bounds = array<i64: 32, 128>}, {pipeline_mode = #tpu.pipeline_mode<synchronous>, transform_indices = @transform_4, window_bounds = array<i64: 1, 128>}, {transform_indices = @transform_5, window_bounds = array<i64: 32, 128>}]} {
    %c0 = arith.constant 0 : index
    %c0_0 = arith.constant 0 : index
    %0 = vector.load %arg1[%c0, %c0_0] : memref<32x32xf32, #tpu.memory_space<vmem>>, vector<32x32xf32>
    %c0_1 = arith.constant 0 : index
    %c0_2 = arith.constant 0 : index
    %1 = vector.load %arg2[%c0_1, %c0_2] : memref<1x32xf32, #tpu.memory_space<vmem>>, vector<1x32xf32>
    %c0_3 = arith.constant 0 : index
    %c0_4 = arith.constant 0 : index
    %2 = vector.load %arg3[%c0_3, %c0_4] : memref<1x32xf32, #tpu.memory_space<vmem>>, vector<1x32xf32>
    %cst = arith.constant dense<0.000000e+00> : vector<32xf32>
    %3 = vector.multi_reduction <add>, %0, %cst [1] : vector<32x32xf32> to vector<32xf32>
    %4 = vector.shape_cast %3 : vector<32xf32> to vector<32x1xf32>
    %cst_5 = arith.constant 3.200000e+01 : f32
    %5 = vector.broadcast %cst_5 : f32 to vector<32x1xf32>
    %6 = arith.divf %4, %5 : vector<32x1xf32>
    %7 = vector.broadcast %6 : vector<32x1xf32> to vector<32x32xf32>
    %8 = arith.subf %0, %7 : vector<32x32xf32>
    %9 = arith.mulf %8, %8 : vector<32x32xf32>
    %cst_6 = arith.constant dense<0.000000e+00> : vector<32xf32>
    %10 = vector.multi_reduction <add>, %9, %cst_6 [1] : vector<32x32xf32> to vector<32xf32>
    %11 = vector.shape_cast %10 : vector<32xf32> to vector<32x1xf32>
    %cst_7 = arith.constant 3.200000e+01 : f32
    %12 = vector.broadcast %cst_7 : f32 to vector<32x1xf32>
    %13 = arith.divf %11, %12 : vector<32x1xf32>
    %14 = vector.broadcast %6 : vector<32x1xf32> to vector<32x32xf32>
    %15 = arith.subf %0, %14 : vector<32x32xf32>
    %cst_8 = arith.constant 9.99999997E-7 : f32
    %16 = vector.broadcast %cst_8 : f32 to vector<32x1xf32>
    %17 = arith.addf %13, %16 : vector<32x1xf32>
    %18 = math.rsqrt %17 : vector<32x1xf32>
    %19 = vector.broadcast %18 : vector<32x1xf32> to vector<32x32xf32>
    %20 = arith.mulf %15, %19 : vector<32x32xf32>
    %21 = vector.broadcast %1 : vector<1x32xf32> to vector<32x32xf32>
    %22 = arith.mulf %20, %21 : vector<32x32xf32>
    %23 = vector.broadcast %2 : vector<1x32xf32> to vector<32x32xf32>
    %24 = arith.addf %22, %23 : vector<32x32xf32>
    %25 = arith.truncf %24 : vector<32x32xf32> to vector<32x32xbf16>
    %c0_9 = arith.constant 0 : index
    %c0_10 = arith.constant 0 : index
    %26 = vector.load %arg4[%c0_9, %c0_10] : memref<32x128xbf16, #tpu.memory_space<vmem>>, vector<32x128xbf16>
    %cst_11 = arith.constant dense<0.000000e+00> : vector<32x128xf32>
    %27 = tpu.matmul %25, %26, %cst_11 {dimension_numbers = #tpu.dot_dimension_numbers<[1], [0], [0], [1], [0, 0, 1, 1], [], []>} : vector<32x32xbf16>, vector<32x128xbf16>, vector<32x128xf32> -> vector<32x128xf32>
    %c0_12 = arith.constant 0 : index
    %c0_13 = arith.constant 0 : index
    %28 = vector.load %arg5[%c0_12, %c0_13] : memref<1x128xf32, #tpu.memory_space<vmem>>, vector<1x128xf32>
    %29 = vector.broadcast %28 : vector<1x128xf32> to vector<32x128xf32>
    %30 = arith.addf %27, %29 : vector<32x128xf32>
    %c0_14 = arith.constant 0 : index
    %c0_15 = arith.constant 0 : index
    %31 = vector.load %arg6[%c0_14, %c0_15] : memref<32x128xf32, #tpu.memory_space<vmem>>, vector<32x128xf32>
    tpu.vector_store %arg6[%c0_14, %c0_15], %30 {strides = array<i32>} : memref<32x128xf32, #tpu.memory_space<vmem>>, vector<32x128xf32>,
    return
  }
  func.func @transform_0(%arg0: i32) -> (i32, i32) {
    %c0_i32 = arith.constant 0 : i32
    %c0_i32_0 = arith.constant 0 : i32
    return %arg0, %c0_i32 : i32, i32
  }
  func.func @transform_1(%arg0: i32) -> (i32, i32) {
    %c0_i32 = arith.constant 0 : i32
    %c0_i32_0 = arith.constant 0 : i32
    %c0_i32_1 = arith.constant 0 : i32
    return %c0_i32, %c0_i32_0 : i32, i32
  }
  func.func @transform_2(%arg0: i32) -> (i32, i32) {
    %c0_i32 = arith.constant 0 : i32
    %c0_i32_0 = arith.constant 0 : i32
    %c0_i32_1 = arith.constant 0 : i32
    return %c0_i32, %c0_i32_0 : i32, i32
  }
  func.func @transform_3(%arg0: i32) -> (i32, i32) {
    %c0_i32 = arith.constant 0 : i32
    %c0_i32_0 = arith.constant 0 : i32
    %c0_i32_1 = arith.constant 0 : i32
    return %c0_i32, %c0_i32_0 : i32, i32
  }
  func.func @transform_4(%arg0: i32) -> (i32, i32) {
    %c0_i32 = arith.constant 0 : i32
    %c0_i32_0 = arith.constant 0 : i32
    %c0_i32_1 = arith.constant 0 : i32
    return %c0_i32, %c0_i32_0 : i32, i32
  }
  func.func @transform_5(%arg0: i32) -> (i32, i32) {
    %c0_i32 = arith.constant 0 : i32
    %c0_i32_0 = arith.constant 0 : i32
    return %arg0, %c0_i32 : i32, i32
  }
}

module attributes {stable_mosaic.version = 11 : i64} {
  func.func @_linear_scale_res_kernel(%arg0: i32, %arg1: memref<32x128xf32, #tpu.memory_space<vmem>>, %arg2: memref<128x32xbf16, #tpu.memory_space<vmem>>, %arg3: memref<1x32xf32, #tpu.memory_space<vmem>>, %arg4: memref<1x32xf32, #tpu.memory_space<vmem>>, %arg5: memref<32x32xf32, #tpu.memory_space<vmem>>, %arg6: memref<32x32xf32, #tpu.memory_space<vmem>>) attributes {dimension_semantics = [#tpu.dimension_semantics<parallel>], iteration_bounds = array<i64: 1>, scalar_prefetch = 0 : i64, scratch_operands = 0 : i64, tpu.core_type = #tpu.core_type<tc>, window_params = [{transform_indices = @transform_0, window_bounds = array<i64: 32, 128>}, {pipeline_mode = #tpu.pipeline_mode<synchronous>, transform_indices = @transform_1, window_bounds = array<i64: 128, 32>}, {pipeline_mode = #tpu.pipeline_mode<synchronous>, transform_indices = @transform_2, window_bounds = array<i64: 1, 32>}, {pipeline_mode = #tpu.pipeline_mode<synchronous>, transform_indices = @transform_3, window_bounds = array<i64: 1, 32>}, {transform_indices = @transform_4, window_bounds = array<i64: 32, 32>}, {transform_indices = @transform_5, window_bounds = array<i64: 32, 32>}]} {
    %c0 = arith.constant 0 : index
    %c0_0 = arith.constant 0 : index
    %0 = vector.load %arg1[%c0, %c0_0] : memref<32x128xf32, #tpu.memory_space<vmem>>, vector<32x128xf32>
    %1 = arith.truncf %0 : vector<32x128xf32> to vector<32x128xbf16>
    %c0_1 = arith.constant 0 : index
    %c0_2 = arith.constant 0 : index
    %2 = vector.load %arg2[%c0_1, %c0_2] : memref<128x32xbf16, #tpu.memory_space<vmem>>, vector<128x32xbf16>
    %cst = arith.constant dense<0.000000e+00> : vector<32x32xf32>
    %3 = tpu.matmul %1, %2, %cst {dimension_numbers = #tpu.dot_dimension_numbers<[1], [0], [0], [1], [0, 0, 1, 1], [], []>} : vector<32x128xbf16>, vector<128x32xbf16>, vector<32x32xf32> -> vector<32x32xf32>
    %c0_3 = arith.constant 0 : index
    %c0_4 = arith.constant 0 : index
    %4 = vector.load %arg3[%c0_3, %c0_4] : memref<1x32xf32, #tpu.memory_space<vmem>>, vector<1x32xf32>
    %5 = vector.broadcast %4 : vector<1x32xf32> to vector<32x32xf32>
    %6 = arith.addf %3, %5 : vector<32x32xf32>
    %c0_5 = arith.constant 0 : index
    %c0_6 = arith.constant 0 : index
    %7 = vector.load %arg5[%c0_5, %c0_6] : memref<32x32xf32, #tpu.memory_space<vmem>>, vector<32x32xf32>
    %c0_7 = arith.constant 0 : index
    %c0_8 = arith.constant 0 : index
    %8 = vector.load %arg4[%c0_7, %c0_8] : memref<1x32xf32, #tpu.memory_space<vmem>>, vector<1x32xf32>
    %9 = vector.broadcast %8 : vector<1x32xf32> to vector<32x32xf32>
    %10 = arith.mulf %9, %6 : vector<32x32xf32>
    %11 = arith.addf %7, %10 : vector<32x32xf32>
    %c0_9 = arith.constant 0 : index
    %c0_10 = arith.constant 0 : index
    %12 = vector.load %arg6[%c0_9, %c0_10] : memref<32x32xf32, #tpu.memory_space<vmem>>, vector<32x32xf32>
    tpu.vector_store %arg6[%c0_9, %c0_10], %11 {strides = array<i32>} : memref<32x32xf32, #tpu.memory_space<vmem>>, vector<32x32xf32>,
    return
  }
  func.func @transform_0(%arg0: i32) -> (i32, i32) {
    %c0_i32 = arith.constant 0 : i32
    %c0_i32_0 = arith.constant 0 : i32
    return %arg0, %c0_i32 : i32, i32
  }
  func.func @transform_1(%arg0: i32) -> (i32, i32) {
    %c0_i32 = arith.constant 0 : i32
    %c0_i32_0 = arith.constant 0 : i32
    %c0_i32_1 = arith.constant 0 : i32
    return %c0_i32, %c0_i32_0 : i32, i32
  }
  func.func @transform_2(%arg0: i32) -> (i32, i32) {
    %c0_i32 = arith.constant 0 : i32
    %c0_i32_0 = arith.constant 0 : i32
    %c0_i32_1 = arith.constant 0 : i32
    return %c0_i32, %c0_i32_0 : i32, i32
  }
  func.func @transform_3(%arg0: i32) -> (i32, i32) {
    %c0_i32 = arith.constant 0 : i32
    %c0_i32_0 = arith.constant 0 : i32
    %c0_i32_1 = arith.constant 0 : i32
    return %c0_i32, %c0_i32_0 : i32, i32
  }
  func.func @transform_4(%arg0: i32) -> (i32, i32) {
    %c0_i32 = arith.constant 0 : i32
    %c0_i32_0 = arith.constant 0 : i32
    return %arg0, %c0_i32 : i32, i32
  }
  func.func @transform_5(%arg0: i32) -> (i32, i32) {
    %c0_i32 = arith.constant 0 : i32
    %c0_i32_0 = arith.constant 0 : i32
    return %arg0, %c0_i32 : i32, i32
  }
}

module attributes {stable_mosaic.version = 11 : i64} {
  func.func @_class_attn_kernel(%arg0: i32, %arg1: memref<1x16x32xf32, #tpu.memory_space<vmem>>, %arg2: memref<1x1x32xf32, #tpu.memory_space<vmem>>, %arg3: memref<1x32xf32, #tpu.memory_space<vmem>>, %arg4: memref<1x32xf32, #tpu.memory_space<vmem>>, %arg5: memref<32x32xbf16, #tpu.memory_space<vmem>>, %arg6: memref<1x32xf32, #tpu.memory_space<vmem>>, %arg7: memref<32x32xbf16, #tpu.memory_space<vmem>>, %arg8: memref<1x32xf32, #tpu.memory_space<vmem>>, %arg9: memref<32x32xbf16, #tpu.memory_space<vmem>>, %arg10: memref<1x32xf32, #tpu.memory_space<vmem>>, %arg11: memref<32x32xbf16, #tpu.memory_space<vmem>>, %arg12: memref<1x32xf32, #tpu.memory_space<vmem>>, %arg13: memref<1x32xf32, #tpu.memory_space<vmem>>, %arg14: memref<1x1x32xf32, #tpu.memory_space<vmem>>) attributes {dimension_semantics = [#tpu.dimension_semantics<parallel>], iteration_bounds = array<i64: 2>, scalar_prefetch = 0 : i64, scratch_operands = 0 : i64, tpu.core_type = #tpu.core_type<tc>, window_params = [{transform_indices = @transform_0, window_bounds = array<i64: 1, 16, 32>}, {transform_indices = @transform_1, window_bounds = array<i64: 1, 1, 32>}, {pipeline_mode = #tpu.pipeline_mode<synchronous>, transform_indices = @transform_2, window_bounds = array<i64: 1, 32>}, {pipeline_mode = #tpu.pipeline_mode<synchronous>, transform_indices = @transform_3, window_bounds = array<i64: 1, 32>}, {pipeline_mode = #tpu.pipeline_mode<synchronous>, transform_indices = @transform_4, window_bounds = array<i64: 32, 32>}, {pipeline_mode = #tpu.pipeline_mode<synchronous>, transform_indices = @transform_5, window_bounds = array<i64: 1, 32>}, {pipeline_mode = #tpu.pipeline_mode<synchronous>, transform_indices = @transform_6, window_bounds = array<i64: 32, 32>}, {pipeline_mode = #tpu.pipeline_mode<synchronous>, transform_indices = @transform_7, window_bounds = array<i64: 1, 32>}, {pipeline_mode = #tpu.pipeline_mode<synchronous>, transform_indices = @transform_8, window_bounds = array<i64: 32, 32>}, {pipeline_mode = #tpu.pipeline_mode<synchronous>, transform_indices = @transform_9, window_bounds = array<i64: 1, 32>}, {pipeline_mode = #tpu.pipeline_mode<synchronous>, transform_indices = @transform_10, window_bounds = array<i64: 32, 32>}, {pipeline_mode = #tpu.pipeline_mode<synchronous>, transform_indices = @transform_11, window_bounds = array<i64: 1, 32>}, {pipeline_mode = #tpu.pipeline_mode<synchronous>, transform_indices = @transform_12, window_bounds = array<i64: 1, 32>}, {transform_indices = @transform_13, window_bounds = array<i64: 1, 1, 32>}]} {
    %c0 = arith.constant 0 : index
    %c0_0 = arith.constant 0 : index
    %c0_1 = arith.constant 0 : index
    %0 = vector.load %arg2[%c0, %c0_0, %c0_1] : memref<1x1x32xf32, #tpu.memory_space<vmem>>, vector<1x1x32xf32>
    %1 = vector.shape_cast %0 : vector<1x1x32xf32> to vector<1x32xf32>
    %c0_2 = arith.constant 0 : index
    %c0_3 = arith.constant 0 : index
    %c0_4 = arith.constant 0 : index
    %2 = vector.load %arg1[%c0_2, %c0_3, %c0_4] : memref<1x16x32xf32, #tpu.memory_space<vmem>>, vector<1x16x32xf32>
    %3 = vector.shape_cast %2 : vector<1x16x32xf32> to vector<16x32xf32>
    %4 = tpu.concatenate %1, %3 in 0 : vector<1x32xf32>, vector<16x32xf32> -> vector<17x32xf32>
    %c0_5 = arith.constant 0 : index
    %c0_6 = arith.constant 0 : index
    %5 = vector.load %arg3[%c0_5, %c0_6] : memref<1x32xf32, #tpu.memory_space<vmem>>, vector<1x32xf32>
    %c0_7 = arith.constant 0 : index
    %c0_8 = arith.constant 0 : index
    %6 = vector.load %arg4[%c0_7, %c0_8] : memref<1x32xf32, #tpu.memory_space<vmem>>, vector<1x32xf32>
    %cst = arith.constant dense<0.000000e+00> : vector<17xf32>
    %7 = vector.multi_reduction <add>, %4, %cst [1] : vector<17x32xf32> to vector<17xf32>
    %8 = vector.shape_cast %7 : vector<17xf32> to vector<17x1xf32>
    %cst_9 = arith.constant 3.200000e+01 : f32
    %9 = vector.broadcast %cst_9 : f32 to vector<17x1xf32>
    %10 = arith.divf %8, %9 : vector<17x1xf32>
    %11 = vector.broadcast %10 : vector<17x1xf32> to vector<17x32xf32>
    %12 = arith.subf %4, %11 : vector<17x32xf32>
    %13 = arith.mulf %12, %12 : vector<17x32xf32>
    %cst_10 = arith.constant dense<0.000000e+00> : vector<17xf32>
    %14 = vector.multi_reduction <add>, %13, %cst_10 [1] : vector<17x32xf32> to vector<17xf32>
    %15 = vector.shape_cast %14 : vector<17xf32> to vector<17x1xf32>
    %cst_11 = arith.constant 3.200000e+01 : f32
    %16 = vector.broadcast %cst_11 : f32 to vector<17x1xf32>
    %17 = arith.divf %15, %16 : vector<17x1xf32>
    %18 = vector.broadcast %10 : vector<17x1xf32> to vector<17x32xf32>
    %19 = arith.subf %4, %18 : vector<17x32xf32>
    %cst_12 = arith.constant 9.99999997E-7 : f32
    %20 = vector.broadcast %cst_12 : f32 to vector<17x1xf32>
    %21 = arith.addf %17, %20 : vector<17x1xf32>
    %22 = math.rsqrt %21 : vector<17x1xf32>
    %23 = vector.broadcast %22 : vector<17x1xf32> to vector<17x32xf32>
    %24 = arith.mulf %19, %23 : vector<17x32xf32>
    %25 = vector.broadcast %5 : vector<1x32xf32> to vector<17x32xf32>
    %26 = arith.mulf %24, %25 : vector<17x32xf32>
    %27 = vector.broadcast %6 : vector<1x32xf32> to vector<17x32xf32>
    %28 = arith.addf %26, %27 : vector<17x32xf32>
    %29 = arith.truncf %28 : vector<17x32xf32> to vector<17x32xbf16>
    %30 = vector.extract_strided_slice %29 {offsets = [0, 0], sizes = [1, 32], strides = [1, 1]} : vector<17x32xbf16> to vector<1x32xbf16>
    %c0_13 = arith.constant 0 : index
    %c0_14 = arith.constant 0 : index
    %31 = vector.load %arg5[%c0_13, %c0_14] : memref<32x32xbf16, #tpu.memory_space<vmem>>, vector<32x32xbf16>
    %cst_15 = arith.constant dense<0.000000e+00> : vector<1x32xf32>
    %32 = tpu.matmul %30, %31, %cst_15 {dimension_numbers = #tpu.dot_dimension_numbers<[1], [0], [0], [1], [0, 0, 1, 1], [], []>} : vector<1x32xbf16>, vector<32x32xbf16>, vector<1x32xf32> -> vector<1x32xf32>
    %c0_16 = arith.constant 0 : index
    %c0_17 = arith.constant 0 : index
    %33 = vector.load %arg6[%c0_16, %c0_17] : memref<1x32xf32, #tpu.memory_space<vmem>>, vector<1x32xf32>
    %34 = arith.addf %32, %33 : vector<1x32xf32>
    %cst_18 = arith.constant 0.353553385 : f32
    %35 = vector.broadcast %cst_18 : f32 to vector<1x32xf32>
    %36 = arith.mulf %34, %35 : vector<1x32xf32>
    %c0_19 = arith.constant 0 : index
    %c0_20 = arith.constant 0 : index
    %37 = vector.load %arg7[%c0_19, %c0_20] : memref<32x32xbf16, #tpu.memory_space<vmem>>, vector<32x32xbf16>
    %cst_21 = arith.constant dense<0.000000e+00> : vector<17x32xf32>
    %38 = tpu.matmul %29, %37, %cst_21 {dimension_numbers = #tpu.dot_dimension_numbers<[1], [0], [0], [1], [0, 0, 1, 1], [], []>} : vector<17x32xbf16>, vector<32x32xbf16>, vector<17x32xf32> -> vector<17x32xf32>
    %c0_22 = arith.constant 0 : index
    %c0_23 = arith.constant 0 : index
    %39 = vector.load %arg8[%c0_22, %c0_23] : memref<1x32xf32, #tpu.memory_space<vmem>>, vector<1x32xf32>
    %40 = vector.broadcast %39 : vector<1x32xf32> to vector<17x32xf32>
    %41 = arith.addf %38, %40 : vector<17x32xf32>
    %c0_24 = arith.constant 0 : index
    %c0_25 = arith.constant 0 : index
    %42 = vector.load %arg9[%c0_24, %c0_25] : memref<32x32xbf16, #tpu.memory_space<vmem>>, vector<32x32xbf16>
    %cst_26 = arith.constant dense<0.000000e+00> : vector<17x32xf32>
    %43 = tpu.matmul %29, %42, %cst_26 {dimension_numbers = #tpu.dot_dimension_numbers<[1], [0], [0], [1], [0, 0, 1, 1], [], []>} : vector<17x32xbf16>, vector<32x32xbf16>, vector<17x32xf32> -> vector<17x32xf32>
    %c0_27 = arith.constant 0 : index
    %c0_28 = arith.constant 0 : index
    %44 = vector.load %arg10[%c0_27, %c0_28] : memref<1x32xf32, #tpu.memory_space<vmem>>, vector<1x32xf32>
    %45 = vector.broadcast %44 : vector<1x32xf32> to vector<17x32xf32>
    %46 = arith.addf %43, %45 : vector<17x32xf32>
    %47 = arith.truncf %36 : vector<1x32xf32> to vector<1x32xbf16>
    %48 = arith.truncf %41 : vector<17x32xf32> to vector<17x32xbf16>
    %49 = arith.truncf %46 : vector<17x32xf32> to vector<17x32xbf16>
    %50 = vector.extract_strided_slice %47 {offsets = [0, 0], sizes = [1, 8], strides = [1, 1]} : vector<1x32xbf16> to vector<1x8xbf16>
    %51 = vector.extract_strided_slice %48 {offsets = [0, 0], sizes = [17, 8], strides = [1, 1]} : vector<17x32xbf16> to vector<17x8xbf16>
    "tpu.trace_start"() <{level = 10 : i32, message = "qd,kd->qk"}> : () -> ()
    %cst_29 = arith.constant dense<0.000000e+00> : vector<1x17xf32>
    %52 = tpu.matmul %50, %51, %cst_29 {dimension_numbers = #tpu.dot_dimension_numbers<[1], [1], [0], [0], [0, 0, 1, 0], [], []>} : vector<1x8xbf16>, vector<17x8xbf16>, vector<1x17xf32> -> vector<1x17xf32>
    "tpu.trace_stop"() : () -> ()
    %cst_30 = arith.constant dense<0xFF800000> : vector<1xf32>
    %53 = vector.multi_reduction <maximumf>, %52, %cst_30 [1] : vector<1x17xf32> to vector<1xf32>
    %54 = vector.shape_cast %53 : vector<1xf32> to vector<1x1xf32>
    %55 = vector.broadcast %54 : vector<1x1xf32> to vector<1x17xf32>
    %56 = arith.subf %52, %55 : vector<1x17xf32>
    %57 = math.exp %56 : vector<1x17xf32>
    %cst_31 = arith.constant dense<0.000000e+00> : vector<1xf32>
    %58 = vector.multi_reduction <add>, %57, %cst_31 [1] : vector<1x17xf32> to vector<1xf32>
    %59 = vector.shape_cast %58 : vector<1xf32> to vector<1x1xf32>
    %60 = vector.broadcast %59 : vector<1x1xf32> to vector<1x17xf32>
    %61 = arith.divf %57, %60 : vector<1x17xf32>
    %62 = arith.truncf %61 : vector<1x17xf32> to vector<1x17xbf16>
    %63 = vector.extract_strided_slice %49 {offsets = [0, 0], sizes = [17, 8], strides = [1, 1]} : vector<17x32xbf16> to vector<17x8xbf16>
    %cst_32 = arith.constant dense<0.000000e+00> : vector<1x8xf32>
    %64 = tpu.matmul %62, %63, %cst_32 {dimension_numbers = #tpu.dot_dimension_numbers<[1], [0], [0], [1], [0, 0, 1, 1], [], []>} : vector<1x17xbf16>, vector<17x8xbf16>, vector<1x8xf32> -> vector<1x8xf32>
    %65 = vector.extract_strided_slice %47 {offsets = [0, 8], sizes = [1, 8], strides = [1, 1]} : vector<1x32xbf16> to vector<1x8xbf16>
    %66 = vector.extract_strided_slice %48 {offsets = [0, 8], sizes = [17, 8], strides = [1, 1]} : vector<17x32xbf16> to vector<17x8xbf16>
    "tpu.trace_start"() <{level = 10 : i32, message = "qd,kd->qk"}> : () -> ()
    %cst_33 = arith.constant dense<0.000000e+00> : vector<1x17xf32>
    %67 = tpu.matmul %65, %66, %cst_33 {dimension_numbers = #tpu.dot_dimension_numbers<[1], [1], [0], [0], [0, 0, 1, 0], [], []>} : vector<1x8xbf16>, vector<17x8xbf16>, vector<1x17xf32> -> vector<1x17xf32>
    "tpu.trace_stop"() : () -> ()
    %cst_34 = arith.constant dense<0xFF800000> : vector<1xf32>
    %68 = vector.multi_reduction <maximumf>, %67, %cst_34 [1] : vector<1x17xf32> to vector<1xf32>
    %69 = vector.shape_cast %68 : vector<1xf32> to vector<1x1xf32>
    %70 = vector.broadcast %69 : vector<1x1xf32> to vector<1x17xf32>
    %71 = arith.subf %67, %70 : vector<1x17xf32>
    %72 = math.exp %71 : vector<1x17xf32>
    %cst_35 = arith.constant dense<0.000000e+00> : vector<1xf32>
    %73 = vector.multi_reduction <add>, %72, %cst_35 [1] : vector<1x17xf32> to vector<1xf32>
    %74 = vector.shape_cast %73 : vector<1xf32> to vector<1x1xf32>
    %75 = vector.broadcast %74 : vector<1x1xf32> to vector<1x17xf32>
    %76 = arith.divf %72, %75 : vector<1x17xf32>
    %77 = arith.truncf %76 : vector<1x17xf32> to vector<1x17xbf16>
    %78 = vector.extract_strided_slice %49 {offsets = [0, 8], sizes = [17, 8], strides = [1, 1]} : vector<17x32xbf16> to vector<17x8xbf16>
    %cst_36 = arith.constant dense<0.000000e+00> : vector<1x8xf32>
    %79 = tpu.matmul %77, %78, %cst_36 {dimension_numbers = #tpu.dot_dimension_numbers<[1], [0], [0], [1], [0, 0, 1, 1], [], []>} : vector<1x17xbf16>, vector<17x8xbf16>, vector<1x8xf32> -> vector<1x8xf32>
    %80 = vector.extract_strided_slice %47 {offsets = [0, 16], sizes = [1, 8], strides = [1, 1]} : vector<1x32xbf16> to vector<1x8xbf16>
    %81 = vector.extract_strided_slice %48 {offsets = [0, 16], sizes = [17, 8], strides = [1, 1]} : vector<17x32xbf16> to vector<17x8xbf16>
    "tpu.trace_start"() <{level = 10 : i32, message = "qd,kd->qk"}> : () -> ()
    %cst_37 = arith.constant dense<0.000000e+00> : vector<1x17xf32>
    %82 = tpu.matmul %80, %81, %cst_37 {dimension_numbers = #tpu.dot_dimension_numbers<[1], [1], [0], [0], [0, 0, 1, 0], [], []>} : vector<1x8xbf16>, vector<17x8xbf16>, vector<1x17xf32> -> vector<1x17xf32>
    "tpu.trace_stop"() : () -> ()
    %cst_38 = arith.constant dense<0xFF800000> : vector<1xf32>
    %83 = vector.multi_reduction <maximumf>, %82, %cst_38 [1] : vector<1x17xf32> to vector<1xf32>
    %84 = vector.shape_cast %83 : vector<1xf32> to vector<1x1xf32>
    %85 = vector.broadcast %84 : vector<1x1xf32> to vector<1x17xf32>
    %86 = arith.subf %82, %85 : vector<1x17xf32>
    %87 = math.exp %86 : vector<1x17xf32>
    %cst_39 = arith.constant dense<0.000000e+00> : vector<1xf32>
    %88 = vector.multi_reduction <add>, %87, %cst_39 [1] : vector<1x17xf32> to vector<1xf32>
    %89 = vector.shape_cast %88 : vector<1xf32> to vector<1x1xf32>
    %90 = vector.broadcast %89 : vector<1x1xf32> to vector<1x17xf32>
    %91 = arith.divf %87, %90 : vector<1x17xf32>
    %92 = arith.truncf %91 : vector<1x17xf32> to vector<1x17xbf16>
    %93 = vector.extract_strided_slice %49 {offsets = [0, 16], sizes = [17, 8], strides = [1, 1]} : vector<17x32xbf16> to vector<17x8xbf16>
    %cst_40 = arith.constant dense<0.000000e+00> : vector<1x8xf32>
    %94 = tpu.matmul %92, %93, %cst_40 {dimension_numbers = #tpu.dot_dimension_numbers<[1], [0], [0], [1], [0, 0, 1, 1], [], []>} : vector<1x17xbf16>, vector<17x8xbf16>, vector<1x8xf32> -> vector<1x8xf32>
    %95 = vector.extract_strided_slice %47 {offsets = [0, 24], sizes = [1, 8], strides = [1, 1]} : vector<1x32xbf16> to vector<1x8xbf16>
    %96 = vector.extract_strided_slice %48 {offsets = [0, 24], sizes = [17, 8], strides = [1, 1]} : vector<17x32xbf16> to vector<17x8xbf16>
    "tpu.trace_start"() <{level = 10 : i32, message = "qd,kd->qk"}> : () -> ()
    %cst_41 = arith.constant dense<0.000000e+00> : vector<1x17xf32>
    %97 = tpu.matmul %95, %96, %cst_41 {dimension_numbers = #tpu.dot_dimension_numbers<[1], [1], [0], [0], [0, 0, 1, 0], [], []>} : vector<1x8xbf16>, vector<17x8xbf16>, vector<1x17xf32> -> vector<1x17xf32>
    "tpu.trace_stop"() : () -> ()
    %cst_42 = arith.constant dense<0xFF800000> : vector<1xf32>
    %98 = vector.multi_reduction <maximumf>, %97, %cst_42 [1] : vector<1x17xf32> to vector<1xf32>
    %99 = vector.shape_cast %98 : vector<1xf32> to vector<1x1xf32>
    %100 = vector.broadcast %99 : vector<1x1xf32> to vector<1x17xf32>
    %101 = arith.subf %97, %100 : vector<1x17xf32>
    %102 = math.exp %101 : vector<1x17xf32>
    %cst_43 = arith.constant dense<0.000000e+00> : vector<1xf32>
    %103 = vector.multi_reduction <add>, %102, %cst_43 [1] : vector<1x17xf32> to vector<1xf32>
    %104 = vector.shape_cast %103 : vector<1xf32> to vector<1x1xf32>
    %105 = vector.broadcast %104 : vector<1x1xf32> to vector<1x17xf32>
    %106 = arith.divf %102, %105 : vector<1x17xf32>
    %107 = arith.truncf %106 : vector<1x17xf32> to vector<1x17xbf16>
    %108 = vector.extract_strided_slice %49 {offsets = [0, 24], sizes = [17, 8], strides = [1, 1]} : vector<17x32xbf16> to vector<17x8xbf16>
    %cst_44 = arith.constant dense<0.000000e+00> : vector<1x8xf32>
    %109 = tpu.matmul %107, %108, %cst_44 {dimension_numbers = #tpu.dot_dimension_numbers<[1], [0], [0], [1], [0, 0, 1, 1], [], []>} : vector<1x17xbf16>, vector<17x8xbf16>, vector<1x8xf32> -> vector<1x8xf32>
    %110 = tpu.concatenate %64, %79, %94, %109 in 1 : vector<1x8xf32>, vector<1x8xf32>, vector<1x8xf32>, vector<1x8xf32> -> vector<1x32xf32>
    %111 = arith.truncf %110 : vector<1x32xf32> to vector<1x32xbf16>
    %c0_45 = arith.constant 0 : index
    %c0_46 = arith.constant 0 : index
    %112 = vector.load %arg11[%c0_45, %c0_46] : memref<32x32xbf16, #tpu.memory_space<vmem>>, vector<32x32xbf16>
    %cst_47 = arith.constant dense<0.000000e+00> : vector<1x32xf32>
    %113 = tpu.matmul %111, %112, %cst_47 {dimension_numbers = #tpu.dot_dimension_numbers<[1], [0], [0], [1], [0, 0, 1, 1], [], []>} : vector<1x32xbf16>, vector<32x32xbf16>, vector<1x32xf32> -> vector<1x32xf32>
    %c0_48 = arith.constant 0 : index
    %c0_49 = arith.constant 0 : index
    %114 = vector.load %arg12[%c0_48, %c0_49] : memref<1x32xf32, #tpu.memory_space<vmem>>, vector<1x32xf32>
    %115 = arith.addf %113, %114 : vector<1x32xf32>
    %c0_50 = arith.constant 0 : index
    %c0_51 = arith.constant 0 : index
    %116 = vector.load %arg13[%c0_50, %c0_51] : memref<1x32xf32, #tpu.memory_space<vmem>>, vector<1x32xf32>
    %117 = arith.mulf %116, %115 : vector<1x32xf32>
    %118 = arith.addf %1, %117 : vector<1x32xf32>
    %c0_52 = arith.constant 0 : index
    %c0_53 = arith.constant 0 : index
    %c0_54 = arith.constant 0 : index
    %119 = vector.load %arg14[%c0_52, %c0_53, %c0_54] : memref<1x1x32xf32, #tpu.memory_space<vmem>>, vector<1x1x32xf32>
    %120 = vector.shape_cast %119 : vector<1x1x32xf32> to vector<1x32xf32>
    %121 = vector.shape_cast %118 : vector<1x32xf32> to vector<1x1x32xf32>
    tpu.vector_store %arg14[%c0_52, %c0_53, %c0_54], %121 {strides = array<i32>} : memref<1x1x32xf32, #tpu.memory_space<vmem>>, vector<1x1x32xf32>,
    return
  }
  func.func @transform_0(%arg0: i32) -> (i32, i32, i32) {
    %c0_i32 = arith.constant 0 : i32
    %c0_i32_0 = arith.constant 0 : i32
    %c0_i32_1 = arith.constant 0 : i32
    return %arg0, %c0_i32, %c0_i32_0 : i32, i32, i32
  }
  func.func @transform_1(%arg0: i32) -> (i32, i32, i32) {
    %c0_i32 = arith.constant 0 : i32
    %c0_i32_0 = arith.constant 0 : i32
    %c0_i32_1 = arith.constant 0 : i32
    return %arg0, %c0_i32, %c0_i32_0 : i32, i32, i32
  }
  func.func @transform_2(%arg0: i32) -> (i32, i32) {
    %c0_i32 = arith.constant 0 : i32
    %c0_i32_0 = arith.constant 0 : i32
    %c0_i32_1 = arith.constant 0 : i32
    return %c0_i32, %c0_i32_0 : i32, i32
  }
  func.func @transform_3(%arg0: i32) -> (i32, i32) {
    %c0_i32 = arith.constant 0 : i32
    %c0_i32_0 = arith.constant 0 : i32
    %c0_i32_1 = arith.constant 0 : i32
    return %c0_i32, %c0_i32_0 : i32, i32
  }
  func.func @transform_4(%arg0: i32) -> (i32, i32) {
    %c0_i32 = arith.constant 0 : i32
    %c0_i32_0 = arith.constant 0 : i32
    %c0_i32_1 = arith.constant 0 : i32
    return %c0_i32, %c0_i32_0 : i32, i32
  }
  func.func @transform_5(%arg0: i32) -> (i32, i32) {
    %c0_i32 = arith.constant 0 : i32
    %c0_i32_0 = arith.constant 0 : i32
    %c0_i32_1 = arith.constant 0 : i32
    return %c0_i32, %c0_i32_0 : i32, i32
  }
  func.func @transform_6(%arg0: i32) -> (i32, i32) {
    %c0_i32 = arith.constant 0 : i32
    %c0_i32_0 = arith.constant 0 : i32
    %c0_i32_1 = arith.constant 0 : i32
    return %c0_i32, %c0_i32_0 : i32, i32
  }
  func.func @transform_7(%arg0: i32) -> (i32, i32) {
    %c0_i32 = arith.constant 0 : i32
    %c0_i32_0 = arith.constant 0 : i32
    %c0_i32_1 = arith.constant 0 : i32
    return %c0_i32, %c0_i32_0 : i32, i32
  }
  func.func @transform_8(%arg0: i32) -> (i32, i32) {
    %c0_i32 = arith.constant 0 : i32
    %c0_i32_0 = arith.constant 0 : i32
    %c0_i32_1 = arith.constant 0 : i32
    return %c0_i32, %c0_i32_0 : i32, i32
  }
  func.func @transform_9(%arg0: i32) -> (i32, i32) {
    %c0_i32 = arith.constant 0 : i32
    %c0_i32_0 = arith.constant 0 : i32
    %c0_i32_1 = arith.constant 0 : i32
    return %c0_i32, %c0_i32_0 : i32, i32
  }
  func.func @transform_10(%arg0: i32) -> (i32, i32) {
    %c0_i32 = arith.constant 0 : i32
    %c0_i32_0 = arith.constant 0 : i32
    %c0_i32_1 = arith.constant 0 : i32
    return %c0_i32, %c0_i32_0 : i32, i32
  }
  func.func @transform_11(%arg0: i32) -> (i32, i32) {
    %c0_i32 = arith.constant 0 : i32
    %c0_i32_0 = arith.constant 0 : i32
    %c0_i32_1 = arith.constant 0 : i32
    return %c0_i32, %c0_i32_0 : i32, i32
  }
  func.func @transform_12(%arg0: i32) -> (i32, i32) {
    %c0_i32 = arith.constant 0 : i32
    %c0_i32_0 = arith.constant 0 : i32
    %c0_i32_1 = arith.constant 0 : i32
    return %c0_i32, %c0_i32_0 : i32, i32
  }
  func.func @transform_13(%arg0: i32) -> (i32, i32, i32) {
    %c0_i32 = arith.constant 0 : i32
    %c0_i32_0 = arith.constant 0 : i32
    %c0_i32_1 = arith.constant 0 : i32
    return %arg0, %c0_i32, %c0_i32_0 : i32, i32, i32
  }
}

module attributes {stable_mosaic.version = 11 : i64} {
  func.func @_ln_linear_kernel(%arg0: i32, %arg1: memref<2x32xf32, #tpu.memory_space<vmem>>, %arg2: memref<1x32xf32, #tpu.memory_space<vmem>>, %arg3: memref<1x32xf32, #tpu.memory_space<vmem>>, %arg4: memref<32x128xbf16, #tpu.memory_space<vmem>>, %arg5: memref<1x128xf32, #tpu.memory_space<vmem>>, %arg6: memref<2x128xf32, #tpu.memory_space<vmem>>) attributes {dimension_semantics = [#tpu.dimension_semantics<parallel>], iteration_bounds = array<i64: 1>, scalar_prefetch = 0 : i64, scratch_operands = 0 : i64, tpu.core_type = #tpu.core_type<tc>, window_params = [{transform_indices = @transform_0, window_bounds = array<i64: 2, 32>}, {pipeline_mode = #tpu.pipeline_mode<synchronous>, transform_indices = @transform_1, window_bounds = array<i64: 1, 32>}, {pipeline_mode = #tpu.pipeline_mode<synchronous>, transform_indices = @transform_2, window_bounds = array<i64: 1, 32>}, {pipeline_mode = #tpu.pipeline_mode<synchronous>, transform_indices = @transform_3, window_bounds = array<i64: 32, 128>}, {pipeline_mode = #tpu.pipeline_mode<synchronous>, transform_indices = @transform_4, window_bounds = array<i64: 1, 128>}, {transform_indices = @transform_5, window_bounds = array<i64: 2, 128>}]} {
    %c0 = arith.constant 0 : index
    %c0_0 = arith.constant 0 : index
    %0 = vector.load %arg1[%c0, %c0_0] : memref<2x32xf32, #tpu.memory_space<vmem>>, vector<2x32xf32>
    %c0_1 = arith.constant 0 : index
    %c0_2 = arith.constant 0 : index
    %1 = vector.load %arg2[%c0_1, %c0_2] : memref<1x32xf32, #tpu.memory_space<vmem>>, vector<1x32xf32>
    %c0_3 = arith.constant 0 : index
    %c0_4 = arith.constant 0 : index
    %2 = vector.load %arg3[%c0_3, %c0_4] : memref<1x32xf32, #tpu.memory_space<vmem>>, vector<1x32xf32>
    %cst = arith.constant dense<0.000000e+00> : vector<2xf32>
    %3 = vector.multi_reduction <add>, %0, %cst [1] : vector<2x32xf32> to vector<2xf32>
    %4 = vector.shape_cast %3 : vector<2xf32> to vector<2x1xf32>
    %cst_5 = arith.constant 3.200000e+01 : f32
    %5 = vector.broadcast %cst_5 : f32 to vector<2x1xf32>
    %6 = arith.divf %4, %5 : vector<2x1xf32>
    %7 = vector.broadcast %6 : vector<2x1xf32> to vector<2x32xf32>
    %8 = arith.subf %0, %7 : vector<2x32xf32>
    %9 = arith.mulf %8, %8 : vector<2x32xf32>
    %cst_6 = arith.constant dense<0.000000e+00> : vector<2xf32>
    %10 = vector.multi_reduction <add>, %9, %cst_6 [1] : vector<2x32xf32> to vector<2xf32>
    %11 = vector.shape_cast %10 : vector<2xf32> to vector<2x1xf32>
    %cst_7 = arith.constant 3.200000e+01 : f32
    %12 = vector.broadcast %cst_7 : f32 to vector<2x1xf32>
    %13 = arith.divf %11, %12 : vector<2x1xf32>
    %14 = vector.broadcast %6 : vector<2x1xf32> to vector<2x32xf32>
    %15 = arith.subf %0, %14 : vector<2x32xf32>
    %cst_8 = arith.constant 9.99999997E-7 : f32
    %16 = vector.broadcast %cst_8 : f32 to vector<2x1xf32>
    %17 = arith.addf %13, %16 : vector<2x1xf32>
    %18 = math.rsqrt %17 : vector<2x1xf32>
    %19 = vector.broadcast %18 : vector<2x1xf32> to vector<2x32xf32>
    %20 = arith.mulf %15, %19 : vector<2x32xf32>
    %21 = vector.broadcast %1 : vector<1x32xf32> to vector<2x32xf32>
    %22 = arith.mulf %20, %21 : vector<2x32xf32>
    %23 = vector.broadcast %2 : vector<1x32xf32> to vector<2x32xf32>
    %24 = arith.addf %22, %23 : vector<2x32xf32>
    %25 = arith.truncf %24 : vector<2x32xf32> to vector<2x32xbf16>
    %c0_9 = arith.constant 0 : index
    %c0_10 = arith.constant 0 : index
    %26 = vector.load %arg4[%c0_9, %c0_10] : memref<32x128xbf16, #tpu.memory_space<vmem>>, vector<32x128xbf16>
    %cst_11 = arith.constant dense<0.000000e+00> : vector<2x128xf32>
    %27 = tpu.matmul %25, %26, %cst_11 {dimension_numbers = #tpu.dot_dimension_numbers<[1], [0], [0], [1], [0, 0, 1, 1], [], []>} : vector<2x32xbf16>, vector<32x128xbf16>, vector<2x128xf32> -> vector<2x128xf32>
    %c0_12 = arith.constant 0 : index
    %c0_13 = arith.constant 0 : index
    %28 = vector.load %arg5[%c0_12, %c0_13] : memref<1x128xf32, #tpu.memory_space<vmem>>, vector<1x128xf32>
    %29 = vector.broadcast %28 : vector<1x128xf32> to vector<2x128xf32>
    %30 = arith.addf %27, %29 : vector<2x128xf32>
    %c0_14 = arith.constant 0 : index
    %c0_15 = arith.constant 0 : index
    %31 = vector.load %arg6[%c0_14, %c0_15] : memref<2x128xf32, #tpu.memory_space<vmem>>, vector<2x128xf32>
    tpu.vector_store %arg6[%c0_14, %c0_15], %30 {strides = array<i32>} : memref<2x128xf32, #tpu.memory_space<vmem>>, vector<2x128xf32>,
    return
  }
  func.func @transform_0(%arg0: i32) -> (i32, i32) {
    %c0_i32 = arith.constant 0 : i32
    %c0_i32_0 = arith.constant 0 : i32
    return %arg0, %c0_i32 : i32, i32
  }
  func.func @transform_1(%arg0: i32) -> (i32, i32) {
    %c0_i32 = arith.constant 0 : i32
    %c0_i32_0 = arith.constant 0 : i32
    %c0_i32_1 = arith.constant 0 : i32
    return %c0_i32, %c0_i32_0 : i32, i32
  }
  func.func @transform_2(%arg0: i32) -> (i32, i32) {
    %c0_i32 = arith.constant 0 : i32
    %c0_i32_0 = arith.constant 0 : i32
    %c0_i32_1 = arith.constant 0 : i32
    return %c0_i32, %c0_i32_0 : i32, i32
  }
  func.func @transform_3(%arg0: i32) -> (i32, i32) {
    %c0_i32 = arith.constant 0 : i32
    %c0_i32_0 = arith.constant 0 : i32
    %c0_i32_1 = arith.constant 0 : i32
    return %c0_i32, %c0_i32_0 : i32, i32
  }
  func.func @transform_4(%arg0: i32) -> (i32, i32) {
    %c0_i32 = arith.constant 0 : i32
    %c0_i32_0 = arith.constant 0 : i32
    %c0_i32_1 = arith.constant 0 : i32
    return %c0_i32, %c0_i32_0 : i32, i32
  }
  func.func @transform_5(%arg0: i32) -> (i32, i32) {
    %c0_i32 = arith.constant 0 : i32
    %c0_i32_0 = arith.constant 0 : i32
    return %arg0, %c0_i32 : i32, i32
  }
}

module attributes {stable_mosaic.version = 11 : i64} {
  func.func @_linear_scale_res_kernel(%arg0: i32, %arg1: memref<2x128xf32, #tpu.memory_space<vmem>>, %arg2: memref<128x32xbf16, #tpu.memory_space<vmem>>, %arg3: memref<1x32xf32, #tpu.memory_space<vmem>>, %arg4: memref<1x32xf32, #tpu.memory_space<vmem>>, %arg5: memref<2x32xf32, #tpu.memory_space<vmem>>, %arg6: memref<2x32xf32, #tpu.memory_space<vmem>>) attributes {dimension_semantics = [#tpu.dimension_semantics<parallel>], iteration_bounds = array<i64: 1>, scalar_prefetch = 0 : i64, scratch_operands = 0 : i64, tpu.core_type = #tpu.core_type<tc>, window_params = [{transform_indices = @transform_0, window_bounds = array<i64: 2, 128>}, {pipeline_mode = #tpu.pipeline_mode<synchronous>, transform_indices = @transform_1, window_bounds = array<i64: 128, 32>}, {pipeline_mode = #tpu.pipeline_mode<synchronous>, transform_indices = @transform_2, window_bounds = array<i64: 1, 32>}, {pipeline_mode = #tpu.pipeline_mode<synchronous>, transform_indices = @transform_3, window_bounds = array<i64: 1, 32>}, {transform_indices = @transform_4, window_bounds = array<i64: 2, 32>}, {transform_indices = @transform_5, window_bounds = array<i64: 2, 32>}]} {
    %c0 = arith.constant 0 : index
    %c0_0 = arith.constant 0 : index
    %0 = vector.load %arg1[%c0, %c0_0] : memref<2x128xf32, #tpu.memory_space<vmem>>, vector<2x128xf32>
    %1 = arith.truncf %0 : vector<2x128xf32> to vector<2x128xbf16>
    %c0_1 = arith.constant 0 : index
    %c0_2 = arith.constant 0 : index
    %2 = vector.load %arg2[%c0_1, %c0_2] : memref<128x32xbf16, #tpu.memory_space<vmem>>, vector<128x32xbf16>
    %cst = arith.constant dense<0.000000e+00> : vector<2x32xf32>
    %3 = tpu.matmul %1, %2, %cst {dimension_numbers = #tpu.dot_dimension_numbers<[1], [0], [0], [1], [0, 0, 1, 1], [], []>} : vector<2x128xbf16>, vector<128x32xbf16>, vector<2x32xf32> -> vector<2x32xf32>
    %c0_3 = arith.constant 0 : index
    %c0_4 = arith.constant 0 : index
    %4 = vector.load %arg3[%c0_3, %c0_4] : memref<1x32xf32, #tpu.memory_space<vmem>>, vector<1x32xf32>
    %5 = vector.broadcast %4 : vector<1x32xf32> to vector<2x32xf32>
    %6 = arith.addf %3, %5 : vector<2x32xf32>
    %c0_5 = arith.constant 0 : index
    %c0_6 = arith.constant 0 : index
    %7 = vector.load %arg5[%c0_5, %c0_6] : memref<2x32xf32, #tpu.memory_space<vmem>>, vector<2x32xf32>
    %c0_7 = arith.constant 0 : index
    %c0_8 = arith.constant 0 : index
    %8 = vector.load %arg4[%c0_7, %c0_8] : memref<1x32xf32, #tpu.memory_space<vmem>>, vector<1x32xf32>
    %9 = vector.broadcast %8 : vector<1x32xf32> to vector<2x32xf32>
    %10 = arith.mulf %9, %6 : vector<2x32xf32>
    %11 = arith.addf %7, %10 : vector<2x32xf32>
    %c0_9 = arith.constant 0 : index
    %c0_10 = arith.constant 0 : index
    %12 = vector.load %arg6[%c0_9, %c0_10] : memref<2x32xf32, #tpu.memory_space<vmem>>, vector<2x32xf32>
    tpu.vector_store %arg6[%c0_9, %c0_10], %11 {strides = array<i32>} : memref<2x32xf32, #tpu.memory_space<vmem>>, vector<2x32xf32>,
    return
  }
  func.func @transform_0(%arg0: i32) -> (i32, i32) {
    %c0_i32 = arith.constant 0 : i32
    %c0_i32_0 = arith.constant 0 : i32
    return %arg0, %c0_i32 : i32, i32
  }
  func.func @transform_1(%arg0: i32) -> (i32, i32) {
    %c0_i32 = arith.constant 0 : i32
    %c0_i32_0 = arith.constant 0 : i32
    %c0_i32_1 = arith.constant 0 : i32
    return %c0_i32, %c0_i32_0 : i32, i32
  }
  func.func @transform_2(%arg0: i32) -> (i32, i32) {
    %c0_i32 = arith.constant 0 : i32
    %c0_i32_0 = arith.constant 0 : i32
    %c0_i32_1 = arith.constant 0 : i32
    return %c0_i32, %c0_i32_0 : i32, i32
  }
  func.func @transform_3(%arg0: i32) -> (i32, i32) {
    %c0_i32 = arith.constant 0 : i32
    %c0_i32_0 = arith.constant 0 : i32
    %c0_i32_1 = arith.constant 0 : i32
    return %c0_i32, %c0_i32_0 : i32, i32
  }
  func.func @transform_4(%arg0: i32) -> (i32, i32) {
    %c0_i32 = arith.constant 0 : i32
    %c0_i32_0 = arith.constant 0 : i32
    return %arg0, %c0_i32 : i32, i32
  }
  func.func @transform_5(%arg0: i32) -> (i32, i32) {
    %c0_i32 = arith.constant 0 : i32
    %c0_i32_0 = arith.constant 0 : i32
    return %arg0, %c0_i32 : i32, i32
  }
}

module attributes {stable_mosaic.version = 11 : i64} {
  func.func @_ln_linear_kernel(%arg0: i32, %arg1: memref<2x32xf32, #tpu.memory_space<vmem>>, %arg2: memref<1x32xf32, #tpu.memory_space<vmem>>, %arg3: memref<1x32xf32, #tpu.memory_space<vmem>>, %arg4: memref<32x128xbf16, #tpu.memory_space<vmem>>, %arg5: memref<1x128xf32, #tpu.memory_space<vmem>>, %arg6: memref<2x128xf32, #tpu.memory_space<vmem>>) attributes {dimension_semantics = [#tpu.dimension_semantics<parallel>], iteration_bounds = array<i64: 1>, scalar_prefetch = 0 : i64, scratch_operands = 0 : i64, tpu.core_type = #tpu.core_type<tc>, window_params = [{transform_indices = @transform_0, window_bounds = array<i64: 2, 32>}, {pipeline_mode = #tpu.pipeline_mode<synchronous>, transform_indices = @transform_1, window_bounds = array<i64: 1, 32>}, {pipeline_mode = #tpu.pipeline_mode<synchronous>, transform_indices = @transform_2, window_bounds = array<i64: 1, 32>}, {pipeline_mode = #tpu.pipeline_mode<synchronous>, transform_indices = @transform_3, window_bounds = array<i64: 32, 128>}, {pipeline_mode = #tpu.pipeline_mode<synchronous>, transform_indices = @transform_4, window_bounds = array<i64: 1, 128>}, {transform_indices = @transform_5, window_bounds = array<i64: 2, 128>}]} {
    %c0 = arith.constant 0 : index
    %c0_0 = arith.constant 0 : index
    %0 = vector.load %arg1[%c0, %c0_0] : memref<2x32xf32, #tpu.memory_space<vmem>>, vector<2x32xf32>
    %c0_1 = arith.constant 0 : index
    %c0_2 = arith.constant 0 : index
    %1 = vector.load %arg2[%c0_1, %c0_2] : memref<1x32xf32, #tpu.memory_space<vmem>>, vector<1x32xf32>
    %c0_3 = arith.constant 0 : index
    %c0_4 = arith.constant 0 : index
    %2 = vector.load %arg3[%c0_3, %c0_4] : memref<1x32xf32, #tpu.memory_space<vmem>>, vector<1x32xf32>
    %cst = arith.constant dense<0.000000e+00> : vector<2xf32>
    %3 = vector.multi_reduction <add>, %0, %cst [1] : vector<2x32xf32> to vector<2xf32>
    %4 = vector.shape_cast %3 : vector<2xf32> to vector<2x1xf32>
    %cst_5 = arith.constant 3.200000e+01 : f32
    %5 = vector.broadcast %cst_5 : f32 to vector<2x1xf32>
    %6 = arith.divf %4, %5 : vector<2x1xf32>
    %7 = vector.broadcast %6 : vector<2x1xf32> to vector<2x32xf32>
    %8 = arith.subf %0, %7 : vector<2x32xf32>
    %9 = arith.mulf %8, %8 : vector<2x32xf32>
    %cst_6 = arith.constant dense<0.000000e+00> : vector<2xf32>
    %10 = vector.multi_reduction <add>, %9, %cst_6 [1] : vector<2x32xf32> to vector<2xf32>
    %11 = vector.shape_cast %10 : vector<2xf32> to vector<2x1xf32>
    %cst_7 = arith.constant 3.200000e+01 : f32
    %12 = vector.broadcast %cst_7 : f32 to vector<2x1xf32>
    %13 = arith.divf %11, %12 : vector<2x1xf32>
    %14 = vector.broadcast %6 : vector<2x1xf32> to vector<2x32xf32>
    %15 = arith.subf %0, %14 : vector<2x32xf32>
    %cst_8 = arith.constant 9.99999997E-7 : f32
    %16 = vector.broadcast %cst_8 : f32 to vector<2x1xf32>
    %17 = arith.addf %13, %16 : vector<2x1xf32>
    %18 = math.rsqrt %17 : vector<2x1xf32>
    %19 = vector.broadcast %18 : vector<2x1xf32> to vector<2x32xf32>
    %20 = arith.mulf %15, %19 : vector<2x32xf32>
    %21 = vector.broadcast %1 : vector<1x32xf32> to vector<2x32xf32>
    %22 = arith.mulf %20, %21 : vector<2x32xf32>
    %23 = vector.broadcast %2 : vector<1x32xf32> to vector<2x32xf32>
    %24 = arith.addf %22, %23 : vector<2x32xf32>
    %25 = arith.truncf %24 : vector<2x32xf32> to vector<2x32xbf16>
    %c0_9 = arith.constant 0 : index
    %c0_10 = arith.constant 0 : index
    %26 = vector.load %arg4[%c0_9, %c0_10] : memref<32x128xbf16, #tpu.memory_space<vmem>>, vector<32x128xbf16>
    %cst_11 = arith.constant dense<0.000000e+00> : vector<2x128xf32>
    %27 = tpu.matmul %25, %26, %cst_11 {dimension_numbers = #tpu.dot_dimension_numbers<[1], [0], [0], [1], [0, 0, 1, 1], [], []>} : vector<2x32xbf16>, vector<32x128xbf16>, vector<2x128xf32> -> vector<2x128xf32>
    %c0_12 = arith.constant 0 : index
    %c0_13 = arith.constant 0 : index
    %28 = vector.load %arg5[%c0_12, %c0_13] : memref<1x128xf32, #tpu.memory_space<vmem>>, vector<1x128xf32>
    %29 = vector.broadcast %28 : vector<1x128xf32> to vector<2x128xf32>
    %30 = arith.addf %27, %29 : vector<2x128xf32>
    %c0_14 = arith.constant 0 : index
    %c0_15 = arith.constant 0 : index
    %31 = vector.load %arg6[%c0_14, %c0_15] : memref<2x128xf32, #tpu.memory_space<vmem>>, vector<2x128xf32>
    tpu.vector_store %arg6[%c0_14, %c0_15], %30 {strides = array<i32>} : memref<2x128xf32, #tpu.memory_space<vmem>>, vector<2x128xf32>,
    return
  }
  func.func @transform_0(%arg0: i32) -> (i32, i32) {
    %c0_i32 = arith.constant 0 : i32
    %c0_i32_0 = arith.constant 0 : i32
    return %arg0, %c0_i32 : i32, i32
  }
  func.func @transform_1(%arg0: i32) -> (i32, i32) {
    %c0_i32 = arith.constant 0 : i32
    %c0_i32_0 = arith.constant 0 : i32
    %c0_i32_1 = arith.constant 0 : i32
    return %c0_i32, %c0_i32_0 : i32, i32
  }
  func.func @transform_2(%arg0: i32) -> (i32, i32) {
    %c0_i32 = arith.constant 0 : i32
    %c0_i32_0 = arith.constant 0 : i32
    %c0_i32_1 = arith.constant 0 : i32
    return %c0_i32, %c0_i32_0 : i32, i32
  }
  func.func @transform_3(%arg0: i32) -> (i32, i32) {
    %c0_i32 = arith.constant 0 : i32
    %c0_i32_0 = arith.constant 0 : i32
    %c0_i32_1 = arith.constant 0 : i32
    return %c0_i32, %c0_i32_0 : i32, i32
  }
  func.func @transform_4(%arg0: i32) -> (i32, i32) {
    %c0_i32 = arith.constant 0 : i32
    %c0_i32_0 = arith.constant 0 : i32
    %c0_i32_1 = arith.constant 0 : i32
    return %c0_i32, %c0_i32_0 : i32, i32
  }
  func.func @transform_5(%arg0: i32) -> (i32, i32) {
    %c0_i32 = arith.constant 0 : i32
    %c0_i32_0 = arith.constant 0 : i32
    return %arg0, %c0_i32 : i32, i32
  }
}

module attributes {stable_mosaic.version = 11 : i64} {
  func.func @_ln_linear_kernel(%arg0: i32, %arg1: memref<2x32xf32, #tpu.memory_space<vmem>>, %arg2: memref<1x32xf32, #tpu.memory_space<vmem>>, %arg3: memref<1x32xf32, #tpu.memory_space<vmem>>, %arg4: memref<32x10xbf16, #tpu.memory_space<vmem>>, %arg5: memref<1x10xf32, #tpu.memory_space<vmem>>, %arg6: memref<2x10xf32, #tpu.memory_space<vmem>>) attributes {dimension_semantics = [#tpu.dimension_semantics<parallel>], iteration_bounds = array<i64: 1>, scalar_prefetch = 0 : i64, scratch_operands = 0 : i64, tpu.core_type = #tpu.core_type<tc>, window_params = [{transform_indices = @transform_0, window_bounds = array<i64: 2, 32>}, {pipeline_mode = #tpu.pipeline_mode<synchronous>, transform_indices = @transform_1, window_bounds = array<i64: 1, 32>}, {pipeline_mode = #tpu.pipeline_mode<synchronous>, transform_indices = @transform_2, window_bounds = array<i64: 1, 32>}, {pipeline_mode = #tpu.pipeline_mode<synchronous>, transform_indices = @transform_3, window_bounds = array<i64: 32, 10>}, {pipeline_mode = #tpu.pipeline_mode<synchronous>, transform_indices = @transform_4, window_bounds = array<i64: 1, 10>}, {transform_indices = @transform_5, window_bounds = array<i64: 2, 10>}]} {
    %c0 = arith.constant 0 : index
    %c0_0 = arith.constant 0 : index
    %0 = vector.load %arg1[%c0, %c0_0] : memref<2x32xf32, #tpu.memory_space<vmem>>, vector<2x32xf32>
    %c0_1 = arith.constant 0 : index
    %c0_2 = arith.constant 0 : index
    %1 = vector.load %arg2[%c0_1, %c0_2] : memref<1x32xf32, #tpu.memory_space<vmem>>, vector<1x32xf32>
    %c0_3 = arith.constant 0 : index
    %c0_4 = arith.constant 0 : index
    %2 = vector.load %arg3[%c0_3, %c0_4] : memref<1x32xf32, #tpu.memory_space<vmem>>, vector<1x32xf32>
    %cst = arith.constant dense<0.000000e+00> : vector<2xf32>
    %3 = vector.multi_reduction <add>, %0, %cst [1] : vector<2x32xf32> to vector<2xf32>
    %4 = vector.shape_cast %3 : vector<2xf32> to vector<2x1xf32>
    %cst_5 = arith.constant 3.200000e+01 : f32
    %5 = vector.broadcast %cst_5 : f32 to vector<2x1xf32>
    %6 = arith.divf %4, %5 : vector<2x1xf32>
    %7 = vector.broadcast %6 : vector<2x1xf32> to vector<2x32xf32>
    %8 = arith.subf %0, %7 : vector<2x32xf32>
    %9 = arith.mulf %8, %8 : vector<2x32xf32>
    %cst_6 = arith.constant dense<0.000000e+00> : vector<2xf32>
    %10 = vector.multi_reduction <add>, %9, %cst_6 [1] : vector<2x32xf32> to vector<2xf32>
    %11 = vector.shape_cast %10 : vector<2xf32> to vector<2x1xf32>
    %cst_7 = arith.constant 3.200000e+01 : f32
    %12 = vector.broadcast %cst_7 : f32 to vector<2x1xf32>
    %13 = arith.divf %11, %12 : vector<2x1xf32>
    %14 = vector.broadcast %6 : vector<2x1xf32> to vector<2x32xf32>
    %15 = arith.subf %0, %14 : vector<2x32xf32>
    %cst_8 = arith.constant 9.99999997E-7 : f32
    %16 = vector.broadcast %cst_8 : f32 to vector<2x1xf32>
    %17 = arith.addf %13, %16 : vector<2x1xf32>
    %18 = math.rsqrt %17 : vector<2x1xf32>
    %19 = vector.broadcast %18 : vector<2x1xf32> to vector<2x32xf32>
    %20 = arith.mulf %15, %19 : vector<2x32xf32>
    %21 = vector.broadcast %1 : vector<1x32xf32> to vector<2x32xf32>
    %22 = arith.mulf %20, %21 : vector<2x32xf32>
    %23 = vector.broadcast %2 : vector<1x32xf32> to vector<2x32xf32>
    %24 = arith.addf %22, %23 : vector<2x32xf32>
    %25 = arith.truncf %24 : vector<2x32xf32> to vector<2x32xbf16>
    %c0_9 = arith.constant 0 : index
    %c0_10 = arith.constant 0 : index
    %26 = vector.load %arg4[%c0_9, %c0_10] : memref<32x10xbf16, #tpu.memory_space<vmem>>, vector<32x10xbf16>
    %cst_11 = arith.constant dense<0.000000e+00> : vector<2x10xf32>
    %27 = tpu.matmul %25, %26, %cst_11 {dimension_numbers = #tpu.dot_dimension_numbers<[1], [0], [0], [1], [0, 0, 1, 1], [], []>} : vector<2x32xbf16>, vector<32x10xbf16>, vector<2x10xf32> -> vector<2x10xf32>
    %c0_12 = arith.constant 0 : index
    %c0_13 = arith.constant 0 : index
    %28 = vector.load %arg5[%c0_12, %c0_13] : memref<1x10xf32, #tpu.memory_space<vmem>>, vector<1x10xf32>
    %29 = vector.broadcast %28 : vector<1x10xf32> to vector<2x10xf32>
    %30 = arith.addf %27, %29 : vector<2x10xf32>
    %c0_14 = arith.constant 0 : index
    %c0_15 = arith.constant 0 : index
    %31 = vector.load %arg6[%c0_14, %c0_15] : memref<2x10xf32, #tpu.memory_space<vmem>>, vector<2x10xf32>
    tpu.vector_store %arg6[%c0_14, %c0_15], %30 {strides = array<i32>} : memref<2x10xf32, #tpu.memory_space<vmem>>, vector<2x10xf32>,
    return
  }
  func.func @transform_0(%arg0: i32) -> (i32, i32) {
    %c0_i32 = arith.constant 0 : i32
    %c0_i32_0 = arith.constant 0 : i32
    return %arg0, %c0_i32 : i32, i32
  }
  func.func @transform_1(%arg0: i32) -> (i32, i32) {
    %c0_i32 = arith.constant 0 : i32
    %c0_i32_0 = arith.constant 0 : i32
    %c0_i32_1 = arith.constant 0 : i32
    return %c0_i32, %c0_i32_0 : i32, i32
  }
  func.func @transform_2(%arg0: i32) -> (i32, i32) {
    %c0_i32 = arith.constant 0 : i32
    %c0_i32_0 = arith.constant 0 : i32
    %c0_i32_1 = arith.constant 0 : i32
    return %c0_i32, %c0_i32_0 : i32, i32
  }
  func.func @transform_3(%arg0: i32) -> (i32, i32) {
    %c0_i32 = arith.constant 0 : i32
    %c0_i32_0 = arith.constant 0 : i32
    %c0_i32_1 = arith.constant 0 : i32
    return %c0_i32, %c0_i32_0 : i32, i32
  }
  func.func @transform_4(%arg0: i32) -> (i32, i32) {
    %c0_i32 = arith.constant 0 : i32
    %c0_i32_0 = arith.constant 0 : i32
    %c0_i32_1 = arith.constant 0 : i32
    return %c0_i32, %c0_i32_0 : i32, i32
  }
  func.func @transform_5(%arg0: i32) -> (i32, i32) {
    %c0_i32 = arith.constant 0 : i32
    %c0_i32_0 = arith.constant 0 : i32
    return %arg0, %c0_i32 : i32, i32
  }
}

</mosaic_0001>

<bundles_post_ra>
// kernel: cait_forward.19
= control target key start
LH: loop header
LB: loop body
LE: loop exit
PB: predicated region body
PF: predicated region fallthrough
CT: control target
= control target key end

     0   :  { %vm27_vm0 = vcmask 261120   ;;  %v221_v8 = vmov 32.0   ;;  %vm184_vm14 = vcmask 785408   ;;  %s321_s0 = inlined_call_operand.vmem [shape: f32[32,32], index: 0, kind: input, shape index: {}]   ;;  %s322_s1 = inlined_call_operand.vmem [shape: f32[1,32], index: 1, kind: input, shape index: {}]   ;;  %s323_s2 = inlined_call_operand.vmem [shape: f32[1,32], index: 2, kind: input, shape index: {}]   ;;  %s324_s4 = inlined_call_operand.vmem [shape: f32[1,96], index: 4, kind: input, shape index: {}]   ;;  %s325_s3 = inlined_call_operand.vmem [shape: bf16[32,96], index: 3, kind: input, shape index: {}]   ;;  %s326_s5 = inlined_call_operand.vmem [shape: f32[32,96], index: 5, kind: output, shape index: {}]  }
   0x1   :  { %v23_v0 = vld [vmem:[%s321_s0 + $0x10] sm:$0xff]  ;;  %v21_v1 = vld [vmem:[%s321_s0] sm:$0xff]  ;;  %v24_v4 = vld [vmem:[%s321_s0 + $0x18] sm:$0xff]  ;;  %211 = vrcp.f32 %v221_v8 }
   0x2   :  { %v34_v2 = vsel %vm27_vm0, %v23_v0, 0.0  ;;  %v28_v3 = vsel %vm27_vm0, %v21_v1, 0.0  ;;  %v22_v5 = vld [vmem:[%s321_s0 + $0x8] sm:$0xff]  ;;  %v37_v6 = vsel %vm27_vm0, %v24_v4, 0.0  ;;  %v203_v40 = vld [vmem:[%s325_s3] sm:$0xff] }
   0x3   :  { %35 = vadd.xlane.f32.xlu1 %v34_v2  ;;  %29 = vadd.xlane.f32.xlu0 %v28_v3  ;;  %v31_v7 = vsel %vm27_vm0, %v22_v5, 0.0  ;;  %v204_v35 = vld [vmem:[%s325_s3 + $0x8] sm:$0xff] }
   0x4   :  { %171 = vmatpush.bf16.msra.mxu0 %v204_v35  ;;  %205 = vmatpush.bf16.msra.mxu1 %v204_v35 }
   0x7   :  { %v212_v9 = vpop.eup %211 }
   0x8   :  { %v41_v10 = vmul.f32 32.0, %v212_v9  ;;  %vm45_vm1 = vweird.f32 %v212_v9  ;;  %172 = vmatpush.bf16.msra.mxu0 %v203_v40  ;;  %206 = vmatpush.bf16.msra.mxu1 %v203_v40 }
   0xa   :  { %v42_v11 = vsub.f32 1.0, %v41_v10  ;;  %v208_v10 = vld [vmem:[%s322_s1] ss:$0 sm:$0xff] }
   0xb   :  { %38 = vadd.xlane.f32.xlu1 %v37_v6  ;;  %32 = vadd.xlane.f32.xlu0 %v31_v7 }
   0xc   :  { %v43_v12 = vmul.f32 %v212_v9, %v42_v11 }
   0xe   :  { %v44_v13 = vadd.f32 %v212_v9, %v43_v12 }
  0x10   :  { %v46_v14 = vsel %vm45_vm1, %v212_v9, %v44_v13 }
  0x76   :  { %v36_v15 = vpop.xlane.xlu1 %35  ;;  %v30_v16 = vpop.xlane.xlu0 %29 }
  0x77   :  { %v49_v17 = vmul.f32 %v46_v14, %v36_v15  ;;  %v47_v18 = vmul.f32 %v46_v14, %v30_v16 }
  0x79   :  { %v268_v19 = vsub.f32 %v23_v0, %v49_v17  ;;  %v270_v20 = vsub.f32 %v21_v1, %v47_v18  ;;  %v209_v17 = vld [vmem:[%s323_s2] ss:$0 sm:$0xff] }
  0x7b   :  { %v57_v21 = vmul.f32 %v268_v19, %v268_v19  ;;  %v55_v22 = vmul.f32 %v270_v20, %v270_v20 }
  0x7d   :  { %v65_v23 = vsel %vm27_vm0, %v57_v21, 0.0  ;;  %v59_v24 = vsel %vm27_vm0, %v55_v22, 0.0 }
  0x7e   :  { %v39_v25 = vpop.xlane.xlu1 %38  ;;  %66 = vadd.xlane.f32.xlu0 %v65_v23  ;;  %60 = vadd.xlane.f32.xlu2 %v59_v24  ;;  %v33_v26 = vpop.xlane.xlu0 %32 }
  0x7f   :  { %v50_v27 = vmul.f32 %v46_v14, %v39_v25  ;;  %v48_v28 = vmul.f32 %v46_v14, %v33_v26 }
  0x81   :  { %v278_v29 = vsub.f32 %v24_v4, %v50_v27  ;;  %v280_v30 = vsub.f32 %v22_v5, %v48_v28 }
  0x83   :  { %v58_v31 = vmul.f32 %v278_v29, %v278_v29  ;;  %v56_v32 = vmul.f32 %v280_v30, %v280_v30 }
  0x85   :  { %v68_v33 = vsel %vm27_vm0, %v58_v31, 0.0  ;;  %v62_v34 = vsel %vm27_vm0, %v56_v32, 0.0 }
  0x86   :  { %69 = vadd.xlane.f32.xlu1 %v68_v33  ;;  %63 = vadd.xlane.f32.xlu2 %v62_v34 }
  0xf1   :  { %v61_v36 = vpop.xlane.xlu2 %60  ;;  %v67_v37 = vpop.xlane.xlu0 %66 }
  0xf2   :  { %v71_v38 = vmul.f32 %v61_v36, %v46_v14  ;;  %v73_v39 = vmul.f32 %v67_v37, %v46_v14 }
  0xf4   :  { %v75_v41 = vadd.f32 1e-06, %v71_v38  ;;  %v77_v42 = vadd.f32 1e-06, %v73_v39 }
  0xf6   :  { %213 = vrsqrt.f32 %v75_v41  ;;  %vm105_vm4 = vweird.f32 %v77_v42  ;;  %vm85_vm5 = vweird.f32 %v75_v41 }
  0xf7   :  { %215 = vrsqrt.f32 %v77_v42 }
  0xf9   :  { %v70_v43 = vpop.xlane.xlu1 %69  ;;  %v64_v44 = vpop.xlane.xlu2 %63 }
  0xfa   :  { %v74_v45 = vmul.f32 %v70_v43, %v46_v14  ;;  %v72_v46 = vmul.f32 %v64_v44, %v46_v14 }
  0xfc   :  { %v214_v47 = vpop.eup %213  ;;  %v78_v48 = vadd.f32 1e-06, %v74_v45  ;;  %v76_v49 = vadd.f32 1e-06, %v72_v46 }
  0xfd   :  { %v216_v50 = vpop.eup %215  ;;  %v80_v51 = vmul.f32 %v214_v47, %v75_v41  ;;  %vm86_vm3 = vweird.f32 %v214_v47 }
  0xfe   :  { %v100_v52 = vmul.f32 %v216_v50, %v77_v42  ;;  %217 = vrsqrt.f32 %v78_v48  ;;  %vm106_vm2 = vweird.f32 %v216_v50  ;;  %vm87_vm7 = vmor %vm85_vm5, %vm86_vm3  ;;  %vm115_vm10 = vweird.f32 %v78_v48 }
  0xff   :  { %v81_v53 = vmul.f32 %v214_v47, %v80_v51  ;;  %219 = vrsqrt.f32 %v76_v49  ;;  %vm107_vm6 = vmor %vm105_vm4, %vm106_vm2  ;;  %vm95_vm12 = vweird.f32 %v76_v49 }
 0x100   :  { %v101_v54 = vmul.f32 %v216_v50, %v100_v52 }
 0x101   :  { %v82_v55 = vmul.f32 0.5, %v81_v53 }
 0x102   :  { %v102_v56 = vmul.f32 0.5, %v101_v54 }
 0x103   :  { %v83_v57 = vsub.f32 1.5, %v82_v55 }
 0x104   :  { %v218_v58 = vpop.eup %217  ;;  %v103_v59 = vsub.f32 1.5, %v102_v56 }
 0x105   :  { %v220_v60 = vpop.eup %219  ;;  %v110_v61 = vmul.f32 %v218_v58, %v78_v48  ;;  %v84_v62 = vmul.f32 %v214_v47, %v83_v57  ;;  %vm116_vm8 = vweird.f32 %v218_v58 }
 0x106   :  { %v104_v63 = vmul.f32 %v216_v50, %v103_v59  ;;  %v90_v0 = vmul.f32 %v220_v60, %v76_v49  ;;  %vm96_vm9 = vweird.f32 %v220_v60  ;;  %vm117_vm11 = vmor %vm115_vm10, %vm116_vm8 }
 0x107   :  { %v111_v1 = vmul.f32 %v218_v58, %v110_v61  ;;  %v88_v5 = vsel %vm87_vm7, %v214_v47, %v84_v62  ;;  %vm97_vm13 = vmor %vm95_vm12, %vm96_vm9 }
 0x108   :  { %v91_v2 = vmul.f32 %v220_v60, %v90_v0  ;;  %v108_v3 = vsel %vm107_vm6, %v216_v50, %v104_v63  ;;  %v119_v11 = vmul.f32 %v88_v5, %v270_v20 }
 0x109   :  { %v112_v4 = vmul.f32 0.5, %v111_v1  ;;  %v121_v8 = vmul.f32 %v108_v3, %v268_v19 }
 0x10a   :  { %v92_v6 = vmul.f32 0.5, %v91_v2  ;;  %v126_v21 = vmul.f32 %v208_v10, %v119_v11 }
 0x10b   :  { %v113_v7 = vsub.f32 1.5, %v112_v4  ;;  %v128_v18 = vmul.f32 %v208_v10, %v121_v8 }
 0x10c   :  { %v93_v9 = vsub.f32 1.5, %v92_v6  ;;  %v133_v25 = vadd.f32 %v209_v17, %v126_v21 }
 0x10d   :  { %v114_v12 = vmul.f32 %v218_v58, %v113_v7  ;;  %v135_v23 = vadd.f32 %v209_v17, %v128_v18 }
 0x10e   :  { %v94_v13 = vmul.f32 %v220_v60, %v93_v9 }
 0x10f   :  { %v118_v14 = vsel %vm117_vm11, %v218_v58, %v114_v12 }
 0x110   :  { %v122_v15 = vmul.f32 %v118_v14, %v278_v29  ;;  %v98_v16 = vsel %vm97_vm13, %v220_v60, %v94_v13  ;;  %v210_v29 = vld [vmem:[%s324_s4] ss:$0 sm:$0xff] }
 0x111   :  { %v120_v19 = vmul.f32 %v98_v16, %v280_v30 }
 0x112   :  { %v129_v22 = vmul.f32 %v208_v10, %v122_v15 }
 0x113   :  { %v127_v20 = vmul.f32 %v208_v10, %v120_v19 }
 0x114   :  { %v136_v24 = vadd.f32 %v209_v17, %v129_v22 }
 0x115   :  { %v134_v26 = vadd.f32 %v209_v17, %v127_v20 }
 0x116   :  { %v138_v27 = vpack.c.bf16 %v136_v24, %v135_v23 }
 0x117   :  { %v137_v28 = vpack.c.bf16 %v134_v26, %v133_v25 }
 0x118   :  { %202 = vmatmul.msk.bf16.vlgmr.msra.gmra.mxu1 %vm27_vm0, %v138_v27 }
 0x119   :  { %201 = vmatmul.msk.bf16.vlgmr.msra.gmra.mxu0 %vm27_vm0, %v137_v28 }
 0x195   :  { %v179_v31 = vpop.f32.mrf.mxu1 }
 0x196   :  { %v174_v30 = vpop.f32.mrf.mxu0  ;;  %v180_v32 = vadd.f32 %v210_v29, %v179_v31 }
 0x197   :  { %v175_v33 = vadd.f32 %v210_v29, %v174_v30 }
 0x198   :  { %187 = vst.msk [vmem:[%s326_s5 + $0x10] sm:$0xff] %vm184_vm14, %v180_v32 }
 0x199   :  { %185 = vst.msk [vmem:[%s326_s5] sm:$0xff] %vm184_vm14, %v175_v33 }
 0x19d   :  { %v181_v34 = vpop.f32.mrf.mxu1 }
 0x19e   :  { %v176_v35 = vpop.f32.mrf.mxu0  ;;  %v182_v36 = vadd.f32 %v210_v29, %v181_v34 }
 0x19f   :  { %v177_v37 = vadd.f32 %v210_v29, %v176_v35 }
 0x1a0   :  { %188 = vst.msk [vmem:[%s326_s5 + $0x18] sm:$0xff] %vm184_vm14, %v182_v36 }
 0x1a1   :  { %186 = vst.msk [vmem:[%s326_s5 + $0x8] sm:$0xff] %vm184_vm14, %v177_v37 }

// kernel: cait_forward.21
= control target key start
LH: loop header
LB: loop body
LE: loop exit
PB: predicated region body
PF: predicated region fallthrough
CT: control target
= control target key end

     0   :  { %vm47_vm0 = vcmask 261120   ;;  %s197_s1 = inlined_call_operand.vmem [shape: bf16[32,32], index: 1, kind: input, shape index: {}]   ;;  %s198_s0 = inlined_call_operand.vmem [shape: f32[32,32], index: 0, kind: input, shape index: {}]   ;;  %s199_s2 = inlined_call_operand.vmem [shape: f32[1,32], index: 2, kind: input, shape index: {}]   ;;  %s200_s3 = inlined_call_operand.vmem [shape: f32[1,32], index: 3, kind: input, shape index: {}]   ;;  %s201_s4 = inlined_call_operand.vmem [shape: f32[32,32], index: 4, kind: input, shape index: {}]   ;;  %s202_s5 = inlined_call_operand.vmem [shape: f32[32,32], index: 5, kind: output, shape index: {}]  }
   0x1   :  { %v108_v0 = vld [vmem:[%s197_s1 + $0x8] sm:$0xff]  ;;  %v107_v1 = vld [vmem:[%s197_s1] sm:$0xff]  ;;  %v23_v4 = vld [vmem:[%s198_s0 + $0x10] sm:$0xff] }
   0x2   :  { %v21_v2 = vld [vmem:[%s198_s0] sm:$0xff]  ;;  %v22_v3 = vld [vmem:[%s198_s0 + $0x8] sm:$0xff]  ;;  %60 = vmatpush.bf16.msra.mxu0 %v108_v0  ;;  %109 = vmatpush.bf16.msra.mxu1 %v108_v0  ;;  %v24_v5 = vld [vmem:[%s198_s0 + $0x18] sm:$0xff] }
   0x3   :  { %v25_v6 = vpack.c.bf16 %v22_v3, %v21_v2  ;;  %v26_v7 = vpack.c.bf16 %v24_v5, %v23_v4  ;;  %v111_v8 = vld [vmem:[%s199_s2] ss:$0 sm:$0xff]  ;;  %v75_v15 = vld [vmem:[%s201_s4 + $0x10] sm:$0xff]  ;;  %v74_v24 = vld [vmem:[%s201_s4 + $0x8] sm:$0xff] }
   0x4   :  { %v112_v9 = vld [vmem:[%s200_s3] ss:$0 sm:$0xff]  ;;  %v76_v25 = vld [vmem:[%s201_s4 + $0x18] sm:$0xff] }
   0x5   :  { %v73_v14 = vld [vmem:[%s201_s4] sm:$0xff] }
   0x6   :  { %61 = vmatpush.bf16.msra.mxu0 %v107_v1  ;;  %110 = vmatpush.bf16.msra.mxu1 %v107_v1 }
   0x9   :  { %105 = vmatmul.msk.bf16.vlgmr.msra.gmra.mxu0 %vm47_vm0, %v25_v6  ;;  %106 = vmatmul.msk.bf16.vlgmr.msra.gmra.mxu1 %vm47_vm0, %v26_v7 }
  0x86   :  { %v63_v10 = vpop.f32.mrf.mxu0  ;;  %v68_v11 = vpop.f32.mrf.mxu1 }
  0x87   :  { %v64_v12 = vadd.f32 %v111_v8, %v63_v10  ;;  %v69_v13 = vadd.f32 %v111_v8, %v68_v11 }
  0x89   :  { %v81_v16 = vmul.f32 %v112_v9, %v64_v12  ;;  %v83_v17 = vmul.f32 %v112_v9, %v69_v13 }
  0x8b   :  { %v85_v18 = vadd.f32 %v81_v16, %v73_v14  ;;  %v87_v19 = vadd.f32 %v83_v17, %v75_v15 }
  0x8d   :  { %89 = vst.msk [vmem:[%s202_s5] sm:$0xff] %vm47_vm0, %v85_v18 }
  0x8e   :  { %91 = vst.msk [vmem:[%s202_s5 + $0x10] sm:$0xff] %vm47_vm0, %v87_v19  ;;  %v65_v20 = vpop.f32.mrf.mxu0  ;;  %v70_v21 = vpop.f32.mrf.mxu1 }
  0x8f   :  { %v66_v22 = vadd.f32 %v111_v8, %v65_v20  ;;  %v71_v23 = vadd.f32 %v111_v8, %v70_v21 }
  0x91   :  { %v82_v26 = vmul.f32 %v112_v9, %v66_v22  ;;  %v84_v27 = vmul.f32 %v112_v9, %v71_v23 }
  0x93   :  { %v86_v28 = vadd.f32 %v82_v26, %v74_v24  ;;  %v88_v29 = vadd.f32 %v84_v27, %v76_v25 }
  0x95   :  { %90 = vst.msk [vmem:[%s202_s5 + $0x8] sm:$0xff] %vm47_vm0, %v86_v28 }
  0x96   :  { %92 = vst.msk [vmem:[%s202_s5 + $0x18] sm:$0xff] %vm47_vm0, %v88_v29 }

// kernel: cait_forward.18
= control target key start
LH: loop header
LB: loop body
LE: loop exit
PB: predicated region body
PF: predicated region fallthrough
CT: control target
= control target key end

     0   :  { %vm49_vm0 = vcmask 392192   ;;  %vm75_vm1 = vcmask 261120   ;;  %s161_s1 = inlined_call_operand.vmem [shape: bf16[48,32], index: 1, kind: input, shape index: {}]   ;;  %s162_s2 = inlined_call_operand.vmem [shape: f32[1,32], index: 2, kind: input, shape index: {}]   ;;  %s163_s0 = inlined_call_operand.vmem [shape: f32[32,48], index: 0, kind: input, shape index: {}]   ;;  %s164_s3 = inlined_call_operand.vmem [shape: f32[32,32], index: 3, kind: output, shape index: {}]  }
   0x1   :  { %v100_v0 = vld [vmem:[%s161_s1 + $0x10] sm:$0xff]  ;;  %v99_v1 = vld [vmem:[%s161_s1 + $0x8] sm:$0xff]  ;;  %v98_v2 = vld [vmem:[%s161_s1] sm:$0xff] }
   0x2   :  { %61 = vmatpush.bf16.msra.mxu0 %v100_v0  ;;  %101 = vmatpush.bf16.msra.mxu1 %v100_v0  ;;  %v15_v3 = vld [vmem:[%s163_s0] sm:$0xff]  ;;  %v16_v4 = vld [vmem:[%s163_s0 + $0x8] sm:$0xff]  ;;  %v17_v5 = vld [vmem:[%s163_s0 + $0x10] sm:$0xff] }
   0x3   :  { %v18_v6 = vld [vmem:[%s163_s0 + $0x18] sm:$0xff]  ;;  %v19_v7 = vpack.c.bf16 %v16_v4, %v15_v3  ;;  %v104_v9 = vld [vmem:[%s162_s2] ss:$0 sm:$0xff] }
   0x4   :  { %v20_v8 = vpack.c.bf16 %v18_v6, %v17_v5 }
   0x6   :  { %62 = vmatpush.bf16.msra.mxu0 %v99_v1  ;;  %102 = vmatpush.bf16.msra.mxu1 %v99_v1 }
   0xa   :  { %63 = vmatpush.bf16.msra.mxu0 %v98_v2  ;;  %103 = vmatpush.bf16.msra.mxu1 %v98_v2 }
   0xd   :  { %96 = vmatmul.msk.bf16.vlgmr.msra.gmra.mxu0 %vm49_vm0, %v19_v7  ;;  %97 = vmatmul.msk.bf16.vlgmr.msra.gmra.mxu1 %vm49_vm0, %v20_v8 }
  0x8a   :  { %v65_v10 = vpop.f32.mrf.mxu0  ;;  %v70_v11 = vpop.f32.mrf.mxu1 }
  0x8b   :  { %v66_v12 = vadd.f32 %v104_v9, %v65_v10  ;;  %v71_v13 = vadd.f32 %v104_v9, %v70_v11 }
  0x8d   :  { %76 = vst.msk [vmem:[%s164_s3] sm:$0xff] %vm75_vm1, %v66_v12 }
  0x8e   :  { %78 = vst.msk [vmem:[%s164_s3 + $0x10] sm:$0xff] %vm75_vm1, %v71_v13 }
  0x92   :  { %v67_v14 = vpop.f32.mrf.mxu0  ;;  %v72_v15 = vpop.f32.mrf.mxu1 }
  0x93   :  { %v68_v16 = vadd.f32 %v104_v9, %v67_v14  ;;  %v73_v17 = vadd.f32 %v104_v9, %v72_v15 }
  0x95   :  { %77 = vst.msk [vmem:[%s164_s3 + $0x8] sm:$0xff] %vm75_vm1, %v68_v16 }
  0x96   :  { %79 = vst.msk [vmem:[%s164_s3 + $0x18] sm:$0xff] %vm75_vm1, %v73_v17 }

// kernel: cait_forward.20
= control target key start
LH: loop header
LB: loop body
LE: loop exit
PB: predicated region body
PF: predicated region fallthrough
CT: control target
= control target key end

     0   :  { %10 = vsyncpa [#allocation3], 0  ;;  %s1824_s0 = inlined_call_operand.vmem [shape: f32[2,16,96], index: 0, kind: input, shape index: {}]   ;;  %s1825_s1 = inlined_call_operand.vmem [shape: f32[4,4], index: 1, kind: input, shape index: {}]   ;;  %s1826_s2 = inlined_call_operand.vmem [shape: f32[4], index: 2, kind: input, shape index: {}]   ;;  %s1827_s3 = inlined_call_operand.vmem [shape: f32[4,4], index: 3, kind: input, shape index: {}]   ;;  %s1828_s4 = inlined_call_operand.vmem [shape: f32[4], index: 4, kind: input, shape index: {}]   ;;  %s1829_s5 = inlined_call_operand.vmem [shape: f32[2,16,32], index: 5, kind: output, shape index: {}]  }
   0x1   :  { %11 = vsyncpa [#allocation5], 0 }
   0x2   :  { %12 = vsyncpa [#allocation8], 0  ;;  %s1320_s18 = smov 0  }
   0x3 LB: > { %s181_s21 = sshll.u32 %s1826_s2, 4  ;;  %s1329_s22 = sadd.s32 4294967295, %s1276_s18   ;;  %s1276_s18 = sphi %s1320_s18, %s18_s18   ;;  %s182_s21 = int_to_ptr.vmem [resolvable:$true] %s181_s21 }
   0x4   : > { %p1046_p0 = scmp.ge.s32.totalorder %s1276_s18, 1  ;;  %p159_p1 = scmp.lt.s32.totalorder %s1276_s18, 3 }
   0x5   : > { %p1138_p2 = scmp.eq.s32.totalorder %s1329_s22, 0  ;;  %s171_s26 = sshll.u32 %s1825_s1, 4  ;;  %s172_s26 = int_to_ptr.vmem [resolvable:$true] %s171_s26 }
   0x6   : > { %p1334_p3 = pnand %p1046_p0, %p159_p1  ;;  %s191_s29 = sshll.u32 %s1827_s3, 4  ;;  %s192_s29 = int_to_ptr.vmem [resolvable:$true] %s191_s29 }
   0x7   : > { %s201_s7 = sshll.u32 %s1828_s4, 4  ;;  %s1278_s8 = smov [#allocation4]   ;;  %s202_s7 = int_to_ptr.vmem [resolvable:$true] %s201_s7 }
   0x8   : > { %p1125_p4 = pneg %p1334_p3  ;;  %s1279_s9 = smov [#allocation2]  }
   0x9   : > { %s1280_s10 = smov [#allocation6]   ;;  %s1281_s11 = smov [#allocation7]  }
   0xa   : > { %p1126_p5 = pnand %p1138_p2, %p1125_p4 }
   0xb   : > { %222 = sbr.rel (%p1334_p3) target bundleno = 988 (0x3dc), region = 40 }
   0xc   : > { %1131 = dma.vmem_to_smem (!%p1126_p5), %s182_s21, 16, %s1278_s8, [#allocation5]  }
   0xd   : > { %1128 = dma.vmem_to_smem (!%p1126_p5), %s172_s26, 64, %s1279_s9, [#allocation3]  }
   0xe   : > { %1134 = dma.vmem_to_smem (!%p1126_p5), %s192_s29, 64, %s1280_s10, [#allocation5]  }
   0xf   : > { %1137 = dma.vmem_to_smem (!%p1126_p5), %s202_s7, 16, %s1281_s11, [#allocation8]  }
  0x10   : > { %1263 = dma.done.wait (%p1138_p2), [#allocation3], 64  }
  0x11   : > { %1265 = vsyncadd (%p1138_p2), [#allocation3], 4294967232 }
  0x12   : > { %1267 = dma.done.wait (%p1138_p2), [#allocation5], 80  }
  0x13   : > { %1269 = vsyncadd (%p1138_p2), [#allocation5], 4294967216 }
  0x14   : > { %1271 = dma.done.wait (%p1138_p2), [#allocation8], 16  }
  0x15   : > { %1273 = vsyncadd (%p1138_p2), [#allocation8], 4294967280 }
  0x16   : > { %244 = sfence }
  0x17   : > { %p267_p6 = scmp.lt.s32.totalorder %s1329_s22, 1  ;;  %s1282_s16 = smov 104   ;;  %vm301_vm0 = vcmask 64512   ;;  %vm509_vm1 = vcmask 130048  }
  0x18   : > { %s1283_s17 = smov 112   ;;  %s1284_s19 = smov 120  }
  0x19   : > { %s1850_s22 = smov (!%p267_p6, %s1329_s22), 1  ;;  %s1285_s20 = smov 96  }
  0x1a   : > { %s1107_s12 = sshll.u32 %s1850_s22, 4  ;;  %s1399_s21 = sld [smem:[#allocation2]] }
  0x1b   : > { %s271_s15 = scalar_lea.vmem %s1824_s0, %s1107_s12  ;;  %s1401_s23 = sld [smem:[#allocation2 + $0x80]] }
  0x1c   : > { %v278_v0 = vld [vmem:[%s271_s15] sm:$0xff]  ;;  %v279_v2 = vld [vmem:[%s271_s15 + $0x8] sm:$0xff]  ;;  %s1403_s24 = sld [smem:[#allocation2 + $0x100]] }
  0x1d   : > { %v280_v1 = vpack.c.bf16 %v278_v0, %v278_v0  ;;  %v281_v3 = vpack.c.bf16 %v279_v2, %v279_v2  ;;  %s1405_s25 = sld [smem:[#allocation2 + $0x180]] }
  0x1e   : > { %s1407_s26 = sld [smem:[#allocation2 + $0x82]] }
  0x1f   : > { %292 = vrot.lane.b32.xlu1 %v280_v1, %s1282_s16  ;;  %288 = vrot.lane.b32.xlu0 %v280_v1, %s1283_s17  ;;  %v296_v4 = vunpack.c.l.b16 %v280_v1  ;;  %v297_v5 = vunpack.c.l.b16 %v281_v3  ;;  %s1409_s27 = sld [smem:[#allocation2 + $0x83]] }
  0x20   : > { %284 = vrot.lane.b32.xlu2 %v280_v1, %s1284_s19  ;;  %s1411_s28 = sld [smem:[#allocation2 + $0x1]]  ;;  %v406_v32 = vstv %s1399_s21 }
  0x21   : > { %v1375_v6 = vpack.c.b16 %v297_v5, %v296_v4  ;;  %s1413_s29 = sld [smem:[#allocation2 + $0x81]]  ;;  %v432_v33 = vstv %s1401_s23 }
  0x22   : > { %s1415_s30 = sld [smem:[#allocation2 + $0x101]]  ;;  %v458_v34 = vstv %s1403_s24 }
  0x23   : > { %s1417_s6 = sld [smem:[#allocation2 + $0x181]]  ;;  %v484_v37 = vstv %s1405_s25 }
  0x24   : > { %s1419_s7 = sld [smem:[#allocation2 + $0x2]]  ;;  %v442_v51 = vstv %s1407_s26 }
  0x25   : > { %s1421_s8 = sld [smem:[#allocation2 + $0x3]]  ;;  %v448_v52 = vstv %s1409_s27 }
  0x26   : > { %s1423_s9 = sld [smem:[#allocation2 + $0x182]]  ;;  %v410_v43 = vstv %s1411_s28 }
  0x27   : > { %294 = vrot.lane.b32.xlu1 %v281_v3, %s1282_s16  ;;  %290 = vrot.lane.b32.xlu0 %v281_v3, %s1283_s17  ;;  %s1428_s10 = sld [smem:[#allocation2 + $0x102]]  ;;  %v436_v46 = vstv %s1413_s29 }
  0x28   : > { %286 = vrot.lane.b32.xlu2 %v281_v3, %s1284_s19  ;;  %s1430_s11 = sld [smem:[#allocation2 + $0x183]]  ;;  %v462_v47 = vstv %s1415_s30  ;;  %s1286_s19 = smov 64  }
  0x29   : > { %s1433_s13 = sld [smem:[#allocation2 + $0x103]]  ;;  %v488_v48 = vstv %s1417_s6 }
  0x2a   : > { %s1440_s14 = sld [smem:[#allocation4 + $0x1]]  ;;  %v416_v54 = vstv %s1419_s7 }
  0x2b   : > { %s1445_s15 = sld [smem:[#allocation4]]  ;;  %v422_v55 = vstv %s1421_s8 }
  0x2c   : > { %v494_v56 = vstv %s1423_s9  ;;  %s1458_s16 = sld [smem:[#allocation4 + $0x3]] }
  0x2d   : > { %v468_v0 = vstv %s1428_s10  ;;  %s1465_s17 = sld [smem:[#allocation4 + $0x2]] }
  0x2e   : > { %s1535_s21 = sld [smem:[#allocation6 + $0x81]] }
  0x2f   : > { %s1537_s23 = sld [smem:[#allocation6 + $0x100]] }
  0x30   : > { %299 = vrot.lane.b32.xlu2 %v1375_v6, %s1285_s20  ;;  %s1539_s24 = sld [smem:[#allocation6 + $0x101]] }
  0x31   : > { %s1541_s25 = sld [smem:[#allocation6 + $0x180]] }
  0x32   : > { %s1543_s26 = sld [smem:[#allocation6 + $0x82]] }
  0x33   : > { %s1545_s27 = sld [smem:[#allocation6 + $0x83]] }
  0x34   : > { %s1547_s28 = sld [smem:[#allocation6 + $0x181]] }
  0x35   : > { %s1549_s29 = sld [smem:[#allocation7 + $0x1]] }
  0x36   : > { %s1551_s30 = sld [smem:[#allocation6 + $0x102]] }
  0x37   : > { %s1555_s6 = sld [smem:[#allocation6 + $0x103]] }
  0x38   : > { %s1559_s7 = sld [smem:[#allocation6]] }
  0x39   : > { %s1571_s8 = sld [smem:[#allocation7 + $0x2]] }
  0x3a   : > { %s1575_s9 = sld [smem:[#allocation6 + $0x1]] }
  0x3b   : > { %s1586_s10 = sld [smem:[#allocation6 + $0x182]] }
  0x7a   : > { %v285_v9 = vpop.permute.xlu2 %284 }
  0x7b   : > { %v322_v19 = vunpack.c.l.b16 %v285_v9 }
  0x82   : > { %v287_v18 = vpop.permute.xlu2 %286 }
  0x83   : > { %v323_v20 = vunpack.c.l.b16 %v287_v18 }
  0x85   : > { %v1384_v21 = vpack.c.b16 %v323_v20, %v322_v19  ;;  %v454_v20 = vstv %s1440_s14  ;;  %s1750_s14 = sld [smem:[#allocation6 + $0x2]] }
  0x8a   : > { %v300_v22 = vpop.permute.xlu2 %299 }
  0x8b   : > { %v306_v23 = vsel %vm301_vm0, %v300_v22, 0  ;;  %v428_v22 = vstv %s1445_s15  ;;  %s1768_s15 = sld [smem:[#allocation6 + $0x3]] }
  0x8c   : > { %315 = vmatpush.bf16.xpose.msra.mxu0 %v306_v23 }
  0x91   : > { %v293_v7 = vpop.permute.xlu1 %292  ;;  %v289_v8 = vpop.permute.xlu0 %288 }
  0x92   : > { %v372_v12 = vunpack.c.l.b16 %v293_v7  ;;  %v347_v13 = vunpack.c.l.b16 %v289_v8  ;;  %v500_v8 = vstv %s1430_s11  ;;  %s1592_s11 = sld [smem:[#allocation6 + $0x183]] }
  0x93   : > { %1061 = vmatmul.msk.bf16.vlgmr.msra.gmra.mxu0 %vm301_vm0, %v1375_v6 }
  0x99   : > { %v295_v10 = vpop.permute.xlu1 %294  ;;  %v291_v11 = vpop.permute.xlu0 %290 }
  0x9a   : > { %v373_v14 = vunpack.c.l.b16 %v295_v10  ;;  %v348_v15 = vunpack.c.l.b16 %v291_v11  ;;  %v474_v10 = vstv %s1433_s13  ;;  %s1729_s13 = sld [smem:[#allocation7 + $0x3]] }
  0x9c   : > { %v1378_v16 = vpack.c.b16 %v373_v14, %v372_v12  ;;  %v1380_v17 = vpack.c.b16 %v348_v15, %v347_v13 }
  0x9e   : > { %375 = vrot.lane.b32.xlu1 %v1378_v16, %s1285_s20  ;;  %350 = vrot.lane.b32.xlu0 %v1380_v17, %s1285_s20 }
  0xa6   : > { %325 = vrot.lane.b32.xlu0 %v1384_v21, %s1285_s20  ;;  %s1533_s20 = sld [smem:[#allocation6 + $0x80]] }
 0x110   : > { %v376_v24 = vpop.permute.xlu1 %375  ;;  %v351_v25 = vpop.permute.xlu0 %350 }
 0x111   : > { %v356_v26 = vsel %vm301_vm0, %v351_v25, 0  ;;  %v381_v27 = vsel %vm301_vm0, %v376_v24, 0  ;;  %v317_v30 = vpop.f32.mrf.mxu0 }
 0x112   : > { %365 = vmatpush.bf16.xpose.msra.mxu2 %v356_v26  ;;  %390 = vmatpush.bf16.xpose.msra.mxu3 %v381_v27  ;;  %v397_v31 = vmul.f32 0.35355338, %v317_v30 }
 0x114   : > { %v407_v36 = vmul.f32 %v406_v32, %v397_v31  ;;  %v433_v40 = vmul.f32 %v432_v33, %v397_v31  ;;  %v459_v41 = vmul.f32 %v458_v34, %v397_v31  ;;  %v485_v49 = vmul.f32 %v484_v37, %v397_v31 }
 0x118   : > { %v326_v28 = vpop.permute.xlu0 %325 }
 0x119   : > { %1063 = vmatmul.msk.bf16.vlgmr.msra.gmra.mxu2 %vm301_vm0, %v1380_v17  ;;  %1064 = vmatmul.msk.bf16.vlgmr.msra.gmra.mxu3 %vm301_vm0, %v1378_v16  ;;  %v331_v29 = vsel %vm301_vm0, %v326_v28, 0  ;;  %v319_v35 = vpop.f32.mrf.mxu0 }
 0x11a   : > { %340 = vmatpush.bf16.xpose.msra.mxu1 %v331_v29  ;;  %v1437_v42 = vmul.f32 0.35355338, %v319_v35 }
 0x11c   : > { %v408_v61 = vmul.f32 %v406_v32, %v1437_v42  ;;  %v434_v62 = vmul.f32 %v432_v33, %v1437_v42  ;;  %v486_v28 = vmul.f32 %v484_v37, %v1437_v42 }
 0x121   : > { %1062 = vmatmul.msk.bf16.vlgmr.msra.gmra.mxu1 %vm301_vm0, %v1384_v21 }
 0x19c   : > { %v367_v38 = vpop.f32.mrf.mxu2  ;;  %v392_v39 = vpop.f32.mrf.mxu3 }
 0x19d   : > { %v401_v44 = vmul.f32 0.35355338, %v367_v38  ;;  %v403_v53 = vmul.f32 0.35355338, %v392_v39  ;;  %v506_v39 = vstv %s1458_s16  ;;  %s1785_s16 = sld [smem:[#allocation7]] }
 0x19e   : > { %v342_v45 = vpop.f32.mrf.mxu1 }
 0x19f   : > { %v399_v50 = vmul.f32 0.35355338, %v342_v45  ;;  %v443_v63 = vmul.f32 %v442_v51, %v401_v44  ;;  %v417_v3 = vmul.f32 %v416_v54, %v401_v44  ;;  %v449_v7 = vmul.f32 %v448_v52, %v403_v53 }
 0x1a0   : > { %v423_v13 = vmul.f32 %v422_v55, %v403_v53  ;;  %v495_v14 = vmul.f32 %v494_v56, %v401_v44  ;;  %v469_v23 = vmul.f32 %v468_v0, %v401_v44  ;;  %v501_v29 = vmul.f32 %v500_v8, %v403_v53 }
 0x1a1   : > { %v411_v57 = vmul.f32 %v410_v43, %v399_v50  ;;  %v437_v58 = vmul.f32 %v436_v46, %v399_v50  ;;  %v463_v59 = vmul.f32 %v462_v47, %v399_v50  ;;  %v489_v60 = vmul.f32 %v488_v48, %v399_v50 }
 0x1a3   : > { %v439_v1 = vadd.f32 %v437_v58, %v433_v40  ;;  %v413_v2 = vadd.f32 %v411_v57, %v407_v36  ;;  %v491_v4 = vadd.f32 %v489_v60, %v485_v49  ;;  %v465_v9 = vadd.f32 %v463_v59, %v459_v41 }
 0x1a4   : > { %v369_v5 = vpop.f32.mrf.mxu2  ;;  %v394_v18 = vpop.f32.mrf.mxu3  ;;  %v475_v40 = vmul.f32 %v474_v10, %v403_v53 }
 0x1a5   : > { %v445_v11 = vadd.f32 %v443_v63, %v439_v1  ;;  %v419_v12 = vadd.f32 %v417_v3, %v413_v2  ;;  %v402_v15 = vmul.f32 0.35355338, %v369_v5  ;;  %v497_v27 = vadd.f32 %v495_v14, %v491_v4 }
 0x1a6   : > { %v344_v19 = vpop.f32.mrf.mxu1  ;;  %v471_v30 = vadd.f32 %v469_v23, %v465_v9  ;;  %v404_v31 = vmul.f32 0.35355338, %v394_v18  ;;  %v460_v2 = vmul.f32 %v458_v34, %v1437_v42 }
 0x1a7   : > { %v400_v24 = vmul.f32 0.35355338, %v344_v19  ;;  %v451_v25 = vadd.f32 %v449_v7, %v445_v11  ;;  %v425_v26 = vadd.f32 %v423_v13, %v419_v12  ;;  %v503_v41 = vadd.f32 %v501_v29, %v497_v27 }
 0x1a8   : > { %v418_v45 = vmul.f32 %v416_v54, %v402_v15  ;;  %v424_v58 = vmul.f32 %v422_v55, %v404_v31  ;;  %v444_v53 = vmul.f32 %v442_v51, %v402_v15  ;;  %v496_v59 = vmul.f32 %v494_v56, %v402_v15 }
 0x1a9   : > { %v412_v32 = vmul.f32 %v410_v43, %v400_v24  ;;  %v438_v33 = vmul.f32 %v436_v46, %v400_v24  ;;  %v490_v35 = vmul.f32 %v488_v48, %v400_v24  ;;  %v455_v36 = vadd.f32 %v454_v20, %v451_v25 }
 0x1aa   : > { %v429_v38 = vadd.f32 %v428_v22, %v425_v26  ;;  %v477_v43 = vadd.f32 %v475_v40, %v471_v30  ;;  %v480_v48 = vstv %s1465_s17  ;;  %v464_v60 = vmul.f32 %v462_v47, %v400_v24  ;;  %s1287_s17 = smov 8  }
 0x1ab   : > { %v414_v44 = vadd.f32 %v412_v32, %v408_v61  ;;  %v440_v49 = vadd.f32 %v438_v33, %v434_v62  ;;  %v516_v37 = vsel %vm509_vm1, %v455_v36, -inf  ;;  %v492_v46 = vadd.f32 %v490_v35, %v486_v28 }
 0x1ac   : > { %v510_v50 = vsel %vm509_vm1, %v429_v38, -inf  ;;  %517 = vmax.xlane.f32.xlu0 %v516_v37  ;;  %v507_v62 = vadd.f32 %v506_v39, %v503_v41  ;;  %v481_v63 = vadd.f32 %v480_v48, %v477_v43  ;;  %v450_v4 = vmul.f32 %v448_v52, %v404_v31 }
 0x1ad   : > { %511 = vmax.xlane.f32.xlu1 %v510_v50  ;;  %v420_v57 = vadd.f32 %v418_v45, %v414_v44  ;;  %v446_v61 = vadd.f32 %v444_v53, %v440_v49  ;;  %v498_v1 = vadd.f32 %v496_v59, %v492_v46  ;;  %v502_v5 = vmul.f32 %v500_v8, %v404_v31 }
 0x1ae   : > { %v466_v56 = vadd.f32 %v464_v60, %v460_v2  ;;  %v528_v47 = vsel %vm509_vm1, %v507_v62, -inf  ;;  %v522_v7 = vsel %vm509_vm1, %v481_v63, -inf  ;;  %v470_v11 = vmul.f32 %v468_v0, %v402_v15 }
 0x1af   : > { %v426_v54 = vadd.f32 %v424_v58, %v420_v57  ;;  %v452_v51 = vadd.f32 %v450_v4, %v446_v61  ;;  %v504_v9 = vadd.f32 %v502_v5, %v498_v1  ;;  %v476_v52 = vmul.f32 %v474_v10, %v404_v31 }
 0x1b0   : > { %v472_v42 = vadd.f32 %v470_v11, %v466_v56  ;;  %v733_v4 = vstv %s1535_s21  ;;  %v755_v56 = vstv %s1537_s23 }
 0x1b1   : > { %v430_v3 = vadd.f32 %v428_v22, %v426_v54  ;;  %v456_v34 = vadd.f32 %v454_v20, %v452_v51  ;;  %v508_v12 = vadd.f32 %v506_v39, %v504_v9 }
 0x1b2   : > { %v478_v13 = vadd.f32 %v476_v52, %v472_v42  ;;  %v781_v42 = vstv %s1541_s25 }
 0x1b3   : > { %v513_v55 = vsel %vm509_vm1, %v430_v3, -inf  ;;  %v519_v8 = vsel %vm509_vm1, %v456_v34, -inf  ;;  %v531_v14 = vsel %vm509_vm1, %v508_v12, -inf }
 0x1b4   : > { %514 = vmax.xlane.f32.xlu2 %v513_v55  ;;  %529 = vmax.xlane.f32.xlu0 %v528_v47  ;;  %v482_v18 = vadd.f32 %v480_v48, %v478_v13  ;;  %v759_v47 = vstv %s1539_s24  ;;  %s276_s24 = scalar_lea.vmem %s1829_s5, %s1107_s12 }
 0x1b5   : > { %523 = vmax.xlane.f32.xlu1 %v522_v7 }
 0x1b6   : > { %v525_v19 = vsel %vm509_vm1, %v482_v18, -inf }
 0x1bc   : > { %520 = vmax.xlane.f32.xlu2 %v519_v8 }
 0x1bd   : > { %532 = vmax.xlane.f32.xlu1 %v531_v14  ;;  %v739_v14 = vstv %s1543_s26 }
 0x1c4   : > { %526 = vmax.xlane.f32.xlu2 %v525_v19 }
 0x21f   : > { %v518_v22 = vpop.xlane.xlu0 %517 }
 0x220   : > { %v512_v23 = vpop.xlane.xlu1 %511  ;;  %v536_v24 = vsub.f32 %v455_v36, %v518_v22  ;;  %v745_v22 = vstv %s1545_s27 }
 0x221   : > { %v534_v0 = vsub.f32 %v429_v38, %v512_v23 }
 0x222   : > { %v546_v15 = vmul.f32 1.442695, %v536_v24 }
 0x223   : > { %v542_v20 = vmul.f32 1.442695, %v534_v0 }
 0x224   : > { %1166 = vpow2.f32 %v546_v15 }
 0x225   : > { %1168 = vpow2.f32 %v542_v20 }
 0x227   : > { %v515_v10 = vpop.xlane.xlu2 %514  ;;  %v530_v25 = vpop.xlane.xlu0 %529 }
 0x228   : > { %v524_v26 = vpop.xlane.xlu1 %523  ;;  %v540_v27 = vsub.f32 %v507_v62, %v530_v25  ;;  %v535_v32 = vsub.f32 %v430_v3, %v515_v10  ;;  %v751_v10 = vstv %s1549_s29  ;;  %v785_v25 = vstv %s1547_s28 }
 0x229   : > { %v538_v28 = vsub.f32 %v481_v63, %v524_v26 }
 0x22a   : > { %v1497_v29 = vpop.eup %1166  ;;  %v554_v30 = vmul.f32 1.442695, %v540_v27  ;;  %v544_v38 = vmul.f32 1.442695, %v535_v32 }
 0x22b   : > { %v550_v31 = vmul.f32 1.442695, %v538_v28  ;;  %v1499_v33 = vpop.eup %1168  ;;  %v564_v35 = vsel %vm509_vm1, %v1497_v29, 0.0  ;;  %v765_v28 = vstv %s1551_s30 }
 0x22c   : > { %1170 = vpow2.f32 %v554_v30  ;;  %565 = vadd.xlane.f32.xlu1 %v564_v35  ;;  %v558_v36 = vsel %vm509_vm1, %v1499_v33, 0.0  ;;  %v771_v30 = vstv %s1555_s6  ;;  %v703_v35 = vstv %s1559_s7 }
 0x22d   : > { %1172 = vpow2.f32 %v550_v31  ;;  %559 = vadd.xlane.f32.xlu2 %v558_v36 }
 0x22e   : > { %1174 = vpow2.f32 %v544_v38 }
 0x22f   : > { %v521_v39 = vpop.xlane.xlu2 %520 }
 0x230   : > { %v533_v40 = vpop.xlane.xlu1 %532  ;;  %v537_v41 = vsub.f32 %v456_v34, %v521_v39 }
 0x231   : > { %v541_v49 = vsub.f32 %v508_v12, %v533_v40 }
 0x232   : > { %v548_v44 = vmul.f32 1.442695, %v537_v41  ;;  %v1505_v45 = vpop.eup %1170 }
 0x233   : > { %v1507_v37 = vpop.eup %1172  ;;  %v576_v50 = vsel %vm509_vm1, %v1505_v45, 0.0  ;;  %v556_v46 = vmul.f32 1.442695, %v541_v49 }
 0x234   : > { %1176 = vpow2.f32 %v548_v44  ;;  %v570_v43 = vsel %vm509_vm1, %v1507_v37, 0.0  ;;  %v1513_v58 = vpop.eup %1174 }
 0x235   : > { %571 = vadd.xlane.f32.xlu0 %v570_v43  ;;  %577 = vadd.xlane.f32.xlu2 %v576_v50  ;;  %1178 = vpow2.f32 %v556_v46  ;;  %v561_v54 = vsel %vm509_vm1, %v1513_v58, 0.0 }
 0x237   : > { %v527_v48 = vpop.xlane.xlu2 %526 }
 0x238   : > { %v539_v57 = vsub.f32 %v482_v18, %v527_v48 }
 0x23a   : > { %v1515_v53 = vpop.eup %1176  ;;  %v552_v59 = vmul.f32 1.442695, %v539_v57  ;;  %v777_v57 = vstv %s1571_s8 }
 0x23b   : > { %v567_v60 = vsel %vm509_vm1, %v1515_v53, 0.0  ;;  %v1521_v61 = vpop.eup %1178 }
 0x23c   : > { %1180 = vpow2.f32 %v552_v59  ;;  %v579_v1 = vsel %vm509_vm1, %v1521_v61, 0.0 }
 0x23d   : > { %562 = vadd.xlane.f32.xlu0 %v561_v54  ;;  %568 = vadd.xlane.f32.xlu2 %v567_v60  ;;  %v707_v54 = vstv %s1575_s9 }
 0x242   : > { %v1523_v62 = vpop.eup %1180 }
 0x243   : > { %v573_v63 = vsel %vm509_vm1, %v1523_v62, 0.0 }
 0x244   : > { %574 = vadd.xlane.f32.xlu1 %v573_v63 }
 0x245   : > { %580 = vadd.xlane.f32.xlu0 %v579_v1 }
 0x255   : > { %894 = vrot.lane.b32.xlu2 %v1378_v16, %s1286_s19 }
 0x259   : > { %844 = vrot.lane.b32.xlu0 %v1384_v21, %s1286_s19  ;;  %v729_v21 = vstv %s1533_s20  ;;  %s1289_s20 = smov 24  }
 0x25d   : > { %869 = vrot.lane.b32.xlu1 %v1380_v17, %s1286_s19 }
 0x265   : > { %819 = vrot.lane.b32.xlu1 %v1375_v6, %s1286_s19  ;;  %s1288_s19 = smov 16  }
 0x29f   : > { %v566_v2 = vpop.xlane.xlu1 %565 }
 0x2a0   : > { %1182 = vrcp.f32 %v566_v2  ;;  %v560_v3 = vpop.xlane.xlu2 %559  ;;  %v621_v6 = vand.u32 2147483647, %v566_v2  ;;  %v623_v17 = vand.u32 2147483648, %v566_v2  ;;  %vm617_vm2 = vweird.f32 %v566_v2 }
 0x2a1   : > { %1184 = vrcp.f32 %v560_v3  ;;  %v591_v51 = vand.u32 2147483647, %v560_v3  ;;  %v593_v9 = vand.u32 2147483648, %v560_v3  ;;  %vm587_vm4 = vweird.f32 %v560_v3 }
 0x2a2   : > { %vm1566_vm3 = vcmp.eq.f32.partialorder %v621_v6, 8.507059e+37  ;;  %v624_v8 = vor.u32 1.1754944e-38, %v623_v17 }
 0x2a3   : > { %vm1577_vm6 = vcmp.eq.f32.partialorder %v591_v51, 8.507059e+37  ;;  %v594_v24 = vor.u32 1.1754944e-38, %v593_v9  ;;  %v797_v9 = vstv %s1592_s11 }
 0x2a6   : > { %v1183_v16 = vpop.eup %1182 }
 0x2a7   : > { %v1185_v5 = vpop.eup %1184  ;;  %v613_v55 = vmul.f32 %v1183_v16, %v566_v2  ;;  %vm618_vm5 = vweird.f32 %v1183_v16 }
 0x2a8   : > { %v583_v7 = vmul.f32 %v1185_v5, %v560_v3  ;;  %v1561_v11 = vpop.xlane.xlu0 %571  ;;  %v1563_v34 = vpop.xlane.xlu2 %577  ;;  %vm588_vm7 = vweird.f32 %v1185_v5  ;;  %vm619_vm8 = vmor %vm617_vm2, %vm618_vm5 }
 0x2a9   : > { %v614_v12 = vsub.f32 1.0, %v613_v55  ;;  %1186 = vrcp.f32 %v1561_v11  ;;  %v651_v0 = vand.u32 2147483647, %v1561_v11  ;;  %v653_v20 = vand.u32 2147483648, %v1561_v11  ;;  %vm589_vm9 = vmor %vm587_vm4, %vm588_vm7 }
 0x2aa   : > { %v584_v13 = vsub.f32 1.0, %v583_v7  ;;  %1188 = vrcp.f32 %v1563_v34  ;;  %v681_v27 = vand.u32 2147483647, %v1563_v34  ;;  %vm647_vm10 = vweird.f32 %v1561_v11 }
 0x2ab   : > { %v615_v18 = vmul.f32 %v1183_v16, %v614_v12  ;;  %vm677_vm11 = vweird.f32 %v1563_v34  ;;  %vm1602_vm12 = vcmp.eq.f32.partialorder %v651_v0, 8.507059e+37  ;;  %v683_v44 = vand.u32 2147483648, %v1563_v34 }
 0x2ac   : > { %v585_v23 = vmul.f32 %v1185_v5, %v584_v13  ;;  %v654_v46 = vor.u32 1.1754944e-38, %v653_v20  ;;  %vm1615_vm13 = vcmp.eq.f32.partialorder %v681_v27, 8.507059e+37  ;;  %v791_v7 = vstv %s1586_s10 }
 0x2ad   : > { %v616_v15 = vadd.f32 %v1183_v16, %v615_v18 }
 0x2ae   : > { %v586_v26 = vadd.f32 %v1185_v5, %v585_v23 }
 0x2af   : > { %v1187_v31 = vpop.eup %1186  ;;  %v620_v32 = vsel %vm619_vm8, %v1183_v16, %v616_v15 }
 0x2b0   : > { %v1189_v36 = vpop.eup %1188  ;;  %v625_v38 = vsel %vm1566_vm3, %v624_v8, %v620_v32  ;;  %v590_v39 = vsel %vm589_vm9, %v1185_v5, %v586_v26  ;;  %v643_v40 = vmul.f32 %v1187_v31, %v1561_v11  ;;  %v1607_v49 = vpop.xlane.xlu0 %562  ;;  %vm648_vm14 = vweird.f32 %v1187_v31 }
 0x2b1   : > { %v1609_v50 = vpop.xlane.xlu2 %568  ;;  %v595_v43 = vsel %vm1577_vm6, %v594_v24, %v590_v39  ;;  %v673_v48 = vmul.f32 %v1189_v36, %v1563_v34  ;;  %1190 = vrcp.f32 %v1607_v49  ;;  %v1622_v63 = vmul.f32 %v1497_v29, %v625_v38  ;;  %vm1638_vm2 = vmor %vm647_vm10, %vm648_vm14 }
 0x2b2   : > { %v644_v59 = vsub.f32 1.0, %v643_v40  ;;  %v1625_v1 = vmul.f32 %v1499_v33, %v595_v43  ;;  %1192 = vrcp.f32 %v1609_v50  ;;  %v608_v6 = vand.u32 2147483648, %v1607_v49 }
 0x2b3   : > { %v674_v2 = vsub.f32 1.0, %v673_v48  ;;  %v638_v16 = vand.u32 2147483648, %v1609_v50  ;;  %vm678_vm15 = vweird.f32 %v1189_v36  ;;  %v684_v5 = vor.u32 1.1754944e-38, %v683_v44 }
 0x2b4   : > { %v645_v3 = vmul.f32 %v1187_v31, %v644_v59  ;;  %v606_v29 = vand.u32 2147483647, %v1607_v49  ;;  %v636_v33 = vand.u32 2147483647, %v1609_v50  ;;  %vm602_vm3 = vweird.f32 %v1607_v49  ;;  %vm679_vm4 = vmor %vm677_vm11, %vm678_vm15 }
 0x2b5   : > { %v675_v17 = vmul.f32 %v1189_v36, %v674_v2  ;;  %v730_v8 = vmul.f32 %v729_v21, %v1625_v1  ;;  %v734_v13 = vmul.f32 %v733_v4, %v1622_v63  ;;  %v609_v11 = vor.u32 1.1754944e-38, %v608_v6 }
 0x2b6   : > { %v646_v55 = vadd.f32 %v1187_v31, %v645_v3  ;;  %vm632_vm5 = vweird.f32 %v1609_v50  ;;  %v639_v23 = vor.u32 1.1754944e-38, %v638_v16  ;;  %vm1661_vm6 = vcmp.eq.f32.partialorder %v606_v29, 8.507059e+37 }
 0x2b7   : > { %v1632_v51 = vpop.xlane.xlu1 %574  ;;  %v676_v52 = vadd.f32 %v1189_v36, %v675_v17  ;;  %v1191_v18 = vpop.eup %1190  ;;  %vm1672_vm7 = vcmp.eq.f32.partialorder %v636_v33, 8.507059e+37  ;;  %v760_v33 = vmul.f32 %v759_v47, %v1622_v63 }
 0x2b8   : > { %1194 = vrcp.f32 %v1632_v51  ;;  %v650_v19 = vsel %vm1638_vm2, %v1187_v31, %v646_v55  ;;  %v1656_v24 = vpop.xlane.xlu0 %580  ;;  %v1193_v15 = vpop.eup %1192  ;;  %v598_v27 = vmul.f32 %v1191_v18, %v1607_v49  ;;  %v666_v34 = vand.u32 2147483647, %v1632_v51 }
 0x2b9   : > { %v895_v0 = vpop.permute.xlu2 %894  ;;  %v655_v20 = vsel %vm1602_vm12, %v654_v46, %v650_v19  ;;  %v680_v26 = vsel %vm679_vm4, %v1189_v36, %v676_v52  ;;  %v628_v39 = vmul.f32 %v1193_v15, %v1609_v50  ;;  %v668_v40 = vand.u32 2147483648, %v1632_v51 }
 0x2ba   : > { %907 = vmatpush.bf16.msrb.mxu3 %v895_v0  ;;  %v1667_v32 = vmul.f32 %v1507_v37, %v655_v20  ;;  %v685_v38 = vsel %vm1615_vm13, %v684_v5, %v680_v26  ;;  %v599_v44 = vsub.f32 1.0, %v598_v27  ;;  %1196 = vrcp.f32 %v1656_v24 }
 0x2bb   : > { %v1678_v41 = vmul.f32 %v1505_v45, %v685_v38  ;;  %v736_v37 = vadd.f32 %v734_v13, %v730_v8  ;;  %vm603_vm8 = vweird.f32 %v1191_v18  ;;  %v629_v43 = vsub.f32 1.0, %v628_v39 }
 0x2bc   : > { %vm633_vm9 = vweird.f32 %v1193_v15  ;;  %v756_v46 = vmul.f32 %v755_v56, %v1625_v1  ;;  %v600_v59 = vmul.f32 %v1191_v18, %v599_v44  ;;  %v696_v60 = vand.u32 2147483647, %v1656_v24  ;;  %vm604_vm13 = vmor %vm602_vm3, %vm603_vm8 }
 0x2bd   : > { %v698_v2 = vand.u32 2147483648, %v1656_v24  ;;  %vm662_vm10 = vweird.f32 %v1632_v51  ;;  %v740_v45 = vmul.f32 %v739_v14, %v1667_v32  ;;  %v630_v3 = vmul.f32 %v1193_v15, %v629_v43  ;;  %vm634_vm15 = vmor %vm632_vm5, %vm633_vm9 }
 0x2be   : > { %v1195_v48 = vpop.eup %1194  ;;  %v669_v16 = vor.u32 1.1754944e-38, %v668_v40  ;;  %v746_v17 = vmul.f32 %v745_v22, %v1678_v41  ;;  %v601_v5 = vadd.f32 %v1191_v18, %v600_v59  ;;  %vm1694_vm12 = vcmp.eq.f32.partialorder %v666_v34, 8.507059e+37 }
 0x2bf   : > { %v658_v6 = vmul.f32 %v1195_v48, %v1632_v51  ;;  %vm663_vm11 = vweird.f32 %v1195_v48  ;;  %v742_v55 = vadd.f32 %v740_v45, %v736_v37  ;;  %v631_v12 = vadd.f32 %v1193_v15, %v630_v3 }
 0x2c0   : > { %vm692_vm14 = vweird.f32 %v1656_v24  ;;  %v766_v8 = vmul.f32 %v765_v28, %v1667_v32  ;;  %v772_v13 = vmul.f32 %v771_v30, %v1678_v41  ;;  %v1197_v19 = vpop.eup %1196  ;;  %v605_v0 = vsel %vm604_vm13, %v1191_v18, %v601_v5  ;;  %vm664_vm4 = vmor %vm662_vm10, %vm663_vm11 }
 0x2c1   : > { %v659_v52 = vsub.f32 1.0, %v658_v6  ;;  %v748_v20 = vadd.f32 %v746_v17, %v742_v55  ;;  %v762_v49 = vadd.f32 %v760_v33, %v756_v46  ;;  %v782_v26 = vmul.f32 %v781_v42, %v1625_v1 }
 0x2c2   : > { %v610_v27 = vsel %vm1661_vm6, %v609_v11, %v605_v0  ;;  %v635_v34 = vsel %vm634_vm15, %v1193_v15, %v631_v12  ;;  %v688_v38 = vmul.f32 %v1197_v19, %v1656_v24  ;;  %vm693_vm2 = vweird.f32 %v1197_v19 }
 0x2c3   : > { %vm1720_vm3 = vcmp.eq.f32.partialorder %v696_v60, 8.507059e+37  ;;  %v611_v50 = vmul.f32 %v1513_v58, %v610_v27  ;;  %v640_v39 = vsel %vm1672_vm7, %v639_v23, %v635_v34  ;;  %v660_v40 = vmul.f32 %v1195_v48, %v659_v52  ;;  %vm694_vm5 = vmor %vm692_vm14, %vm693_vm2 }
 0x2c4   : > { %v752_v31 = vadd.f32 %v751_v10, %v748_v20  ;;  %v641_v11 = vmul.f32 %v1515_v53, %v640_v39  ;;  %v689_v15 = vsub.f32 1.0, %v688_v38  ;;  %v768_v44 = vadd.f32 %v766_v8, %v762_v49 }
 0x2c5   : > { %v786_v37 = vmul.f32 %v785_v25, %v1622_v63  ;;  %v661_v43 = vadd.f32 %v1195_v48, %v660_v40  ;;  %v731_v58 = vmul.f32 %v729_v21, %v611_v50  ;;  %v757_v23 = vmul.f32 %v755_v56, %v611_v50 }
 0x2c6   : > { %v808_v36 = vpack.c.bf16 %v752_v31, %v752_v31  ;;  %v690_v46 = vmul.f32 %v1197_v19, %v689_v15  ;;  %v735_v53 = vmul.f32 %v733_v4, %v641_v11  ;;  %v761_v59 = vmul.f32 %v759_v47, %v641_v11 }
 0x2c7   : > { %v774_v60 = vadd.f32 %v772_v13, %v768_v44  ;;  %v699_v45 = vor.u32 1.1754944e-38, %v698_v2  ;;  %v665_v3 = vsel %vm664_vm4, %v1195_v48, %v661_v43  ;;  %v783_v21 = vmul.f32 %v781_v42, %v611_v50 }
 0x2c8   : > { %v787_v6 = vmul.f32 %v785_v25, %v641_v11  ;;  %v691_v56 = vadd.f32 %v1197_v19, %v690_v46  ;;  %v670_v51 = vsel %vm1694_vm12, %v669_v16, %v665_v3  ;;  %v737_v4 = vadd.f32 %v735_v53, %v731_v58 }
 0x2c9   : > { %v1754_v47 = vunpack.c.l.b16 %v808_v36  ;;  %v671_v42 = vmul.f32 %v1523_v62, %v670_v51  ;;  %v763_v48 = vadd.f32 %v761_v59, %v757_v23  ;;  %v778_v25 = vadd.f32 %v777_v57, %v774_v60 }
 0x2ca   : > { %v788_v2 = vadd.f32 %v786_v37, %v782_v26  ;;  %v695_v17 = vsel %vm694_vm5, %v1197_v19, %v691_v56  ;;  %v789_v5 = vadd.f32 %v787_v6, %v783_v21  ;;  %v792_v16 = vmul.f32 %v791_v7, %v1667_v32 }
 0x2cb   : > { %v798_v29 = vmul.f32 %v797_v9, %v1678_v41  ;;  %v700_v62 = vsel %vm1720_vm3, %v699_v45, %v695_v17  ;;  %v845_v24 = vpop.permute.xlu0 %844  ;;  %v741_v55 = vmul.f32 %v739_v14, %v671_v42  ;;  %v767_v33 = vmul.f32 %v765_v28, %v671_v42 }
 0x2cc   : > { %v803_v12 = vstv %s1729_s13  ;;  %v701_v52 = vmul.f32 %v1521_v61, %v700_v62  ;;  %857 = vmatpush.bf16.msrb.mxu1 %v845_v24  ;;  %v810_v8 = vpack.c.bf16 %v778_v25, %v778_v25  ;;  %v793_v13 = vmul.f32 %v791_v7, %v671_v42 }
 0x2cd   : > { %v794_v19 = vadd.f32 %v792_v16, %v788_v2  ;;  %v743_v0 = vadd.f32 %v741_v55, %v737_v4  ;;  %v769_v20 = vadd.f32 %v767_v33, %v763_v48  ;;  %v704_v49 = vmul.f32 %v703_v35, %v1625_v1 }
 0x2ce   : > { %v705_v14 = vmul.f32 %v703_v35, %v611_v50  ;;  %v747_v61 = vmul.f32 %v745_v22, %v701_v52  ;;  %v773_v26 = vmul.f32 %v771_v30, %v701_v52  ;;  %v795_v27 = vadd.f32 %v793_v13, %v789_v5 }
 0x2cf   : > { %v870_v28 = vpop.permute.xlu1 %869  ;;  %v799_v7 = vmul.f32 %v797_v9, %v701_v52  ;;  %v800_v34 = vadd.f32 %v798_v29, %v794_v19  ;;  %v708_v1 = vmul.f32 %v707_v54, %v1622_v63  ;;  %v709_v35 = vmul.f32 %v707_v54, %v641_v11 }
 0x2d0   : > { %882 = vmatpush.bf16.msrb.mxu2 %v870_v28  ;;  %v713_v38 = vstv %s1750_s14  ;;  %v749_v18 = vadd.f32 %v747_v61, %v743_v0  ;;  %v775_v50 = vadd.f32 %v773_v26, %v769_v20  ;;  %v719_v43 = vstv %s1768_s15 }
 0x2d1   : > { %v801_v39 = vadd.f32 %v799_v7, %v795_v27  ;;  %v714_v22 = vmul.f32 %v713_v38, %v1667_v32  ;;  %v804_v30 = vadd.f32 %v803_v12, %v800_v34  ;;  %v710_v40 = vadd.f32 %v708_v1, %v704_v49 }
 0x2d2   : > { %v711_v31 = vadd.f32 %v709_v35, %v705_v14  ;;  %v715_v15 = vmul.f32 %v713_v38, %v671_v42  ;;  %v753_v9 = vadd.f32 %v751_v10, %v749_v18  ;;  %v779_v44 = vadd.f32 %v777_v57, %v775_v50 }
 0x2d3   : > { %v805_v37 = vadd.f32 %v803_v12, %v801_v39  ;;  %v812_v63 = vpack.c.bf16 %v804_v30, %v804_v30  ;;  %v716_v58 = vadd.f32 %v714_v22, %v710_v40  ;;  %v720_v11 = vmul.f32 %v719_v43, %v1678_v41 }
 0x2d4   : > { %v717_v54 = vadd.f32 %v715_v15, %v711_v31  ;;  %v809_v36 = vpack.c.bf16 %v753_v9, %v753_v9  ;;  %v811_v23 = vpack.c.bf16 %v779_v44, %v779_v44  ;;  %v721_v32 = vmul.f32 %v719_v43, %v701_v52 }
 0x2d5   : > { %v813_v46 = vpack.c.bf16 %v805_v37, %v805_v37  ;;  %v866_v53 = vunpack.c.l.b16 %v810_v8  ;;  %v891_v59 = vunpack.c.l.b16 %v812_v63  ;;  %v722_v60 = vadd.f32 %v720_v11, %v716_v58 }
 0x2d6   : > { %v725_v45 = vstv %s1785_s16  ;;  %v842_v21 = vunpack.c.l.b16 %v809_v36  ;;  %v867_v10 = vunpack.c.l.b16 %v811_v23  ;;  %v723_v57 = vadd.f32 %v721_v32, %v717_v54 }
 0x2d7   : > { %v820_v3 = vpop.permute.xlu1 %819  ;;  %v892_v6 = vunpack.c.l.b16 %v813_v46  ;;  %v726_v56 = vadd.f32 %v725_v45, %v722_v60  ;;  %vm942_vm6 = vcmask 195584   ;;  %vm945_vm7 = vcmask 261120  }
 0x2d8   : > { %832 = vmatpush.bf16.msrb.mxu0 %v820_v3  ;;  %v843_v51 = vpack.c.b16 %v842_v21, %v1754_v47  ;;  %v868_v4 = vpack.c.b16 %v867_v10, %v866_v53  ;;  %v727_v41 = vadd.f32 %v725_v45, %v723_v57 }
 0x2d9   : > { %v893_v42 = vpack.c.b16 %v892_v6, %v891_v59  ;;  %v806_v48 = vpack.c.bf16 %v726_v56, %v726_v56 }
 0x2da   : > { %1102 = vmatmul.msk.bf16.vlgmr.msrb.gmra.mxu1 %vm509_vm1, %v843_v51  ;;  %1103 = vmatmul.msk.bf16.vlgmr.msrb.gmra.mxu2 %vm509_vm1, %v868_v4  ;;  %v807_v25 = vpack.c.bf16 %v727_v41, %v727_v41 }
 0x2db   : > { %1104 = vmatmul.msk.bf16.vlgmr.msrb.gmra.mxu3 %vm509_vm1, %v893_v42  ;;  %v816_v2 = vunpack.c.l.b16 %v806_v48 }
 0x2dc   : > { %v817_v17 = vunpack.c.l.b16 %v807_v25 }
 0x2de   : > { %v818_v5 = vpack.c.b16 %v817_v17, %v816_v2 }
 0x2e0   : > { %1101 = vmatmul.msk.bf16.vlgmr.msrb.gmra.mxu0 %vm509_vm1, %v818_v5 }
 0x357   : > { %v859_v16 = vpop.f32.mrf.mxu1 }
 0x358   : > { %916 = vrot.lane.b32.xlu0 %v859_v16, %s1287_s17 }
 0x35d   : > { %v884_v47 = vpop.f32.mrf.mxu2  ;;  %v834_v12 = vpop.f32.mrf.mxu0 }
 0x35e   : > { %v909_v29 = vpop.f32.mrf.mxu3  ;;  %924 = vrot.lane.b32.xlu1 %v884_v47, %s1288_s19 }
 0x35f   : > { %v861_v62 = vpop.f32.mrf.mxu1 }
 0x360   : > { %918 = vrot.lane.b32.xlu2 %v861_v62, %s1287_s17 }
 0x365   : > { %v886_v24 = vpop.f32.mrf.mxu2  ;;  %v836_v49 = vpop.f32.mrf.mxu0 }
 0x366   : > { %v911_v55 = vpop.f32.mrf.mxu3  ;;  %926 = vrot.lane.b32.xlu0 %v886_v24, %s1288_s19 }
 0x367   : > { %934 = vrot.lane.b32.xlu1 %v911_v55, %s1289_s20 }
 0x368   : > { %932 = vrot.lane.b32.xlu2 %v909_v29, %s1289_s20 }
 0x3ba   : > { %v919_v33 = vpop.permute.xlu2 %918 }
 0x3bb   : > { %v939_v14 = vsel %vm301_vm0, %v836_v49, %v919_v33 }
 0x3c2   : > { %v933_v19 = vpop.permute.xlu2 %932 }
 0x3ca   : > { %v917_v52 = vpop.permute.xlu0 %916 }
 0x3cb   : > { %v938_v8 = vsel %vm301_vm0, %v834_v12, %v917_v52 }
 0x3d0   : > { %v925_v13 = vpop.permute.xlu1 %924 }
 0x3d1   : > { %v940_v0 = vsel %vm509_vm1, %v938_v8, %v925_v13 }
 0x3d2   : > { %v943_v20 = vsel %vm942_vm6, %v940_v0, %v933_v19 }
 0x3d3   : > { %946 = vst.msk [vmem:[%s276_s24] sm:$0xff] %vm945_vm7, %v943_v20 }
 0x3d8   : > { %v927_v28 = vpop.permute.xlu0 %926 }
 0x3d9   : > { %v941_v61 = vsel %vm509_vm1, %v939_v14, %v927_v28  ;;  %v935_v26 = vpop.permute.xlu1 %934 }
 0x3da   : > { %v944_v27 = vsel %vm942_vm6, %v941_v61, %v935_v26 }
 0x3db   : > { %947 = vst.msk [vmem:[%s276_s24 + $0x8] sm:$0xff] %vm945_vm7, %v944_v27 }
 0x3dc PF: > { %s18_s18 = sadd.s32 1, %s1276_s18  }
 0x3dd   : > { %p15_p7 = scmp.ge.s32.totalorder %s18_s18, 4  }
 0x3df   :  { %17 = sbr.rel (!%p15_p7) target bundleno = 3 (0x3), region = 87 }
 0x3e4   :  { %969 = vsyncpa [#allocation3], 1 }
 0x3e5   :  { %971 = vsyncpa [#allocation3 + $0x1], 1 }
 0x3e6   :  { %972 = vsyncpa [#allocation5], 1 }
 0x3e7   :  { %973 = vsyncpa [#allocation8], 1 }

// kernel: cait_forward.22
= control target key start
LH: loop header
LB: loop body
LE: loop exit
PB: predicated region body
PF: predicated region fallthrough
CT: control target
= control target key end

     0   :  { %vm27_vm0 = vcmask 261120   ;;  %v220_v8 = vmov 32.0   ;;  %s320_s0 = inlined_call_operand.vmem [shape: f32[32,32], index: 0, kind: input, shape index: {}]   ;;  %s321_s1 = inlined_call_operand.vmem [shape: f32[1,32], index: 1, kind: input, shape index: {}]   ;;  %s322_s2 = inlined_call_operand.vmem [shape: f32[1,32], index: 2, kind: input, shape index: {}]   ;;  %s323_s4 = inlined_call_operand.vmem [shape: f32[1,128], index: 4, kind: input, shape index: {}]   ;;  %s324_s3 = inlined_call_operand.vmem [shape: bf16[32,128], index: 3, kind: input, shape index: {}]   ;;  %s325_s5 = inlined_call_operand.vmem [shape: f32[32,128], index: 5, kind: output, shape index: {}]  }
   0x1   :  { %v23_v0 = vld [vmem:[%s320_s0 + $0x10] sm:$0xff]  ;;  %v21_v1 = vld [vmem:[%s320_s0] sm:$0xff]  ;;  %v24_v4 = vld [vmem:[%s320_s0 + $0x18] sm:$0xff]  ;;  %210 = vrcp.f32 %v220_v8 }
   0x2   :  { %v34_v2 = vsel %vm27_vm0, %v23_v0, 0.0  ;;  %v28_v3 = vsel %vm27_vm0, %v21_v1, 0.0  ;;  %v22_v5 = vld [vmem:[%s320_s0 + $0x8] sm:$0xff]  ;;  %v37_v6 = vsel %vm27_vm0, %v24_v4, 0.0  ;;  %v202_v40 = vld [vmem:[%s324_s3] sm:$0xff] }
   0x3   :  { %35 = vadd.xlane.f32.xlu1 %v34_v2  ;;  %29 = vadd.xlane.f32.xlu0 %v28_v3  ;;  %v31_v7 = vsel %vm27_vm0, %v22_v5, 0.0  ;;  %v203_v35 = vld [vmem:[%s324_s3 + $0x8] sm:$0xff] }
   0x4   :  { %171 = vmatpush.bf16.msra.mxu0 %v203_v35  ;;  %204 = vmatpush.bf16.msra.mxu1 %v203_v35 }
   0x7   :  { %v211_v9 = vpop.eup %210 }
   0x8   :  { %v41_v10 = vmul.f32 32.0, %v211_v9  ;;  %vm45_vm1 = vweird.f32 %v211_v9  ;;  %172 = vmatpush.bf16.msra.mxu0 %v202_v40  ;;  %205 = vmatpush.bf16.msra.mxu1 %v202_v40 }
   0xa   :  { %v42_v11 = vsub.f32 1.0, %v41_v10  ;;  %v207_v10 = vld [vmem:[%s321_s1] ss:$0 sm:$0xff] }
   0xb   :  { %38 = vadd.xlane.f32.xlu1 %v37_v6  ;;  %32 = vadd.xlane.f32.xlu0 %v31_v7 }
   0xc   :  { %v43_v12 = vmul.f32 %v211_v9, %v42_v11 }
   0xe   :  { %v44_v13 = vadd.f32 %v211_v9, %v43_v12 }
  0x10   :  { %v46_v14 = vsel %vm45_vm1, %v211_v9, %v44_v13 }
  0x76   :  { %v36_v15 = vpop.xlane.xlu1 %35  ;;  %v30_v16 = vpop.xlane.xlu0 %29 }
  0x77   :  { %v49_v17 = vmul.f32 %v46_v14, %v36_v15  ;;  %v47_v18 = vmul.f32 %v46_v14, %v30_v16 }
  0x79   :  { %v267_v19 = vsub.f32 %v23_v0, %v49_v17  ;;  %v269_v20 = vsub.f32 %v21_v1, %v47_v18  ;;  %v208_v17 = vld [vmem:[%s322_s2] ss:$0 sm:$0xff] }
  0x7b   :  { %v57_v21 = vmul.f32 %v267_v19, %v267_v19  ;;  %v55_v22 = vmul.f32 %v269_v20, %v269_v20 }
  0x7d   :  { %v65_v23 = vsel %vm27_vm0, %v57_v21, 0.0  ;;  %v59_v24 = vsel %vm27_vm0, %v55_v22, 0.0 }
  0x7e   :  { %v39_v25 = vpop.xlane.xlu1 %38  ;;  %66 = vadd.xlane.f32.xlu0 %v65_v23  ;;  %60 = vadd.xlane.f32.xlu2 %v59_v24  ;;  %v33_v26 = vpop.xlane.xlu0 %32 }
  0x7f   :  { %v50_v27 = vmul.f32 %v46_v14, %v39_v25  ;;  %v48_v28 = vmul.f32 %v46_v14, %v33_v26 }
  0x81   :  { %v277_v29 = vsub.f32 %v24_v4, %v50_v27  ;;  %v279_v30 = vsub.f32 %v22_v5, %v48_v28 }
  0x83   :  { %v58_v31 = vmul.f32 %v277_v29, %v277_v29  ;;  %v56_v32 = vmul.f32 %v279_v30, %v279_v30 }
  0x85   :  { %v68_v33 = vsel %vm27_vm0, %v58_v31, 0.0  ;;  %v62_v34 = vsel %vm27_vm0, %v56_v32, 0.0 }
  0x86   :  { %69 = vadd.xlane.f32.xlu1 %v68_v33  ;;  %63 = vadd.xlane.f32.xlu2 %v62_v34 }
  0xf1   :  { %v61_v36 = vpop.xlane.xlu2 %60  ;;  %v67_v37 = vpop.xlane.xlu0 %66 }
  0xf2   :  { %v71_v38 = vmul.f32 %v61_v36, %v46_v14  ;;  %v73_v39 = vmul.f32 %v67_v37, %v46_v14 }
  0xf4   :  { %v75_v41 = vadd.f32 1e-06, %v71_v38  ;;  %v77_v42 = vadd.f32 1e-06, %v73_v39 }
  0xf6   :  { %212 = vrsqrt.f32 %v75_v41  ;;  %vm105_vm4 = vweird.f32 %v77_v42  ;;  %vm85_vm5 = vweird.f32 %v75_v41 }
  0xf7   :  { %214 = vrsqrt.f32 %v77_v42 }
  0xf9   :  { %v70_v43 = vpop.xlane.xlu1 %69  ;;  %v64_v44 = vpop.xlane.xlu2 %63 }
  0xfa   :  { %v74_v45 = vmul.f32 %v70_v43, %v46_v14  ;;  %v72_v46 = vmul.f32 %v64_v44, %v46_v14 }
  0xfc   :  { %v213_v47 = vpop.eup %212  ;;  %v78_v48 = vadd.f32 1e-06, %v74_v45  ;;  %v76_v49 = vadd.f32 1e-06, %v72_v46 }
  0xfd   :  { %v215_v50 = vpop.eup %214  ;;  %v80_v51 = vmul.f32 %v213_v47, %v75_v41  ;;  %vm86_vm3 = vweird.f32 %v213_v47 }
  0xfe   :  { %v100_v52 = vmul.f32 %v215_v50, %v77_v42  ;;  %216 = vrsqrt.f32 %v78_v48  ;;  %vm106_vm2 = vweird.f32 %v215_v50  ;;  %vm87_vm7 = vmor %vm85_vm5, %vm86_vm3  ;;  %vm115_vm10 = vweird.f32 %v78_v48 }
  0xff   :  { %v81_v53 = vmul.f32 %v213_v47, %v80_v51  ;;  %218 = vrsqrt.f32 %v76_v49  ;;  %vm107_vm6 = vmor %vm105_vm4, %vm106_vm2  ;;  %vm95_vm12 = vweird.f32 %v76_v49 }
 0x100   :  { %v101_v54 = vmul.f32 %v215_v50, %v100_v52 }
 0x101   :  { %v82_v55 = vmul.f32 0.5, %v81_v53 }
 0x102   :  { %v102_v56 = vmul.f32 0.5, %v101_v54 }
 0x103   :  { %v83_v57 = vsub.f32 1.5, %v82_v55 }
 0x104   :  { %v217_v58 = vpop.eup %216  ;;  %v103_v59 = vsub.f32 1.5, %v102_v56 }
 0x105   :  { %v219_v60 = vpop.eup %218  ;;  %v110_v61 = vmul.f32 %v217_v58, %v78_v48  ;;  %v84_v62 = vmul.f32 %v213_v47, %v83_v57  ;;  %vm116_vm8 = vweird.f32 %v217_v58 }
 0x106   :  { %v104_v63 = vmul.f32 %v215_v50, %v103_v59  ;;  %v90_v0 = vmul.f32 %v219_v60, %v76_v49  ;;  %vm96_vm9 = vweird.f32 %v219_v60  ;;  %vm117_vm11 = vmor %vm115_vm10, %vm116_vm8 }
 0x107   :  { %v111_v1 = vmul.f32 %v217_v58, %v110_v61  ;;  %v88_v5 = vsel %vm87_vm7, %v213_v47, %v84_v62  ;;  %vm97_vm13 = vmor %vm95_vm12, %vm96_vm9 }
 0x108   :  { %v91_v2 = vmul.f32 %v219_v60, %v90_v0  ;;  %v108_v3 = vsel %vm107_vm6, %v215_v50, %v104_v63  ;;  %v119_v11 = vmul.f32 %v88_v5, %v269_v20 }
 0x109   :  { %v112_v4 = vmul.f32 0.5, %v111_v1  ;;  %v121_v8 = vmul.f32 %v108_v3, %v267_v19 }
 0x10a   :  { %v92_v6 = vmul.f32 0.5, %v91_v2  ;;  %v126_v21 = vmul.f32 %v207_v10, %v119_v11 }
 0x10b   :  { %v113_v7 = vsub.f32 1.5, %v112_v4  ;;  %v128_v18 = vmul.f32 %v207_v10, %v121_v8 }
 0x10c   :  { %v93_v9 = vsub.f32 1.5, %v92_v6  ;;  %v133_v25 = vadd.f32 %v208_v17, %v126_v21 }
 0x10d   :  { %v114_v12 = vmul.f32 %v217_v58, %v113_v7  ;;  %v135_v23 = vadd.f32 %v208_v17, %v128_v18 }
 0x10e   :  { %v94_v13 = vmul.f32 %v219_v60, %v93_v9 }
 0x10f   :  { %v118_v14 = vsel %vm117_vm11, %v217_v58, %v114_v12 }
 0x110   :  { %v122_v15 = vmul.f32 %v118_v14, %v277_v29  ;;  %v98_v16 = vsel %vm97_vm13, %v219_v60, %v94_v13  ;;  %v209_v29 = vld [vmem:[%s323_s4] ss:$0 sm:$0xff] }
 0x111   :  { %v120_v19 = vmul.f32 %v98_v16, %v279_v30 }
 0x112   :  { %v129_v22 = vmul.f32 %v207_v10, %v122_v15 }
 0x113   :  { %v127_v20 = vmul.f32 %v207_v10, %v120_v19 }
 0x114   :  { %v136_v24 = vadd.f32 %v208_v17, %v129_v22 }
 0x115   :  { %v134_v26 = vadd.f32 %v208_v17, %v127_v20 }
 0x116   :  { %v138_v27 = vpack.c.bf16 %v136_v24, %v135_v23 }
 0x117   :  { %v137_v28 = vpack.c.bf16 %v134_v26, %v133_v25 }
 0x118   :  { %201 = vmatmul.msk.bf16.vlgmr.msra.gmra.mxu1 %vm27_vm0, %v138_v27 }
 0x119   :  { %200 = vmatmul.msk.bf16.vlgmr.msra.gmra.mxu0 %vm27_vm0, %v137_v28 }
 0x195   :  { %v179_v31 = vpop.f32.mrf.mxu1 }
 0x196   :  { %v174_v32 = vpop.f32.mrf.mxu0  ;;  %v180_v30 = vadd.f32 %v209_v29, %v179_v31 }
 0x197   :  { %v175_v33 = vadd.f32 %v209_v29, %v174_v32 }
 0x198   :  { %186 = vst [vmem:[%s325_s5 + $0x10] sm:$0xff] %v180_v30 }
 0x199   :  { %184 = vst [vmem:[%s325_s5] sm:$0xff] %v175_v33 }
 0x19d   :  { %v181_v34 = vpop.f32.mrf.mxu1 }
 0x19e   :  { %v176_v35 = vpop.f32.mrf.mxu0  ;;  %v182_v36 = vadd.f32 %v209_v29, %v181_v34 }
 0x19f   :  { %v177_v37 = vadd.f32 %v209_v29, %v176_v35 }
 0x1a0   :  { %187 = vst [vmem:[%s325_s5 + $0x18] sm:$0xff] %v182_v36 }
 0x1a1   :  { %185 = vst [vmem:[%s325_s5 + $0x8] sm:$0xff] %v177_v37 }

// kernel: cait_forward.23
= control target key start
LH: loop header
LB: loop body
LE: loop exit
PB: predicated region body
PF: predicated region fallthrough
CT: control target
= control target key end

     0   :  { %vm129_vm0 = vcmask 261120   ;;  %s288_s1 = inlined_call_operand.vmem [shape: bf16[128,32], index: 1, kind: input, shape index: {}]   ;;  %s289_s2 = inlined_call_operand.vmem [shape: f32[1,32], index: 2, kind: input, shape index: {}]   ;;  %s290_s3 = inlined_call_operand.vmem [shape: f32[1,32], index: 3, kind: input, shape index: {}]   ;;  %s291_s0 = inlined_call_operand.vmem [shape: f32[32,128], index: 0, kind: input, shape index: {}]   ;;  %s292_s4 = inlined_call_operand.vmem [shape: f32[32,32], index: 4, kind: input, shape index: {}]   ;;  %s293_s5 = inlined_call_operand.vmem [shape: f32[32,32], index: 5, kind: output, shape index: {}]  }
   0x1   :  { %v177_v0 = vld [vmem:[%s288_s1 + $0x38] sm:$0xff]  ;;  %v176_v1 = vld [vmem:[%s288_s1 + $0x30] sm:$0xff]  ;;  %v175_v2 = vld [vmem:[%s288_s1 + $0x28] sm:$0xff] }
   0x2   :  { %94 = vmatpush.bf16.msra.mxu0 %v177_v0  ;;  %178 = vmatpush.bf16.msra.mxu1 %v177_v0  ;;  %v174_v3 = vld [vmem:[%s288_s1 + $0x20] sm:$0xff]  ;;  %v173_v4 = vld [vmem:[%s288_s1 + $0x18] sm:$0xff]  ;;  %v172_v5 = vld [vmem:[%s288_s1 + $0x10] sm:$0xff] }
   0x3   :  { %v171_v6 = vld [vmem:[%s288_s1 + $0x8] sm:$0xff]  ;;  %v170_v7 = vld [vmem:[%s288_s1] sm:$0xff]  ;;  %v22_v10 = vld [vmem:[%s291_s0 + $0x10] sm:$0xff] }
   0x4   :  { %v20_v8 = vld [vmem:[%s291_s0] sm:$0xff]  ;;  %v21_v9 = vld [vmem:[%s291_s0 + $0x8] sm:$0xff]  ;;  %v23_v11 = vld [vmem:[%s291_s0 + $0x18] sm:$0xff] }
   0x5   :  { %v24_v12 = vpack.c.bf16 %v21_v9, %v20_v8  ;;  %v25_v13 = vpack.c.bf16 %v23_v11, %v22_v10  ;;  %v186_v14 = vld [vmem:[%s289_s2] ss:$0 sm:$0xff]  ;;  %v115_v21 = vld [vmem:[%s292_s4 + $0x10] sm:$0xff]  ;;  %v114_v30 = vld [vmem:[%s292_s4 + $0x8] sm:$0xff] }
   0x6   :  { %95 = vmatpush.bf16.msra.mxu0 %v176_v1  ;;  %179 = vmatpush.bf16.msra.mxu1 %v176_v1  ;;  %v187_v15 = vld [vmem:[%s290_s3] ss:$0 sm:$0xff]  ;;  %v116_v31 = vld [vmem:[%s292_s4 + $0x18] sm:$0xff] }
   0x7   :  { %v113_v20 = vld [vmem:[%s292_s4] sm:$0xff] }
   0xa   :  { %96 = vmatpush.bf16.msra.mxu0 %v175_v2  ;;  %180 = vmatpush.bf16.msra.mxu1 %v175_v2 }
   0xe   :  { %97 = vmatpush.bf16.msra.mxu0 %v174_v3  ;;  %181 = vmatpush.bf16.msra.mxu1 %v174_v3 }
  0x12   :  { %98 = vmatpush.bf16.msra.mxu0 %v173_v4  ;;  %182 = vmatpush.bf16.msra.mxu1 %v173_v4 }
  0x16   :  { %99 = vmatpush.bf16.msra.mxu0 %v172_v5  ;;  %183 = vmatpush.bf16.msra.mxu1 %v172_v5 }
  0x1a   :  { %100 = vmatpush.bf16.msra.mxu0 %v171_v6  ;;  %184 = vmatpush.bf16.msra.mxu1 %v171_v6 }
  0x1e   :  { %101 = vmatpush.bf16.msra.mxu0 %v170_v7  ;;  %185 = vmatpush.bf16.msra.mxu1 %v170_v7 }
  0x21   :  { %102 = vmatmul.bf16.vlgmr.msra.gmra.mxu0 %v24_v12  ;;  %107 = vmatmul.bf16.vlgmr.msra.gmra.mxu1 %v25_v13 }
  0x9e   :  { %v103_v16 = vpop.f32.mrf.mxu0  ;;  %v108_v17 = vpop.f32.mrf.mxu1 }
  0x9f   :  { %v104_v18 = vadd.f32 %v186_v14, %v103_v16  ;;  %v109_v19 = vadd.f32 %v186_v14, %v108_v17 }
  0xa1   :  { %v121_v22 = vmul.f32 %v187_v15, %v104_v18  ;;  %v123_v23 = vmul.f32 %v187_v15, %v109_v19 }
  0xa3   :  { %v125_v24 = vadd.f32 %v121_v22, %v113_v20  ;;  %v127_v25 = vadd.f32 %v123_v23, %v115_v21 }
  0xa5   :  { %130 = vst.msk [vmem:[%s293_s5] sm:$0xff] %vm129_vm0, %v125_v24 }
  0xa6   :  { %132 = vst.msk [vmem:[%s293_s5 + $0x10] sm:$0xff] %vm129_vm0, %v127_v25  ;;  %v105_v26 = vpop.f32.mrf.mxu0  ;;  %v110_v27 = vpop.f32.mrf.mxu1 }
  0xa7   :  { %v106_v28 = vadd.f32 %v186_v14, %v105_v26  ;;  %v111_v29 = vadd.f32 %v186_v14, %v110_v27 }
  0xa9   :  { %v122_v32 = vmul.f32 %v187_v15, %v106_v28  ;;  %v124_v33 = vmul.f32 %v187_v15, %v111_v29 }
  0xab   :  { %v126_v34 = vadd.f32 %v122_v32, %v114_v30  ;;  %v128_v35 = vadd.f32 %v124_v33, %v116_v31 }
  0xad   :  { %131 = vst.msk [vmem:[%s293_s5 + $0x8] sm:$0xff] %vm129_vm0, %v126_v34 }
  0xae   :  { %133 = vst.msk [vmem:[%s293_s5 + $0x18] sm:$0xff] %vm129_vm0, %v128_v35 }

// kernel: cait_forward.30
= control target key start
LH: loop header
LB: loop body
LE: loop exit
PB: predicated region body
PF: predicated region fallthrough
CT: control target
= control target key end

     0   :  { %vm24_vm0 = vcmask 254976   ;;  %v124_v2 = vmov 32.0   ;;  %vm83_vm5 = vcmask 261120   ;;  %s178_s0 = inlined_call_operand.vmem [shape: f32[2,32], index: 0, kind: input, shape index: {}]   ;;  %s179_s1 = inlined_call_operand.vmem [shape: f32[1,32], index: 1, kind: input, shape index: {}]   ;;  %s180_s2 = inlined_call_operand.vmem [shape: f32[1,32], index: 2, kind: input, shape index: {}]   ;;  %s181_s4 = inlined_call_operand.vmem [shape: f32[1,128], index: 4, kind: input, shape index: {}]   ;;  %s182_s3 = inlined_call_operand.vmem [shape: bf16[32,128], index: 3, kind: input, shape index: {}]   ;;  %s183_s5 = inlined_call_operand.vmem [shape: f32[2,128], index: 5, kind: output, shape index: {}]  }
   0x1   :  { %v21_v0 = vld [vmem:[%s178_s0] sm:$0x3]  ;;  %120 = vrcp.f32 %v124_v2  ;;  %v115_v14 = vld [vmem:[%s182_s3 + $0x8] sm:$0xff] }
   0x2   :  { %v25_v1 = vsel %vm24_vm0, %v21_v0, 0.0  ;;  %93 = vmatpush.bf16.msra.mxu0 %v115_v14  ;;  %v114_v15 = vld [vmem:[%s182_s3] sm:$0xff] }
   0x3   :  { %26 = vadd.xlane.f32.xlu0 %v25_v1  ;;  %v117_v25 = vld [vmem:[%s179_s1] ss:$0 sm:$0xff] }
   0x4   :  { %v118_v28 = vld [vmem:[%s180_s2] ss:$0 sm:$0xff] }
   0x5   :  { %v119_v32 = vld [vmem:[%s181_s4] ss:$0 sm:$0xff] }
   0x6   :  { %94 = vmatpush.bf16.msra.mxu0 %v114_v15 }
   0x7   :  { %v121_v3 = vpop.eup %120 }
   0x8   :  { %v29_v4 = vmul.f32 32.0, %v121_v3  ;;  %vm33_vm1 = vweird.f32 %v121_v3 }
   0xa   :  { %v30_v5 = vsub.f32 1.0, %v29_v4 }
   0xc   :  { %v31_v6 = vmul.f32 %v121_v3, %v30_v5 }
   0xe   :  { %v32_v7 = vadd.f32 %v121_v3, %v31_v6 }
  0x10   :  { %v34_v8 = vsel %vm33_vm1, %v121_v3, %v32_v7 }
  0x76   :  { %v27_v9 = vpop.xlane.xlu0 %26 }
  0x77   :  { %v35_v10 = vmul.f32 %v34_v8, %v27_v9 }
  0x79   :  { %v36_v11 = vsub.f32 %v21_v0, %v35_v10 }
  0x7b   :  { %v37_v12 = vmul.f32 %v36_v11, %v36_v11 }
  0x7d   :  { %v38_v13 = vsel %vm24_vm0, %v37_v12, 0.0 }
  0x7e   :  { %39 = vadd.xlane.f32.xlu0 %v38_v13 }
  0xf1   :  { %v40_v16 = vpop.xlane.xlu0 %39 }
  0xf2   :  { %v41_v17 = vmul.f32 %v40_v16, %v34_v8 }
  0xf4   :  { %v42_v18 = vadd.f32 1e-06, %v41_v17 }
  0xf6   :  { %122 = vrsqrt.f32 %v42_v18  ;;  %vm49_vm3 = vweird.f32 %v42_v18 }
  0xfc   :  { %v123_v19 = vpop.eup %122 }
  0xfd   :  { %v44_v20 = vmul.f32 %v123_v19, %v42_v18  ;;  %vm50_vm2 = vweird.f32 %v123_v19 }
  0xfe   :  { %vm51_vm4 = vmor %vm49_vm3, %vm50_vm2 }
  0xff   :  { %v45_v21 = vmul.f32 %v123_v19, %v44_v20 }
 0x101   :  { %v46_v22 = vmul.f32 0.5, %v45_v21 }
 0x103   :  { %v47_v23 = vsub.f32 1.5, %v46_v22 }
 0x105   :  { %v48_v24 = vmul.f32 %v123_v19, %v47_v23 }
 0x107   :  { %v52_v26 = vsel %vm51_vm4, %v123_v19, %v48_v24 }
 0x108   :  { %v53_v27 = vmul.f32 %v52_v26, %v36_v11 }
 0x10a   :  { %v57_v29 = vmul.f32 %v117_v25, %v53_v27 }
 0x10c   :  { %v61_v30 = vadd.f32 %v118_v28, %v57_v29 }
 0x10e   :  { %v62_v31 = vpack.c.bf16 %v61_v30, %v61_v30 }
 0x110   :  { %113 = vmatmul.msk.bf16.vlgmr.msra.gmra.mxu0 %vm83_vm5, %v62_v31 }
 0x18d   :  { %v96_v33 = vpop.f32.mrf.mxu0 }
 0x18e   :  { %v97_v34 = vadd.f32 %v119_v32, %v96_v33 }
 0x190   :  { %100 = vst [vmem:[%s183_s5] sm:$0x3] %v97_v34 }
 0x195   :  { %v98_v35 = vpop.f32.mrf.mxu0 }

// kernel: cait_forward.29
= control target key start
LH: loop header
LB: loop body
LE: loop exit
PB: predicated region body
PF: predicated region fallthrough
CT: control target
= control target key end

     0   :  { %s1315_s25 = smov 0   ;;  %s1477_s0 = inlined_call_operand.vmem [shape: f32[2,16,32], index: 0, kind: input, shape index: {}]   ;;  %s1478_s1 = inlined_call_operand.vmem [shape: f32[2,1,32], index: 1, kind: input, shape index: {}]   ;;  %s1479_s2 = inlined_call_operand.vmem [shape: f32[1,32], index: 2, kind: input, shape index: {}]   ;;  %s1480_s3 = inlined_call_operand.vmem [shape: f32[1,32], index: 3, kind: input, shape index: {}]   ;;  %s1481_s4 = inlined_call_operand.vmem [shape: bf16[32,32], index: 4, kind: input, shape index: {}]   ;;  %s1482_s5 = inlined_call_operand.vmem [shape: f32[1,32], index: 5, kind: input, shape index: {}]   ;;  %s1483_s6 = inlined_call_operand.vmem [shape: bf16[32,32], index: 6, kind: input, shape index: {}]   ;;  %s1484_s7 = inlined_call_operand.vmem [shape: f32[1,32], index: 7, kind: input, shape index: {}]   ;;  %s1485_s8 = inlined_call_operand.vmem [shape: bf16[32,32], index: 8, kind: input, shape index: {}]   ;;  %s1486_s9 = inlined_call_operand.vmem [shape: f32[1,32], index: 9, kind: input, shape index: {}]   ;;  %s1487_s10 = inlined_call_operand.vmem [shape: bf16[32,32], index: 10, kind: input, shape index: {}]   ;;  %s1488_s11 = inlined_call_operand.vmem [shape: f32[1,32], index: 11, kind: input, shape index: {}]   ;;  %s1489_s12 = inlined_call_operand.vmem [shape: f32[1,32], index: 12, kind: input, shape index: {}]   ;;  %s1490_s13 = inlined_call_operand.vmem [shape: f32[2,1,32], index: 13, kind: output, shape index: {}]  }
   0x1 LB: > { %s1121_s26 = sadd.s32 4294967295, %s1235_s25   ;;  %p1125_p0 = scmp.ge.s32.totalorder %s1235_s25, 1  ;;  %s1235_s25 = sphi %s1315_s25, %s23_s25  }
   0x2   : > { %p395_p1 = scmp.lt.s32.totalorder %s1235_s25, 3 }
   0x4   : > { %p396_p2 = pnand %p1125_p0, %p395_p1 }
   0x5   : > { %p440_p3 = scmp.lt.s32.totalorder (!%p396_p2), %s1121_s26, 1  ;;  %s1238_s22 = smov (!%p396_p2), 120  }
   0x6   : > { %399 = sbr.rel (%p396_p2) target bundleno = 1393 (0x571), region = 72  ;;  %s1241_s28 = smov (!%p396_p2), 104  }
   0x7   : > { %s1242_s29 = smov (!%p396_p2), 8   ;;  %s1244_s14 = smov (!%p396_p2), 16  }
   0xb   : > { %s1492_s26 = smov (!%p440_p3, %s1121_s26), 1  ;;  %vm457_vm0 = vcmask 1040384   ;;  %vm474_vm1 = vcmask 253952   ;;  %vm467_vm2 = vcmask 261120   ;;  %v1237_v10 = vmov 32.0   ;;  %v1178_v32 = vld [vmem:[%s1481_s4 + $0x8] sm:$0xff] }
   0xc   : > { %s1176_s27 = sshll.u32 %s1492_s26, 4  ;;  %s447_s30 = scalar_lea.vmem %s1478_s1, %s1492_s26  ;;  %1205 = vrcp.f32 %v1237_v10  ;;  %583 = vmatpush.bf16.msra.mxu0 %v1178_v32  ;;  %v1177_v33 = vld [vmem:[%s1481_s4] sm:$0xff]  ;;  %v1180_v36 = vld [vmem:[%s1483_s6 + $0x8] sm:$0xff]  ;;  %vm696_vm13 = vcmask 64512   ;;  %vm719_vm14 = vcmask 131072  }
   0xd   : > { %s444_s16 = scalar_lea.vmem %s1477_s0, %s1176_s27  ;;  %v1333_v0 = vld [vmem:[%s447_s30] sm:$0x1]  ;;  %v1182_v37 = vld [vmem:[%s1485_s8 + $0x8] sm:$0xff]  ;;  %631 = vmatpush.bf16.msra.mxu1 %v1180_v36  ;;  %s1239_s27 = smov 112  }
   0xe   : > { %v453_v1 = vld [vmem:[%s444_s16] sm:$0xff]  ;;  %v454_v2 = vld [vmem:[%s444_s16 + $0x8] sm:$0xff]  ;;  %669 = vmatpush.bf16.msra.mxu2 %v1182_v37  ;;  %s1243_s30 = smov 24  }
   0xf   : > { %v458_v3 = vrot.slane %v453_v1, 7  ;;  %v459_v4 = vrot.slane %v454_v2, 7  ;;  %v1179_v39 = vld [vmem:[%s1483_s6] sm:$0xff] }
  0x10   : > { %584 = vmatpush.bf16.msra.mxu0 %v1177_v33  ;;  %v1181_v40 = vld [vmem:[%s1485_s8] sm:$0xff] }
  0x11   : > { %v464_v5 = vsel %vm457_vm0, %v1333_v0, %v458_v3  ;;  %v475_v6 = vsel %vm474_vm1, %v459_v4, 0.0  ;;  %v460_v8 = vsel %vm457_vm0, %v458_v3, %v459_v4  ;;  %632 = vmatpush.bf16.msra.mxu1 %v1179_v39  ;;  %v1201_v55 = vld [vmem:[%s1479_s2] ss:$0 sm:$0xff] }
  0x12   : > { %v468_v7 = vsel %vm467_vm2, %v464_v5, 0.0  ;;  %476 = vadd.xlane.f32.xlu1 %v475_v6  ;;  %v471_v9 = vsel %vm467_vm2, %v460_v8, 0.0  ;;  %v1206_v11 = vpop.eup %1205  ;;  %670 = vmatpush.bf16.msra.mxu2 %v1181_v40  ;;  %v1202_v59 = vld [vmem:[%s1480_s3] ss:$0 sm:$0xff] }
  0x13   : > { %469 = vadd.xlane.f32.xlu0 %v468_v7  ;;  %v479_v12 = vmul.f32 32.0, %v1206_v11  ;;  %vm483_vm3 = vweird.f32 %v1206_v11 }
  0x15   : > { %v480_v13 = vsub.f32 1.0, %v479_v12 }
  0x17   : > { %v481_v14 = vmul.f32 %v1206_v11, %v480_v13 }
  0x19   : > { %v482_v15 = vadd.f32 %v1206_v11, %v481_v14 }
  0x1b   : > { %472 = vadd.xlane.f32.xlu0 %v471_v9  ;;  %v484_v16 = vsel %vm483_vm3, %v1206_v11, %v482_v15 }
  0x85   : > { %v477_v21 = vpop.xlane.xlu1 %476 }
  0x86   : > { %v470_v17 = vpop.xlane.xlu0 %469  ;;  %v487_v25 = vmul.f32 %v484_v16, %v477_v21 }
  0x87   : > { %v485_v18 = vmul.f32 %v484_v16, %v470_v17 }
  0x88   : > { %v1342_v27 = vsub.f32 %v459_v4, %v487_v25 }
  0x89   : > { %v488_v19 = vsub.f32 %v464_v5, %v485_v18 }
  0x8a   : > { %v493_v30 = vmul.f32 %v1342_v27, %v1342_v27 }
  0x8b   : > { %v491_v20 = vmul.f32 %v488_v19, %v488_v19 }
  0x8c   : > { %v500_v31 = vsel %vm474_vm1, %v493_v30, 0.0 }
  0x8d   : > { %v494_v22 = vsel %vm467_vm2, %v491_v20, 0.0 }
  0x8e   : > { %495 = vadd.xlane.f32.xlu1 %v494_v22  ;;  %v473_v23 = vpop.xlane.xlu0 %472 }
  0x8f   : > { %v486_v24 = vmul.f32 %v484_v16, %v473_v23 }
  0x91   : > { %v489_v26 = vsub.f32 %v460_v8, %v486_v24 }
  0x93   : > { %v492_v28 = vmul.f32 %v489_v26, %v489_v26 }
  0x95   : > { %v497_v29 = vsel %vm467_vm2, %v492_v28, 0.0 }
  0x96   : > { %498 = vadd.xlane.f32.xlu2 %v497_v29 }
  0x9e   : > { %501 = vadd.xlane.f32.xlu2 %v500_v31 }
 0x101   : > { %v496_v34 = vpop.xlane.xlu1 %495 }
 0x102   : > { %v503_v35 = vmul.f32 %v496_v34, %v484_v16  ;;  %v561_v34 = vld [vmem:[%s1482_s5] sm:$0x1] }
 0x104   : > { %v506_v38 = vadd.f32 1e-06, %v503_v35 }
 0x106   : > { %1207 = vrsqrt.f32 %v506_v38  ;;  %vm515_vm5 = vweird.f32 %v506_v38 }
 0x109   : > { %v499_v41 = vpop.xlane.xlu2 %498 }
 0x10a   : > { %v504_v42 = vmul.f32 %v499_v41, %v484_v16 }
 0x10c   : > { %v1208_v43 = vpop.eup %1207  ;;  %v507_v44 = vadd.f32 1e-06, %v504_v42 }
 0x10d   : > { %v510_v45 = vmul.f32 %v1208_v43, %v506_v38  ;;  %vm516_vm4 = vweird.f32 %v1208_v43 }
 0x10e   : > { %1209 = vrsqrt.f32 %v507_v44  ;;  %vm517_vm6 = vmor %vm515_vm5, %vm516_vm4  ;;  %vm525_vm8 = vweird.f32 %v507_v44  ;;  %vm754_vm5 = vcmask 138240  }
 0x10f   : > { %v511_v46 = vmul.f32 %v1208_v43, %v510_v45 }
 0x111   : > { %v512_v47 = vmul.f32 0.5, %v511_v46  ;;  %v502_v48 = vpop.xlane.xlu2 %501 }
 0x112   : > { %v505_v49 = vmul.f32 %v502_v48, %v484_v16 }
 0x113   : > { %v513_v50 = vsub.f32 1.5, %v512_v47 }
 0x114   : > { %v1210_v51 = vpop.eup %1209  ;;  %v508_v52 = vadd.f32 1e-06, %v505_v49 }
 0x115   : > { %v514_v53 = vmul.f32 %v1208_v43, %v513_v50  ;;  %v520_v54 = vmul.f32 %v1210_v51, %v507_v44  ;;  %vm526_vm7 = vweird.f32 %v1210_v51  ;;  %v1204_v44 = vld [vmem:[%s1486_s9] ss:$0 sm:$0xff] }
 0x116   : > { %1211 = vrsqrt.f32 %v508_v52  ;;  %vm527_vm9 = vmor %vm525_vm8, %vm526_vm7  ;;  %vm535_vm10 = vweird.f32 %v508_v52 }
 0x117   : > { %v518_v56 = vsel %vm517_vm6, %v1208_v43, %v514_v53  ;;  %v521_v57 = vmul.f32 %v1210_v51, %v520_v54 }
 0x118   : > { %v539_v58 = vmul.f32 %v518_v56, %v488_v19 }
 0x119   : > { %v522_v60 = vmul.f32 0.5, %v521_v57 }
 0x11a   : > { %v545_v61 = vmul.f32 %v1201_v55, %v539_v58  ;;  %v1240_v58 = vmov 0  }
 0x11b   : > { %v523_v62 = vsub.f32 1.5, %v522_v60 }
 0x11c   : > { %v1212_v63 = vpop.eup %1211  ;;  %v551_v1 = vadd.f32 %v1202_v59, %v545_v61 }
 0x11d   : > { %v524_v2 = vmul.f32 %v1210_v51, %v523_v62  ;;  %v530_v3 = vmul.f32 %v1212_v63, %v508_v52  ;;  %vm536_vm11 = vweird.f32 %v1212_v63 }
 0x11e   : > { %v554_v4 = vpack.c.bf16 %v551_v1, %v551_v1  ;;  %vm537_vm12 = vmor %vm535_vm10, %vm536_vm11 }
 0x11f   : > { %v528_v5 = vsel %vm527_vm9, %v1210_v51, %v524_v2  ;;  %v531_v6 = vmul.f32 %v1212_v63, %v530_v3 }
 0x120   : > { %v540_v7 = vmul.f32 %v528_v5, %v489_v26  ;;  %1136 = vmatmul.msk.bf16.vlgmr.msra.gmra.mxu0 %vm467_vm2, %v554_v4  ;;  %v602_v15 = vunpack.c.l.b16 %v554_v4 }
 0x121   : > { %v532_v8 = vmul.f32 0.5, %v531_v6 }
 0x122   : > { %v546_v9 = vmul.f32 %v1201_v55, %v540_v7 }
 0x123   : > { %v533_v10 = vsub.f32 1.5, %v532_v8 }
 0x124   : > { %v552_v11 = vadd.f32 %v1202_v59, %v546_v9 }
 0x125   : > { %v534_v12 = vmul.f32 %v1212_v63, %v533_v10 }
 0x126   : > { %v555_v13 = vpack.c.bf16 %v552_v11, %v552_v11 }
 0x127   : > { %v538_v14 = vsel %vm537_vm12, %v1212_v63, %v534_v12 }
 0x128   : > { %v603_v16 = vunpack.c.l.b16 %v555_v13  ;;  %v541_v17 = vmul.f32 %v538_v14, %v1342_v27  ;;  %v1203_v27 = vld [vmem:[%s1484_s7] ss:$0 sm:$0xff] }
 0x12a   : > { %v605_v18 = vpack.c.b16 %v603_v16, %v602_v15  ;;  %v547_v19 = vmul.f32 %v1201_v55, %v541_v17 }
 0x12c   : > { %1145 = vmatmul.msk.bf16.vlgmr.msra.gmra.mxu1 %vm467_vm2, %v605_v18  ;;  %1155 = vmatmul.msk.bf16.vlgmr.msra.gmra.mxu2 %vm467_vm2, %v605_v18  ;;  %v553_v20 = vadd.f32 %v1202_v59, %v547_v19  ;;  %v1393_v59 = vsel %vm457_vm0, 65535, %v1240_v58 }
 0x12e   : > { %v556_v21 = vpack.c.bf16 %v553_v20, %v553_v20 }
 0x130   : > { %v604_v22 = vunpack.c.l.b16 %v556_v21 }
 0x132   : > { %v606_v23 = vpack.c.b16 %v604_v22, %v604_v22 }
 0x13c   : > { %1146 = vmatmul.msk.bf16.gmra.mxu1 %vm467_vm2, %v606_v23  ;;  %1156 = vmatmul.msk.bf16.gmra.mxu2 %vm467_vm2, %v606_v23 }
 0x19d   : > { %v586_v24 = vpop.f32.mrf.mxu0 }
 0x19e   : > { %v587_v38 = vadd.f32 %v586_v24, %v561_v34 }
 0x1a0   : > { %v590_v42 = vmul.f32 0.35355338, %v587_v38 }
 0x1a2   : > { %v681_v47 = vpack.c.bf16 %v590_v42, %v590_v42 }
 0x1a4   : > { %v777_v55 = vunpack.c.l.b16 %v681_v47 }
 0x1a5   : > { %v588_v25 = vpop.f32.mrf.mxu0 }
 0x1a6   : > { %v778_v1 = vpack.c.b16 %v777_v55, %v777_v55 }
 0x1a9   : > { %v634_v26 = vpop.f32.mrf.mxu1 }
 0x1aa   : > { %v635_v28 = vadd.f32 %v1203_v27, %v634_v26 }
 0x1ac   : > { %v682_v31 = vpack.c.bf16 %v635_v28, %v635_v28 }
 0x1ae   : > { %v691_v35 = vunpack.c.l.b16 %v682_v31 }
 0x1af   : > { %v672_v29 = vpop.f32.mrf.mxu2 }
 0x1b0   : > { %v673_v52 = vadd.f32 %v1204_v44, %v672_v29 }
 0x1b1   : > { %v636_v30 = vpop.f32.mrf.mxu1 }
 0x1b2   : > { %v637_v32 = vadd.f32 %v1203_v27, %v636_v30  ;;  %v685_v60 = vpack.c.bf16 %v673_v52, %v673_v52 }
 0x1b4   : > { %v683_v33 = vpack.c.bf16 %v637_v32, %v637_v32  ;;  %v748_v3 = vunpack.c.l.b16 %v685_v60 }
 0x1b6   : > { %v692_v36 = vunpack.c.l.b16 %v683_v33 }
 0x1b7   : > { %v674_v37 = vpop.f32.mrf.mxu2 }
 0x1b8   : > { %v694_v39 = vpack.c.b16 %v692_v36, %v691_v35  ;;  %v675_v48 = vadd.f32 %v1204_v44, %v674_v37 }
 0x1b9   : > { %v639_v40 = vpop.f32.mrf.mxu1 }
 0x1ba   : > { %v640_v41 = vadd.f32 %v1203_v27, %v639_v40  ;;  %781 = vrot.lane.b32.xlu1 %v694_v39, %s1238_s22  ;;  %v686_v56 = vpack.c.bf16 %v675_v48, %v675_v48  ;;  %v701_v4 = vsel %vm696_vm13, %v694_v39, 0 }
 0x1bc   : > { %v684_v43 = vpack.c.bf16 %v640_v41, %v640_v41  ;;  %v749_v63 = vunpack.c.l.b16 %v686_v56 }
 0x1be   : > { %v693_v45 = vunpack.c.l.b16 %v684_v43  ;;  %v751_v5 = vpack.c.b16 %v749_v63, %v748_v3 }
 0x1bf   : > { %v677_v46 = vpop.f32.mrf.mxu2 }
 0x1c0   : > { %v695_v49 = vpack.c.b16 %v693_v45, %v693_v45  ;;  %v678_v50 = vadd.f32 %v1204_v44, %v677_v46 }
 0x1c1   : > { %v641_v51 = vpop.f32.mrf.mxu1 }
 0x1c2   : > { %v687_v53 = vpack.c.bf16 %v678_v50, %v678_v50  ;;  %858 = vrot.lane.b32.xlu1 %v694_v39, %s1239_s27  ;;  %860 = vrot.lane.b32.xlu2 %v695_v49, %s1239_s27  ;;  %v704_v54 = vsel %vm696_vm13, %v695_v49, 0 }
 0x1c3   : > { %783 = vrot.lane.b32.xlu0 %v695_v49, %s1238_s22  ;;  %712 = vmatpush.bf16.xpose.msra.mxu3 %v704_v54 }
 0x1c4   : > { %v750_v57 = vunpack.c.l.b16 %v687_v53 }
 0x1c6   : > { %v1395_v61 = vpack.c.b16 %v750_v57, %v750_v57 }
 0x1c7   : > { %v679_v62 = vpop.f32.mrf.mxu2 }
 0x1c8   : > { %v761_v2 = vand.u32 %v1393_v59, %v1395_v61 }
 0x1ca   : > { %933 = vrot.lane.b32.xlu1 %v778_v1, %s1241_s28  ;;  %769 = vmatpush.bf16.msrb.mxu0 %v761_v2 }
 0x1cb   : > { %937 = vrot.lane.b32.xlu2 %v695_v49, %s1241_s28  ;;  %779 = vrot.lane.b32.xlu0 %v778_v1, %s1238_s22 }
 0x1cc   : > { %713 = vmatpush.bf16.xpose.msra.mxu3 %v701_v4 }
 0x1ce   : > { %770 = vmatpush.bf16.msrb.mxu0 %v751_v5 }
 0x1d3   : > { %856 = vrot.lane.b32.xlu2 %v778_v1, %s1239_s27  ;;  %935 = vrot.lane.b32.xlu0 %v694_v39, %s1241_s28 }
 0x1d4   : > { %1157 = vmatmul.msk.bf16.vlgmr.msra.gmra.mxu3 %vm696_vm13, %v681_v47 }
 0x21c   : > { %v861_v6 = vpop.permute.xlu2 %860 }
 0x21d   : > { %v869_v7 = vsel %vm696_vm13, %v861_v6, 0 }
 0x21e   : > { %877 = vmatpush.bf16.xpose.msrb.mxu1 %v869_v7 }
 0x225   : > { %v938_v9 = vpop.permute.xlu2 %937 }
 0x226   : > { %v946_v17 = vsel %vm696_vm13, %v938_v9, 0 }
 0x22c   : > { %v782_v8 = vpop.permute.xlu1 %781 }
 0x22d   : > { %v857_v14 = vpop.permute.xlu2 %856  ;;  %v789_v16 = vsel %vm696_vm13, %v782_v8, 0 }
 0x234   : > { %v859_v10 = vpop.permute.xlu1 %858 }
 0x235   : > { %v784_v11 = vpop.permute.xlu0 %783  ;;  %v866_v12 = vsel %vm696_vm13, %v859_v10, 0 }
 0x236   : > { %v792_v13 = vsel %vm696_vm13, %v784_v11, 0  ;;  %878 = vmatpush.bf16.xpose.msrb.mxu1 %v866_v12 }
 0x237   : > { %800 = vmatpush.bf16.xpose.msrb.mxu3 %v792_v13 }
 0x23c   : > { %v934_v20 = vpop.permute.xlu1 %933 }
 0x23d   : > { %v780_v15 = vpop.permute.xlu0 %779  ;;  %1161 = vmatmul.msk.bf16.vlgmr.msrb.gmra.mxu1 %vm696_vm13, %v857_v14 }
 0x23f   : > { %801 = vmatpush.bf16.xpose.msrb.mxu3 %v789_v16 }
 0x245   : > { %v936_v18 = vpop.permute.xlu0 %935 }
 0x246   : > { %v943_v19 = vsel %vm696_vm13, %v936_v18, 0  ;;  %1159 = vmatmul.msk.bf16.vlgmr.msrb.gmra.mxu3 %vm696_vm13, %v780_v15 }
 0x247   : > { %954 = vmatpush.bf16.xpose.msra.mxu3 %v946_v17 }
 0x24f   : > { %955 = vmatpush.bf16.xpose.msra.mxu3 %v943_v19 }
 0x256   : > { %1163 = vmatmul.msk.bf16.vlgmr.msra.gmra.mxu3 %vm696_vm13, %v934_v20 }
 0x257   : > { %v715_v21 = vpop.f32.mrf.mxu3 }
 0x258   : > { %v720_v22 = vsel %vm719_vm14, %v715_v21, -inf }
 0x259   : > { %721 = vmax.xlane.f32.xlu0 %v720_v22 }
 0x25f   : > { %v717_v23 = vpop.f32.mrf.mxu3 }
 0x2ba   : > { %v880_v24 = vpop.f32.mrf.mxu1 }
 0x2bb   : > { %v884_v25 = vsel %vm719_vm14, %v880_v24, -inf }
 0x2bc   : > { %885 = vmax.xlane.f32.xlu1 %v884_v25 }
 0x2c2   : > { %v882_v26 = vpop.f32.mrf.mxu1 }
 0x2c9   : > { %v803_v27 = vpop.f32.mrf.mxu3 }
 0x2ca   : > { %v807_v28 = vsel %vm719_vm14, %v803_v27, -inf }
 0x2cb   : > { %808 = vmax.xlane.f32.xlu2 %v807_v28 }
 0x2cc   : > { %v722_v29 = vpop.xlane.xlu0 %721 }
 0x2cd   : > { %v723_v30 = vsub.f32 %v715_v21, %v722_v29 }
 0x2cf   : > { %v724_v31 = vmul.f32 1.442695, %v723_v30 }
 0x2d1   : > { %1213 = vpow2.f32 %v724_v31  ;;  %v805_v32 = vpop.f32.mrf.mxu3 }
 0x2d7   : > { %v1214_v33 = vpop.eup %1213 }
 0x2d8   : > { %v726_v34 = vsel %vm719_vm14, %v1214_v33, 0.0 }
 0x2d9   : > { %727 = vadd.xlane.f32.xlu2 %v726_v34  ;;  %v957_v35 = vpop.f32.mrf.mxu3 }
 0x2da   : > { %v961_v36 = vsel %vm719_vm14, %v957_v35, -inf }
 0x2db   : > { %962 = vmax.xlane.f32.xlu0 %v961_v36 }
 0x2e1   : > { %v959_v37 = vpop.f32.mrf.mxu3 }
 0x2ef   : > { %832 = vrot.lane.b32.xlu0 %v751_v5, %s1238_s22 }
 0x2f1   : > { %834 = vrot.lane.b32.xlu2 %v1395_v61, %s1238_s22 }
 0x2f9   : > { %909 = vrot.lane.b32.xlu2 %v751_v5, %s1239_s27 }
 0x301   : > { %986 = vrot.lane.b32.xlu2 %v751_v5, %s1241_s28 }
 0x32f   : > { %v886_v38 = vpop.xlane.xlu1 %885 }
 0x330   : > { %v887_v39 = vsub.f32 %v880_v24, %v886_v38 }
 0x332   : > { %v888_v40 = vmul.f32 1.442695, %v887_v39 }
 0x334   : > { %1215 = vpow2.f32 %v888_v40 }
 0x33a   : > { %v1425_v41 = vpop.eup %1215 }
 0x33b   : > { %v890_v42 = vsel %vm719_vm14, %v1425_v41, 0.0 }
 0x33c   : > { %891 = vadd.xlane.f32.xlu0 %v890_v42 }
 0x33e   : > { %v809_v43 = vpop.xlane.xlu2 %808 }
 0x33f   : > { %v810_v44 = vsub.f32 %v803_v27, %v809_v43 }
 0x341   : > { %v811_v45 = vmul.f32 1.442695, %v810_v44 }
 0x343   : > { %1217 = vpow2.f32 %v811_v45 }
 0x349   : > { %v1429_v46 = vpop.eup %1217 }
 0x34a   : > { %v813_v47 = vsel %vm719_vm14, %v1429_v46, 0.0 }
 0x34b   : > { %814 = vadd.xlane.f32.xlu1 %v813_v47 }
 0x34c   : > { %v728_v48 = vpop.xlane.xlu2 %727 }
 0x34d   : > { %1219 = vrcp.f32 %v728_v48  ;;  %v740_v57 = vand.u32 2147483648, %v728_v48  ;;  %v738_v60 = vand.u32 2147483647, %v728_v48  ;;  %vm734_vm0 = vweird.f32 %v728_v48 }
 0x34e   : > { %v963_v49 = vpop.xlane.xlu0 %962 }
 0x34f   : > { %v964_v50 = vsub.f32 %v957_v35, %v963_v49  ;;  %v741_v2 = vor.u32 1.1754944e-38, %v740_v57  ;;  %vm739_vm4 = vcmp.eq.f32.partialorder %v738_v60, 8.507059e+37 }
 0x350   : > { %988 = vrot.lane.b32.xlu0 %v1395_v61, %s1241_s28 }
 0x351   : > { %v965_v51 = vmul.f32 1.442695, %v964_v50 }
 0x353   : > { %v1220_v52 = vpop.eup %1219  ;;  %1221 = vpow2.f32 %v965_v51 }
 0x354   : > { %v730_v53 = vmul.f32 %v1220_v52, %v728_v48  ;;  %v835_v54 = vpop.permute.xlu2 %834  ;;  %vm735_vm15 = vweird.f32 %v1220_v52 }
 0x355   : > { %v841_v55 = vand.u32 %v835_v54, %v1393_v59  ;;  %vm736_vm3 = vmor %vm734_vm0, %vm735_vm15 }
 0x356   : > { %v731_v56 = vsub.f32 1.0, %v730_v53 }
 0x357   : > { %849 = vmatpush.bf16.msra.mxu0 %v841_v55 }
 0x358   : > { %v732_v58 = vmul.f32 %v1220_v52, %v731_v56 }
 0x359   : > { %v1436_v62 = vpop.eup %1221 }
 0x35a   : > { %v733_v63 = vadd.f32 %v1220_v52, %v732_v58  ;;  %v967_v1 = vsel %vm719_vm14, %v1436_v62, 0.0 }
 0x35b   : > { %968 = vadd.xlane.f32.xlu1 %v967_v1 }
 0x35c   : > { %v737_v3 = vsel %vm736_vm3, %v1220_v52, %v733_v63  ;;  %v1443_v9 = vpop.permute.xlu2 %909 }
 0x35d   : > { %v742_v4 = vsel %vm739_vm4, %v741_v2, %v737_v3 }
 0x35e   : > { %v743_v5 = vmul.f32 %v1214_v33, %v742_v4 }
 0x360   : > { %v744_v6 = vpack.c.bf16 %v743_v5, %v743_v5 }
 0x361   : > { %v833_v7 = vpop.permute.xlu0 %832 }
 0x362   : > { %1158 = vmatmul.msk.bf16.vlgmr.msrb.gmra.mxu0 %vm754_vm5, %v744_v6 }
 0x363   : > { %850 = vmatpush.bf16.msra.mxu0 %v833_v7  ;;  %v1032_v7 = vld [vmem:[%s1488_s11] sm:$0x1] }
 0x364   : > { %v987_v15 = vpop.permute.xlu2 %986 }
 0x374   : > { %911 = vrot.lane.b32.xlu1 %v1395_v61, %s1239_s27  ;;  %s450_s27 = scalar_lea.vmem %s1490_s13, %s1492_s26 }
 0x3af   : > { %v892_v8 = vpop.xlane.xlu0 %891 }
 0x3b0   : > { %v904_v44 = vand.u32 2147483648, %v892_v8  ;;  %vm898_vm0 = vweird.f32 %v892_v8  ;;  %v902_v45 = vand.u32 2147483647, %v892_v8 }
 0x3b2   : > { %v905_v48 = vor.u32 1.1754944e-38, %v904_v44  ;;  %vm903_vm4 = vcmp.eq.f32.partialorder %v902_v45, 8.507059e+37 }
 0x3be   : > { %v815_v10 = vpop.xlane.xlu1 %814 }
 0x3bf   : > { %1223 = vrcp.f32 %v815_v10  ;;  %v827_v17 = vand.u32 2147483648, %v815_v10  ;;  %v825_v19 = vand.u32 2147483647, %v815_v10  ;;  %vm821_vm7 = vweird.f32 %v815_v10 }
 0x3c0   : > { %1225 = vrcp.f32 %v892_v8 }
 0x3c1   : > { %v828_v20 = vor.u32 1.1754944e-38, %v827_v17  ;;  %vm826_vm9 = vcmp.eq.f32.partialorder %v825_v19, 8.507059e+37 }
 0x3c2   : > { %v989_v11 = vpop.permute.xlu0 %988 }
 0x3c3   : > { %v995_v12 = vand.u32 %v989_v11, %v1393_v59 }
 0x3c5   : > { %v1224_v13 = vpop.eup %1223  ;;  %1003 = vmatpush.bf16.msrb.mxu0 %v995_v12 }
 0x3c6   : > { %v817_v14 = vmul.f32 %v1224_v13, %v815_v10  ;;  %vm822_vm6 = vweird.f32 %v1224_v13  ;;  %v1226_v25 = vpop.eup %1225 }
 0x3c7   : > { %vm823_vm8 = vmor %vm821_vm7, %vm822_vm6  ;;  %v894_v27 = vmul.f32 %v1226_v25, %v892_v8  ;;  %vm899_vm15 = vweird.f32 %v1226_v25  ;;  %vm1025_vm6 = vcmask 195584  }
 0x3c8   : > { %v818_v16 = vsub.f32 1.0, %v817_v14  ;;  %vm900_vm3 = vmor %vm898_vm0, %vm899_vm15 }
 0x3c9   : > { %1004 = vmatpush.bf16.msrb.mxu0 %v987_v15  ;;  %v895_v30 = vsub.f32 1.0, %v894_v27 }
 0x3ca   : > { %v819_v18 = vmul.f32 %v1224_v13, %v818_v16 }
 0x3cb   : > { %v896_v35 = vmul.f32 %v1226_v25, %v895_v30 }
 0x3cc   : > { %v820_v61 = vadd.f32 %v1224_v13, %v819_v18 }
 0x3cd   : > { %v897_v42 = vadd.f32 %v1226_v25, %v896_v35 }
 0x3ce   : > { %v824_v21 = vsel %vm823_vm8, %v1224_v13, %v820_v61  ;;  %v969_v22 = vpop.xlane.xlu1 %968 }
 0x3cf   : > { %v829_v23 = vsel %vm826_vm9, %v828_v20, %v824_v21  ;;  %1227 = vrcp.f32 %v969_v22  ;;  %v981_v32 = vand.u32 2147483648, %v969_v22  ;;  %v979_v34 = vand.u32 2147483647, %v969_v22 }
 0x3d0   : > { %v830_v24 = vmul.f32 %v1429_v46, %v829_v23  ;;  %vm975_vm11 = vweird.f32 %v969_v22  ;;  %v901_v47 = vsel %vm900_vm3, %v1226_v25, %v897_v42 }
 0x3d1   : > { %v982_v37 = vor.u32 1.1754944e-38, %v981_v32  ;;  %vm980_vm14 = vcmp.eq.f32.partialorder %v979_v34, 8.507059e+37  ;;  %v906_v52 = vsel %vm903_vm4, %v905_v48, %v901_v47 }
 0x3d2   : > { %v831_v26 = vpack.c.bf16 %v830_v24, %v830_v24  ;;  %v907_v53 = vmul.f32 %v1425_v41, %v906_v52  ;;  %v1184_v41 = vld [vmem:[%s1487_s10 + $0x8] sm:$0xff] }
 0x3d3   : > { %1054 = vmatpush.bf16.msra.mxu1 %v1184_v41 }
 0x3d4   : > { %1160 = vmatmul.msk.bf16.vlgmr.msra.gmra.mxu0 %vm754_vm5, %v831_v26  ;;  %v908_v54 = vpack.c.bf16 %v907_v53, %v907_v53 }
 0x3d5   : > { %v1228_v28 = vpop.eup %1227 }
 0x3d6   : > { %v971_v29 = vmul.f32 %v1228_v28, %v969_v22  ;;  %vm976_vm10 = vweird.f32 %v1228_v28 }
 0x3d7   : > { %vm977_vm12 = vmor %vm975_vm11, %vm976_vm10 }
 0x3d8   : > { %v972_v31 = vsub.f32 1.0, %v971_v29 }
 0x3da   : > { %v973_v33 = vmul.f32 %v1228_v28, %v972_v31 }
 0x3dc   : > { %v974_v36 = vadd.f32 %v1228_v28, %v973_v33 }
 0x3de   : > { %v978_v38 = vsel %vm977_vm12, %v1228_v28, %v974_v36 }
 0x3df   : > { %v983_v39 = vsel %vm980_vm14, %v982_v37, %v978_v38  ;;  %v772_v40 = vpop.f32.mrf.mxu0 }
 0x3e0   : > { %v984_v43 = vmul.f32 %v1436_v62, %v983_v39  ;;  %v1183_v62 = vld [vmem:[%s1487_s10] sm:$0xff] }
 0x3e1   : > { %1055 = vmatpush.bf16.msra.mxu1 %v1183_v62 }
 0x3e2   : > { %v985_v46 = vpack.c.bf16 %v984_v43, %v984_v43 }
 0x3e4   : > { %1164 = vmatmul.msk.bf16.vlgmr.msrb.gmra.mxu0 %vm754_vm5, %v985_v46 }
 0x3e6   : > { %v912_v49 = vpop.permute.xlu1 %911 }
 0x3e7   : > { %v774_v50 = vpop.f32.mrf.mxu0  ;;  %v918_v51 = vand.u32 %v912_v49, %v1393_v59 }
 0x3e9   : > { %926 = vmatpush.bf16.msrb.mxu2 %v918_v51 }
 0x3ed   : > { %927 = vmatpush.bf16.msrb.mxu2 %v1443_v9  ;;  %v1061_v9 = vld [vmem:[%s1489_s12] sm:$0x1] }
 0x3f0   : > { %1162 = vmatmul.msk.bf16.vlgmr.msrb.gmra.mxu2 %vm754_vm5, %v908_v54  ;;  %vm1023_vm5 = vcmask 130048  }
 0x451   : > { %v852_v55 = vpop.f32.mrf.mxu0 }
 0x452   : > { %1011 = vrot.lane.b32.xlu0 %v852_v55, %s1242_s29 }
 0x459   : > { %v854_v56 = vpop.f32.mrf.mxu0 }
 0x461   : > { %v1006_v57 = vpop.f32.mrf.mxu0 }
 0x462   : > { %1019 = vrot.lane.b32.xlu2 %v1006_v57, %s1243_s30 }
 0x469   : > { %v1008_v58 = vpop.f32.mrf.mxu0 }
 0x473   : > { %v929_v60 = vpop.f32.mrf.mxu2 }
 0x474   : > { %1015 = vrot.lane.b32.xlu1 %v929_v60, %s1244_s14 }
 0x47b   : > { %v931_v59 = vpop.f32.mrf.mxu2 }
 0x4bc   : > { %v1020_v3 = vpop.permute.xlu2 %1019 }
 0x4c4   : > { %v1012_v63 = vpop.permute.xlu0 %1011 }
 0x4c5   : > { %v1022_v1 = vsel %vm696_vm13, %v772_v40, %v1012_v63 }
 0x4e6   : > { %v1016_v2 = vpop.permute.xlu1 %1015 }
 0x4e7   : > { %v1024_v4 = vsel %vm1023_vm5, %v1022_v1, %v1016_v2 }
 0x4e8   : > { %v1026_v5 = vsel %vm1025_vm6, %v1024_v4, %v1020_v3 }
 0x4e9   : > { %v1027_v6 = vpack.c.bf16 %v1026_v5, %v1026_v5 }
 0x4eb   : > { %1173 = vmatmul.msk.bf16.vlgmr.msra.gmra.mxu1 %vm467_vm2, %v1027_v6 }
 0x568   : > { %v1057_v8 = vpop.f32.mrf.mxu1 }
 0x569   : > { %v1058_v10 = vadd.f32 %v1057_v8, %v1032_v7 }
 0x56b   : > { %v1062_v11 = vmul.f32 %v1061_v9, %v1058_v10 }
 0x56d   : > { %v1063_v12 = vadd.f32 %v1062_v11, %v1333_v0 }
 0x56f   : > { %1064 = vst.msk [vmem:[%s450_s27] sm:$0x1] %vm474_vm1, %v1063_v12 }
 0x570   : > { %v1059_v13 = vpop.f32.mrf.mxu1 }
 0x571 PF: > { %s23_s25 = sadd.s32 1, %s1235_s25  }
 0x572   : > { %p20_p4 = scmp.ge.s32.totalorder %s23_s25, 4  }
 0x574   :  { %22 = sbr.rel (!%p20_p4) target bundleno = 1 (0x1), region = 105 }

// kernel: cait_forward.31
= control target key start
LH: loop header
LB: loop body
LE: loop exit
PB: predicated region body
PF: predicated region fallthrough
CT: control target
= control target key end

     0   :  { %vm110_vm0 = vcmask 254976   ;;  %s227_s1 = inlined_call_operand.vmem [shape: bf16[128,32], index: 1, kind: input, shape index: {}]   ;;  %s228_s2 = inlined_call_operand.vmem [shape: f32[1,32], index: 2, kind: input, shape index: {}]   ;;  %s229_s3 = inlined_call_operand.vmem [shape: f32[1,32], index: 3, kind: input, shape index: {}]   ;;  %s230_s0 = inlined_call_operand.vmem [shape: f32[2,128], index: 0, kind: input, shape index: {}]   ;;  %s231_s4 = inlined_call_operand.vmem [shape: f32[2,32], index: 4, kind: input, shape index: {}]   ;;  %s232_s5 = inlined_call_operand.vmem [shape: f32[2,32], index: 5, kind: output, shape index: {}]  }
   0x1   :  { %v155_v0 = vld [vmem:[%s227_s1 + $0x38] sm:$0xff]  ;;  %v154_v1 = vld [vmem:[%s227_s1 + $0x30] sm:$0xff]  ;;  %v153_v2 = vld [vmem:[%s227_s1 + $0x28] sm:$0xff] }
   0x2   :  { %90 = vmatpush.bf16.msra.mxu0 %v155_v0  ;;  %v152_v3 = vld [vmem:[%s227_s1 + $0x20] sm:$0xff]  ;;  %v151_v4 = vld [vmem:[%s227_s1 + $0x18] sm:$0xff]  ;;  %v150_v5 = vld [vmem:[%s227_s1 + $0x10] sm:$0xff] }
   0x3   :  { %v149_v6 = vld [vmem:[%s227_s1 + $0x8] sm:$0xff]  ;;  %v148_v7 = vld [vmem:[%s227_s1] sm:$0xff] }
   0x4   :  { %v20_v8 = vld [vmem:[%s230_s0] sm:$0x3] }
   0x5   :  { %v21_v9 = vpack.c.bf16 %v20_v8, %v20_v8  ;;  %v156_v10 = vld [vmem:[%s228_s2] ss:$0 sm:$0xff] }
   0x6   :  { %91 = vmatpush.bf16.msra.mxu0 %v154_v1  ;;  %v157_v11 = vld [vmem:[%s229_s3] ss:$0 sm:$0xff] }
   0x7   :  { %v103_v14 = vld [vmem:[%s231_s4] sm:$0x3] }
   0xa   :  { %92 = vmatpush.bf16.msra.mxu0 %v153_v2 }
   0xe   :  { %93 = vmatpush.bf16.msra.mxu0 %v152_v3 }
  0x12   :  { %94 = vmatpush.bf16.msra.mxu0 %v151_v4 }
  0x16   :  { %95 = vmatpush.bf16.msra.mxu0 %v150_v5 }
  0x1a   :  { %96 = vmatpush.bf16.msra.mxu0 %v149_v6 }
  0x1e   :  { %97 = vmatpush.bf16.msra.mxu0 %v148_v7 }
  0x21   :  { %98 = vmatmul.bf16.vlgmr.msra.gmra.mxu0 %v21_v9 }
  0x9e   :  { %v99_v12 = vpop.f32.mrf.mxu0 }
  0x9f   :  { %v100_v13 = vadd.f32 %v156_v10, %v99_v12 }
  0xa1   :  { %v108_v15 = vmul.f32 %v157_v11, %v100_v13 }
  0xa3   :  { %v109_v16 = vadd.f32 %v108_v15, %v103_v14 }
  0xa5   :  { %111 = vst.msk [vmem:[%s232_s5] sm:$0x3] %vm110_vm0, %v109_v16 }
  0xa6   :  { %v101_v17 = vpop.f32.mrf.mxu0 }

// kernel: cait_forward.33
= control target key start
LH: loop header
LB: loop body
LE: loop exit
PB: predicated region body
PF: predicated region fallthrough
CT: control target
= control target key end

     0   :  { %10 = vsyncpa [#allocation3], 0  ;;  %s264_s0 = inlined_call_operand.vmem [shape: f32[2,32], index: 0, kind: input, shape index: {}]   ;;  %s265_s1 = inlined_call_operand.vmem [shape: f32[1,32], index: 1, kind: input, shape index: {}]   ;;  %s266_s2 = inlined_call_operand.hbm [shape: f32[1,32], index: 2, kind: input, shape index: {}]   ;;  %s267_s3 = inlined_call_operand.vmem [shape: bf16[32,128], index: 3, kind: input, shape index: {}]   ;;  %s268_s4 = inlined_call_operand.hbm [shape: f32[1,128], index: 4, kind: input, shape index: {}]   ;;  %s269_s5 = inlined_call_operand.vmem [shape: f32[2,128], index: 5, kind: output, shape index: {}]  }
   0x1   :  { %s21_s20 = sshll.u32 %s266_s2, 4  ;;  %s22_s20 = int_to_ptr.hbm [resolvable:$true] %s21_s20 }
   0x2   :  { %11 = vsyncpa [#allocation5], 0  ;;  %s208_s21 = smov [#allocation2]   ;;  %s34_s25 = sshll.u32 %s268_s4, 4  ;;  %s35_s25 = int_to_ptr.hbm [resolvable:$true] %s34_s25 }
   0x3   :  { %s23_s22 = sshll.u32 %s208_s21, 4  ;;  %s209_s26 = smov [#allocation4]   ;;  %s24_s22 = int_to_ptr.vmem [resolvable:$true] %s23_s22 }
   0x4   :  { %26 = dma.hbm_to_vmem [thread:$0]  %s22_s20, 16, %s24_s22, [#allocation3]  }
   0x5   :  { %s36_s27 = sshll.u32 %s209_s26, 4  ;;  %s37_s27 = int_to_ptr.vmem [resolvable:$true] %s36_s27 }
   0x6   :  { %39 = dma.hbm_to_vmem [thread:$0]  %s35_s25, 16, %s37_s27, [#allocation5]  }
   0x7   :  { %204 = dma.done.wait [#allocation3], 16  }
   0x8   :  { %205 = vsyncadd [#allocation3], 4294967280 }
   0x9   :  { %206 = dma.done.wait [#allocation5], 16  }
   0xa   :  { %207 = vsyncadd [#allocation5], 4294967280  ;;  %vm52_vm0 = vcmask 254976   ;;  %v49_v0 = vld [vmem:[%s264_s0] sm:$0x3]  ;;  %v210_v2 = vmov 32.0  }
   0xb   :  { %v53_v1 = vsel %vm52_vm0, %v49_v0, 0.0  ;;  %152 = vrcp.f32 %v210_v2  ;;  %v145_v14 = vld [vmem:[%s267_s3 + $0x8] sm:$0xff]  ;;  %v144_v15 = vld [vmem:[%s267_s3] sm:$0xff]  ;;  %vm111_vm5 = vcmask 261120  }
   0xc   :  { %54 = vadd.xlane.f32.xlu0 %v53_v1  ;;  %121 = vmatpush.bf16.msra.mxu0 %v145_v14  ;;  %v149_v25 = vld [vmem:[%s265_s1] ss:$0 sm:$0xff]  ;;  %v151_v32 = vld [vmem:[#allocation4] ss:$0 sm:$0xff] }
   0xd   :  { %v150_v28 = vld [vmem:[#allocation2] ss:$0 sm:$0xff] }
  0x10   :  { %122 = vmatpush.bf16.msra.mxu0 %v144_v15 }
  0x11   :  { %v153_v3 = vpop.eup %152 }
  0x12   :  { %v57_v4 = vmul.f32 32.0, %v153_v3  ;;  %vm61_vm1 = vweird.f32 %v153_v3 }
  0x14   :  { %v58_v5 = vsub.f32 1.0, %v57_v4 }
  0x16   :  { %v59_v6 = vmul.f32 %v153_v3, %v58_v5 }
  0x18   :  { %v60_v7 = vadd.f32 %v153_v3, %v59_v6 }
  0x1a   :  { %v62_v8 = vsel %vm61_vm1, %v153_v3, %v60_v7 }
  0x7f   :  { %v55_v9 = vpop.xlane.xlu0 %54 }
  0x80   :  { %v63_v10 = vmul.f32 %v62_v8, %v55_v9 }
  0x82   :  { %v64_v11 = vsub.f32 %v49_v0, %v63_v10 }
  0x84   :  { %v65_v12 = vmul.f32 %v64_v11, %v64_v11 }
  0x86   :  { %v66_v13 = vsel %vm52_vm0, %v65_v12, 0.0 }
  0x87   :  { %67 = vadd.xlane.f32.xlu0 %v66_v13 }
  0xfa   :  { %v68_v16 = vpop.xlane.xlu0 %67 }
  0xfb   :  { %v69_v17 = vmul.f32 %v68_v16, %v62_v8 }
  0xfd   :  { %v70_v18 = vadd.f32 1e-06, %v69_v17 }
  0xff   :  { %154 = vrsqrt.f32 %v70_v18  ;;  %vm77_vm3 = vweird.f32 %v70_v18 }
 0x105   :  { %v155_v19 = vpop.eup %154 }
 0x106   :  { %v72_v20 = vmul.f32 %v155_v19, %v70_v18  ;;  %vm78_vm2 = vweird.f32 %v155_v19 }
 0x107   :  { %vm79_vm4 = vmor %vm77_vm3, %vm78_vm2 }
 0x108   :  { %v73_v21 = vmul.f32 %v155_v19, %v72_v20 }
 0x10a   :  { %v74_v22 = vmul.f32 0.5, %v73_v21 }
 0x10c   :  { %v75_v23 = vsub.f32 1.5, %v74_v22 }
 0x10e   :  { %v76_v24 = vmul.f32 %v155_v19, %v75_v23 }
 0x110   :  { %v80_v26 = vsel %vm79_vm4, %v155_v19, %v76_v24 }
 0x111   :  { %v81_v27 = vmul.f32 %v80_v26, %v64_v11 }
 0x113   :  { %v85_v29 = vmul.f32 %v149_v25, %v81_v27 }
 0x115   :  { %v89_v30 = vadd.f32 %v150_v28, %v85_v29 }
 0x117   :  { %v90_v31 = vpack.c.bf16 %v89_v30, %v89_v30 }
 0x119   :  { %143 = vmatmul.msk.bf16.vlgmr.msra.gmra.mxu0 %vm111_vm5, %v90_v31 }
 0x196   :  { %v124_v33 = vpop.f32.mrf.mxu0 }
 0x197   :  { %v125_v34 = vadd.f32 %v151_v32, %v124_v33 }
 0x199   :  { %128 = vst [vmem:[%s269_s5] sm:$0x3] %v125_v34 }
 0x19e   :  { %v126_v35 = vpop.f32.mrf.mxu0 }
 0x19f   :  { %133 = vsyncpa [#allocation3], 1 }
 0x1a0   :  { %134 = vsyncpa [#allocation5], 1 }

// kernel: cait_forward.35
= control target key start
LH: loop header
LB: loop body
LE: loop exit
PB: predicated region body
PF: predicated region fallthrough
CT: control target
= control target key end

     0   :  { %vm25_vm0 = vcmask 254976   ;;  %s220_s0 = inlined_call_operand.vmem [shape: f32[2,32], index: 0, kind: input, shape index: {}]   ;;  %s221_s1 = inlined_call_operand.vmem [shape: f32[1,32], index: 1, kind: input, shape index: {}]   ;;  %s222_s2 = inlined_call_operand.vmem [shape: f32[1,32], index: 2, kind: input, shape index: {}]   ;;  %s223_s3 = inlined_call_operand.vmem [shape: bf16[32,10], index: 3, kind: input, shape index: {}]   ;;  %s224_s4 = inlined_call_operand.vmem [shape: f32[1,10], index: 4, kind: input, shape index: {}]   ;;  %s225_s5 = inlined_call_operand.hbm [shape: f32[2,10], index: 5, kind: output, shape index: {}]  }
   0x1   :  { %v22_v0 = vld [vmem:[%s220_s0] sm:$0x3] }
   0x2   :  { %v26_v1 = vsel %vm25_vm0, %v22_v0, 0.0 }
   0x3   :  { %27 = vadd.xlane.f32.xlu0 %v26_v1 }
   0x4   :  { %10 = vsyncpa [#allocation3], 0  ;;  %v165_v2 = vmov 32.0   ;;  %v129_v14 = vld [vmem:[%s223_s3 + $0x8] sm:$0xff]  ;;  %v128_v15 = vld [vmem:[%s223_s3] sm:$0xff]  ;;  %vm84_vm5 = vcmask 261120  }
   0x5   :  { %135 = vrcp.f32 %v165_v2  ;;  %94 = vmatpush.bf16.msra.mxu0 %v129_v14  ;;  %v132_v25 = vld [vmem:[%s221_s1] ss:$0 sm:$0xff]  ;;  %s166_s28 = smov [#allocation2]   ;;  %s110_s1 = sshll.u32 %s225_s5, 4  ;;  %vm101_vm6 = vcmask 74752   ;;  %s111_s1 = int_to_ptr.hbm [resolvable:$true] %s110_s1 }
   0x6   :  { %v133_v28 = vld [vmem:[%s222_s2] ss:$0 sm:$0xff]  ;;  %s108_s29 = sshll.u32 %s166_s28, 4  ;;  %s109_s29 = int_to_ptr.vmem [resolvable:$true] %s108_s29 }
   0x7   :  { %v134_v32 = vld [vmem:[%s224_s4] ss:$0 sm:$0xff] }
   0x9   :  { %95 = vmatpush.bf16.msra.mxu0 %v128_v15 }
   0xb   :  { %v136_v3 = vpop.eup %135 }
   0xc   :  { %v30_v4 = vmul.f32 32.0, %v136_v3  ;;  %vm34_vm1 = vweird.f32 %v136_v3 }
   0xe   :  { %v31_v5 = vsub.f32 1.0, %v30_v4 }
  0x10   :  { %v32_v6 = vmul.f32 %v136_v3, %v31_v5 }
  0x12   :  { %v33_v7 = vadd.f32 %v136_v3, %v32_v6 }
  0x14   :  { %v35_v8 = vsel %vm34_vm1, %v136_v3, %v33_v7 }
  0x76   :  { %v28_v9 = vpop.xlane.xlu0 %27 }
  0x77   :  { %v36_v10 = vmul.f32 %v35_v8, %v28_v9 }
  0x79   :  { %v37_v11 = vsub.f32 %v22_v0, %v36_v10 }
  0x7b   :  { %v38_v12 = vmul.f32 %v37_v11, %v37_v11 }
  0x7d   :  { %v39_v13 = vsel %vm25_vm0, %v38_v12, 0.0 }
  0x7e   :  { %40 = vadd.xlane.f32.xlu0 %v39_v13 }
  0xf1   :  { %v41_v16 = vpop.xlane.xlu0 %40 }
  0xf2   :  { %v42_v17 = vmul.f32 %v41_v16, %v35_v8 }
  0xf4   :  { %v43_v18 = vadd.f32 1e-06, %v42_v17 }
  0xf6   :  { %137 = vrsqrt.f32 %v43_v18  ;;  %vm50_vm3 = vweird.f32 %v43_v18 }
  0xfc   :  { %v138_v19 = vpop.eup %137 }
  0xfd   :  { %v45_v20 = vmul.f32 %v138_v19, %v43_v18  ;;  %vm51_vm2 = vweird.f32 %v138_v19 }
  0xfe   :  { %vm52_vm4 = vmor %vm50_vm3, %vm51_vm2 }
  0xff   :  { %v46_v21 = vmul.f32 %v138_v19, %v45_v20 }
 0x101   :  { %v47_v22 = vmul.f32 0.5, %v46_v21 }
 0x103   :  { %v48_v23 = vsub.f32 1.5, %v47_v22 }
 0x105   :  { %v49_v24 = vmul.f32 %v138_v19, %v48_v23 }
 0x107   :  { %v53_v26 = vsel %vm52_vm4, %v138_v19, %v49_v24 }
 0x108   :  { %v54_v27 = vmul.f32 %v53_v26, %v37_v11 }
 0x10a   :  { %v58_v29 = vmul.f32 %v132_v25, %v54_v27 }
 0x10c   :  { %v62_v30 = vadd.f32 %v133_v28, %v58_v29 }
 0x10e   :  { %v63_v31 = vpack.c.bf16 %v62_v30, %v62_v30 }
 0x110   :  { %127 = vmatmul.msk.bf16.vlgmr.msra.gmra.mxu0 %vm84_vm5, %v63_v31 }
 0x18d   :  { %v97_v33 = vpop.f32.mrf.mxu0 }
 0x18e   :  { %v98_v34 = vadd.f32 %v134_v32, %v97_v33 }
 0x190   :  { %102 = vst.msk [vmem:[#allocation2] sm:$0x3] %vm101_vm6, %v98_v34 }
 0x191   :  { %113 = dma.vmem_to_hbm [thread:$0]  %s109_s29, 32, %s111_s1, [#allocation3]  }
 0x195   :  { %v99_v35 = vpop.f32.mrf.mxu0 }
 0x196   :  { %163 = dma.done.wait [#allocation3], 32  }
 0x197   :  { %164 = vsyncadd [#allocation3], 4294967264 }
 0x198   :  { %118 = vsyncpa [#allocation3], 1 }

</bundles_post_ra>
